<compile_context>
chip_gen: v5e
topology: v5e:2x2
jax: 0.10.0
libtpu: 0.0.40
codegen_flags: <defaults>
</compile_context>

<pallas_src>
import functools
import math

import jax
import jax.numpy as jnp
from jax.experimental import pallas as pl
from jax.experimental.pallas import tpu as pltpu


def _round_up(x, m):
    return ((x + m - 1) // m) * m


def _pick_vmem_limit_bytes():
    # v5e/v6e have 128 MiB physical VMEM -> raise the scoped limit; v7x has 64 MiB -> stay
    # conservative (32 MiB) so double-buffering still fits.
    try:
        kind = jax.devices()[0].device_kind.lower()
    except Exception:
        return 32 * 1024 * 1024
    if "v6" in kind:
        return 96 * 1024 * 1024
    if "v5" in kind:
        return 64 * 1024 * 1024
    return 32 * 1024 * 1024


VMEM_LIMIT = _pick_vmem_limit_bytes()


# ----------------------------- Tiled matmul with fused epilogues -----------------------------

def _ln_math(x, g, b, eps):
    mean = jnp.mean(x, axis=-1, keepdims=True)
    var = jnp.mean(jnp.square(x - mean), axis=-1, keepdims=True)
    y = (x - mean) * jax.lax.rsqrt(var + eps)
    return y * g + b


def _matmul_kernel(a_ref, b_ref, bias_ref, o_ref, acc_ref, *, activation, valid_n):
    @pl.when(pl.program_id(2) == 0)
    def _():
        acc_ref[...] = jnp.zeros(acc_ref.shape, acc_ref.dtype)

    a = a_ref[...]
    if a.dtype != jnp.bfloat16:
        a = a.astype(jnp.bfloat16)          # in-kernel cast: no wrapper-side activation cast pass
    acc_ref[...] += jnp.dot(a, b_ref[...], preferred_element_type=jnp.float32)

    @pl.when(pl.program_id(2) == pl.num_programs(2) - 1)
    def _():
        acc = acc_ref[...] + bias_ref[...]
        if activation == "relu":
            acc = jnp.maximum(acc, 0.0)
        elif activation == "log_softmax":
            if valid_n is not None and valid_n < acc.shape[-1]:
                col = jax.lax.broadcasted_iota(jnp.int32, acc.shape, 1)
                acc = jnp.where(col < valid_n, acc, -jnp.inf)
            m = jnp.max(acc, axis=-1, keepdims=True)
            z = acc - m
            lse = jnp.log(jnp.sum(jnp.exp(z), axis=-1, keepdims=True))
            acc = z - lse
        o_ref[...] = acc.astype(o_ref.dtype)


def _matmul_add_ln_kernel(a_ref, b_ref, bias_ref, res_ref, g_ref, bt_ref, o_ref, acc_ref, *, eps):
    @pl.when(pl.program_id(2) == 0)
    def _():
        acc_ref[...] = jnp.zeros(acc_ref.shape, acc_ref.dtype)

    a = a_ref[...]
    if a.dtype != jnp.bfloat16:
        a = a.astype(jnp.bfloat16)
    acc_ref[...] += jnp.dot(a, b_ref[...], preferred_element_type=jnp.float32)

    @pl.when(pl.program_id(2) == pl.num_programs(2) - 1)
    def _():
        x = acc_ref[...] + bias_ref[...] + res_ref[...].astype(jnp.float32)
        o_ref[...] = _ln_math(x, g_ref[...], bt_ref[...], eps).astype(o_ref.dtype)


def pallas_matmul(a, w, bias, activation="none", out_dtype=jnp.float32,
                  residual=None, gamma=None, beta=None, valid_n=None, eps=1e-5,
                  tm=256, tn=512, tk=1024):
    """a: (M, K); w: (K, N) bf16 pre-cast; bias: (1, N) f32 pre-shaped.

    activation in {"none","relu","log_softmax","add_ln"}.  "add_ln" fuses LN(result + residual)
    into the finalize epilogue (tn forced to N so the full row is visible).  M uses a cdiv grid
    (no activation padding / trailing slice); K/N tiles are chosen so they divide exactly.
    """
    M, K = a.shape
    K2, N = w.shape
    assert K == K2
    tm_ = M if M <= tm else tm
    tk_ = K if (K <= tk or K % tk != 0) else tk
    if activation in ("log_softmax", "add_ln"):
        tn_ = N                      # epilogue needs the full output row in one block
    else:
        tn_ = N if (N <= tn or N % tn != 0) else tn

    grid = (pl.cdiv(M, tm_), N // tn_, K // tk_)
    a_spec = pl.BlockSpec((tm_, tk_), lambda i, j, k: (i, k))
    w_spec = pl.BlockSpec((tk_, tn_), lambda i, j, k: (k, j))
    b_spec = pl.BlockSpec((1, tn_), lambda i, j, k: (0, j))
    common = dict(
        out_shape=jax.ShapeDtypeStruct((M, N), out_dtype),
        grid=grid,
        out_specs=pl.BlockSpec((tm_, tn_), lambda i, j, k: (i, j)),
        scratch_shapes=[pltpu.VMEM((tm_, tn_), jnp.float32)],
        compiler_params=pltpu.CompilerParams(
            dimension_semantics=("parallel", "parallel", "arbitrary"),
            vmem_limit_bytes=VMEM_LIMIT),
    )

    if activation == "add_ln":
        assert residual is not None and gamma is not None and beta is not None
        r_spec = pl.BlockSpec((tm_, tn_), lambda i, j, k: (i, 0))
        v_spec = pl.BlockSpec((1, tn_), lambda i, j, k: (0, 0))
        return pl.pallas_call(
            functools.partial(_matmul_add_ln_kernel, eps=eps),
            in_specs=[a_spec, w_spec, b_spec, r_spec, v_spec, v_spec],
            **common)(a, w, bias, residual, gamma, beta)

    return pl.pallas_call(
        functools.partial(_matmul_kernel, activation=activation, valid_n=valid_n),
        in_specs=[a_spec, w_spec, b_spec],
        **common)(a, w, bias)


# ----------------------------- Fused multi-slab projection (QKV / KV) -----------------------------

def _fused_proj_kernel(a_ref, w_ref, b_ref, o_ref, acc_ref):
    @pl.when(pl.program_id(2) == 0)
    def _():
        acc_ref[...] = jnp.zeros(acc_ref.shape, acc_ref.dtype)

    a = a_ref[...]
    if a.dtype != jnp.bfloat16:
        a = a.astype(jnp.bfloat16)
    acc_ref[...] += jnp.dot(a, w_ref[0], preferred_element_type=jnp.float32)

    @pl.when(pl.program_id(2) == pl.num_programs(2) - 1)
    def _():
        o_ref[0] = (acc_ref[...] + b_ref[0]).astype(o_ref.dtype)


def pallas_fused_proj(a, w, b, out_dtype=jnp.bfloat16, tm=256, tk=1024):
    """a: (M, K); w: (S, K, E) bf16; b: (S, 1, E) f32  ->  (S, M, E) slab-contiguous output."""
    M, K = a.shape
    S, K2, E = w.shape
    assert K == K2
    tm_ = M if M <= tm else tm
    tk_ = K if (K <= tk or K % tk != 0) else tk
    grid = (pl.cdiv(M, tm_), S, K // tk_)
    return pl.pallas_call(
        _fused_proj_kernel,
        out_shape=jax.ShapeDtypeStruct((S, M, E), out_dtype),
        grid=grid,
        in_specs=[
            pl.BlockSpec((tm_, tk_), lambda i, s, k: (i, k)),
            pl.BlockSpec((1, tk_, E), lambda i, s, k: (s, k, 0)),
            pl.BlockSpec((1, 1, E), lambda i, s, k: (s, 0, 0)),
        ],
        out_specs=pl.BlockSpec((1, tm_, E), lambda i, s, k: (s, i, 0)),
        scratch_shapes=[pltpu.VMEM((tm_, E), jnp.float32)],
        compiler_params=pltpu.CompilerParams(
            dimension_semantics=("parallel", "parallel", "arbitrary"),
            vmem_limit_bytes=VMEM_LIMIT),
    )(a, w, b)


# ----------------------------- LayerNorm (standalone, for final enc/dec norms) -----------------------------

def _layernorm_kernel(x_ref, g_ref, b_ref, o_ref, *, eps):
    x = x_ref[...].astype(jnp.float32)
    o_ref[...] = _ln_math(x, g_ref[...], b_ref[...], eps).astype(o_ref.dtype)


def pallas_layer_norm(x, gamma, beta, eps=1e-5, tm=256):
    shape = x.shape
    E = shape[-1]
    x2 = x.reshape(-1, E)
    M = x2.shape[0]
    tm_ = M if M <= tm else tm
    out = pl.pallas_call(
        functools.partial(_layernorm_kernel, eps=eps),
        out_shape=jax.ShapeDtypeStruct((M, E), jnp.float32),
        grid=(pl.cdiv(M, tm_),),
        in_specs=[pl.BlockSpec((tm_, E), lambda i: (i, 0)),
                  pl.BlockSpec((1, E), lambda i: (0, 0)),
                  pl.BlockSpec((1, E), lambda i: (0, 0))],
        out_specs=pl.BlockSpec((tm_, E), lambda i: (i, 0)),
        compiler_params=pltpu.CompilerParams(
            dimension_semantics=("parallel",),
            vmem_limit_bytes=VMEM_LIMIT),
    )(x2, gamma, beta)
    return out.reshape(shape)


# ----------------------------- Flash attention (online softmax, lane-dense output) -----------------------------

def _flash_attn_kernel(q_ref, k_ref, v_ref, bias_ref, o_ref, m_sc, l_sc, acc_sc,
                       *, num_heads, scale):
    ik = pl.program_id(2)

    @pl.when(ik == 0)
    def _():
        m_sc[...] = jnp.full(m_sc.shape, -jnp.inf, m_sc.dtype)
        l_sc[...] = jnp.zeros(l_sc.shape, l_sc.dtype)
        acc_sc[...] = jnp.zeros(acc_sc.shape, acc_sc.dtype)

    q = q_ref[0]                           # (tq, E)  bf16
    k = k_ref[0]                           # (tkv, E) bf16
    v = v_ref[0]                           # (tkv, E) bf16
    bias = bias_ref[0]                     # (1, tkv) f32 additive key-padding bias
    E = q.shape[-1]
    dh = E // num_heads

    for h in range(num_heads):
        lo, hi = h * dh, (h + 1) * dh
        s = jax.lax.dot_general(q[:, lo:hi], k[:, lo:hi],
                                (((1,), (1,)), ((), ())),
                                preferred_element_type=jnp.float32)      # (tq, tkv)
        s = s * scale + bias
        m_prev = m_sc[h]                                                  # (tq, 1)
        m_new = jnp.maximum(m_prev, jnp.max(s, axis=-1, keepdims=True))
        alpha = jnp.exp(m_prev - m_new)
        p = jnp.exp(s - m_new)
        l_sc[h] = alpha * l_sc[h] + jnp.sum(p, axis=-1, keepdims=True)
        acc_sc[h] = alpha * acc_sc[h] + jnp.dot(p.astype(v.dtype), v[:, lo:hi],
                                                preferred_element_type=jnp.float32)
        m_sc[h] = m_new

    @pl.when(ik == pl.num_programs(2) - 1)
    def _():
        heads = [acc_sc[h] * pl.reciprocal(l_sc[h], approx=True) for h in range(num_heads)]
        # Lane-dense (tq, E) output: heads concatenated on the lane axis in-kernel.
        o_ref[0] = jnp.concatenate(heads, axis=-1).astype(o_ref.dtype)


def pallas_flash_attention(q, k, v, kpm_bias, num_heads, out_dtype=jnp.bfloat16,
                           tq=256, tkv=512):
    """q: (B, Lq, E), k/v: (B, Lk, E) bf16 (heads packed on the lane axis);
    kpm_bias: (B, 1, Lk) f32 additive key-padding bias.  Returns (B, Lq, E)."""
    B, Lq, E = q.shape
    Lk = k.shape[1]
    dh = E // num_heads
    scale = 1.0 / math.sqrt(dh)
    tq_ = Lq if Lq <= tq else tq
    tkv_ = Lk if Lk <= tkv else tkv
    Lkp = _round_up(Lk, tkv_)
    if Lkp != Lk:
        # One-time pad so every Lk tile is full; bias=-1e9 keeps the softmax exact.
        k = jnp.pad(k, ((0, 0), (0, Lkp - Lk), (0, 0)))
        v = jnp.pad(v, ((0, 0), (0, Lkp - Lk), (0, 0)))
        kpm_bias = jnp.pad(kpm_bias, ((0, 0), (0, 0), (0, Lkp - Lk)), constant_values=-1e9)

    grid = (B, pl.cdiv(Lq, tq_), Lkp // tkv_)
    return pl.pallas_call(
        functools.partial(_flash_attn_kernel, num_heads=num_heads, scale=scale),
        out_shape=jax.ShapeDtypeStruct((B, Lq, E), out_dtype),
        grid=grid,
        in_specs=[
            pl.BlockSpec((1, tq_, E), lambda b, iq, ik: (b, iq, 0)),
            pl.BlockSpec((1, tkv_, E), lambda b, iq, ik: (b, ik, 0)),
            pl.BlockSpec((1, tkv_, E), lambda b, iq, ik: (b, ik, 0)),
            pl.BlockSpec((1, 1, tkv_), lambda b, iq, ik: (b, 0, ik)),
        ],
        out_specs=pl.BlockSpec((1, tq_, E), lambda b, iq, ik: (b, iq, 0)),
        scratch_shapes=[pltpu.VMEM((num_heads, tq_, 1), jnp.float32),
                        pltpu.VMEM((num_heads, tq_, 1), jnp.float32),
                        pltpu.VMEM((num_heads, tq_, dh), jnp.float32)],
        compiler_params=pltpu.CompilerParams(
            dimension_semantics=("parallel", "parallel", "arbitrary"),
            vmem_limit_bytes=VMEM_LIMIT),
    )(q, k, v, kpm_bias)


# ----------------------------- Conv front-end: 3-tap accumulate + fused GLU -----------------------------

def _conv3_glu_kernel(x0_ref, x1_ref, x2_ref, w_ref, b_ref, o_ref, acc_ref):
    @pl.when(pl.program_id(1) == 0)
    def _():
        acc_ref[...] = jnp.zeros(acc_ref.shape, acc_ref.dtype)

    for t, xr in enumerate((x0_ref, x1_ref, x2_ref)):
        x = xr[...]
        if x.dtype != jnp.bfloat16:
            x = x.astype(jnp.bfloat16)
        acc_ref[...] += jnp.dot(x, w_ref[t], preferred_element_type=jnp.float32)

    @pl.when(pl.program_id(1) == pl.num_programs(1) - 1)
    def _():
        acc = acc_ref[...] + b_ref[...]
        c = acc.shape[-1] // 2
        o_ref[...] = (acc[:, :c] * jax.nn.sigmoid(acc[:, c:])).astype(o_ref.dtype)


def conv1d_glu(x_btc, layer, stride, out_dtype, tm=256, tk=512):
    """Conv1d(kernel=3, padding=1, stride) + GLU(dim=channels).
    x_btc: (B, T, Cin); layer: dict(w=(3, Cin, Cout) bf16, b=(1, Cout) f32)."""
    B, T, Cin = x_btc.shape
    w, b = layer["w"], layer["b"]
    Cout = w.shape[2]
    K, pad = 3, 1
    T_out = (T + 2 * pad - K) // stride + 1
    xp = jnp.pad(x_btc, ((0, 0), (pad, pad), (0, 0)))
    # Three shifted (strided) views -> three dots accumulated into one VMEM accumulator
    # (no im2col patch tensor).  stride is STATIC here.
    views = [
        jax.lax.slice(xp, (0, kk, 0), (B, kk + (T_out - 1) * stride + 1, Cin),
                      (1, stride, 1)).reshape(B * T_out, Cin)
        for kk in range(K)
    ]
    M = B * T_out
    tm_ = M if M <= tm else tm
    tk_ = Cin if (Cin <= tk or Cin % tk != 0) else tk
    grid = (pl.cdiv(M, tm_), Cin // tk_)
    out = pl.pallas_call(
        _conv3_glu_kernel,
        out_shape=jax.ShapeDtypeStruct((M, Cout // 2), out_dtype),
        grid=grid,
        in_specs=[pl.BlockSpec((tm_, tk_), lambda i, k: (i, k))] * 3 + [
            pl.BlockSpec((K, tk_, Cout), lambda i, k: (0, k, 0)),
            pl.BlockSpec((1, Cout), lambda i, k: (0, 0)),
        ],
        out_specs=pl.BlockSpec((tm_, Cout // 2), lambda i, k: (i, 0)),
        scratch_shapes=[pltpu.VMEM((tm_, Cout), jnp.float32)],
        compiler_params=pltpu.CompilerParams(
            dimension_semantics=("parallel", "arbitrary"),
            vmem_limit_bytes=VMEM_LIMIT),
    )(*views, w, b)
    return out.reshape(B, T_out, Cout // 2)


# ----------------------------- Attention wrappers -----------------------------

def self_attention(x, p, kpm_bias, num_heads):
    B, L, E = x.shape
    qkv = pallas_fused_proj(x.reshape(B * L, E), p["qkv_w"], p["qkv_b"])    # (3, B*L, E) bf16
    q = qkv[0].reshape(B, L, E)
    k = qkv[1].reshape(B, L, E)
    v = qkv[2].reshape(B, L, E)
    return pallas_flash_attention(q, k, v, kpm_bias, num_heads)             # (B, L, E) bf16


def cross_attention(x, mem, p, kpm_bias, num_heads):
    B, Lq, E = x.shape
    Lk = mem.shape[1]
    q = pallas_matmul(x.reshape(B * Lq, E), p["q_w"], p["q_b"],
                      out_dtype=jnp.bfloat16).reshape(B, Lq, E)
    kv = pallas_fused_proj(mem.reshape(B * Lk, E), p["kv_w"], p["kv_b"])    # (2, B*Lk, E) bf16
    k = kv[0].reshape(B, Lk, E)
    v = kv[1].reshape(B, Lk, E)
    return pallas_flash_attention(q, k, v, kpm_bias, num_heads)


# ----------------------------- Transformer layers (batch-first, post-norm) -----------------------------

def encoder_layer(x, p, kpm_bias, num_heads):
    B, L, E = x.shape
    attn = self_attention(x, p["self_attn"], kpm_bias, num_heads)
    x2 = pallas_matmul(attn.reshape(B * L, E), p["self_attn"]["out_w"], p["self_attn"]["out_b"],
                       activation="add_ln", residual=x.reshape(B * L, E),
                       gamma=p["norm1_w"], beta=p["norm1_b"])
    h = pallas_matmul(x2, p["lin1_w"], p["lin1_b"], activation="relu", out_dtype=jnp.bfloat16)
    x2 = pallas_matmul(h, p["lin2_w"], p["lin2_b"], activation="add_ln",
                       residual=x2, gamma=p["norm2_w"], beta=p["norm2_b"])
    return x2.reshape(B, L, E)


def decoder_layer(x, mem, p, tgt_bias, mem_bias, num_heads):
    B, L, E = x.shape
    a = self_attention(x, p["self_attn"], tgt_bias, num_heads)
    x2 = pallas_matmul(a.reshape(B * L, E), p["self_attn"]["out_w"], p["self_attn"]["out_b"],
                       activation="add_ln", residual=x.reshape(B * L, E),
                       gamma=p["norm1_w"], beta=p["norm1_b"])
    xb = x2.reshape(B, L, E)
    a = cross_attention(xb, mem, p["cross_attn"], mem_bias, num_heads)
    x2 = pallas_matmul(a.reshape(B * L, E), p["cross_attn"]["out_w"], p["cross_attn"]["out_b"],
                       activation="add_ln", residual=x2,
                       gamma=p["norm2_w"], beta=p["norm2_b"])
    h = pallas_matmul(x2, p["lin1_w"], p["lin1_b"], activation="relu", out_dtype=jnp.bfloat16)
    x2 = pallas_matmul(h, p["lin2_w"], p["lin2_b"], activation="add_ln",
                       residual=x2, gamma=p["norm3_w"], beta=p["norm3_b"])
    return x2.reshape(B, L, E)


# ----------------------------- Positional encoding (matches reference, denominator=1000) -----------------------------

def build_positional_encoding(d_model, max_pos=1000):
    denominator = 1000.0
    pos = jnp.arange(max_pos, dtype=jnp.float32)[:, None]
    i = jnp.arange(d_model // 2, dtype=jnp.float32)[None, :]
    angle = pos / denominator ** (2.0 * i / d_model)
    pe = jnp.zeros((max_pos, d_model), jnp.float32)
    pe = pe.at[:, 0::2].set(jnp.sin(angle))
    pe = pe.at[:, 1::2].set(jnp.cos(angle))
    return pe                                  # (max_pos, d_model)


# ----------------------------- Full forward -----------------------------

def transformer_stt_forward(params, input_tensor, input_mask, *, num_heads, num_tokens,
                            front_strides):
    # ---- conv front-end; input is NCL like PyTorch, internally (B, T, C) ----
    x = jnp.transpose(input_tensor, (0, 2, 1))                       # (B, T, 80)
    n_conv = len(front_strides)
    for idx, (layer, stride) in enumerate(zip(params["front_end"], front_strides)):
        out_dt = jnp.float32 if idx == n_conv - 1 else jnp.bfloat16  # last conv feeds the residual chain
        x = conv1d_glu(x, layer, stride, out_dt)                     # (B, T', C)

    B, L, E = x.shape
    x = x + params["pe"][:L][None, :, :]                             # batch-first equivalent of pe[:L]

    # key-padding bias built ONCE per forward (shared by every attention call)
    kpm_bias = jnp.where(input_mask, -1e9, 0.0).astype(jnp.float32)[:, None, :]   # (B, 1, L)

    # ---- encoder ----
    mem = x
    for p in params["encoder_layers"]:
        mem = encoder_layer(mem, p, kpm_bias, num_heads)
    mem = pallas_layer_norm(mem, params["enc_norm_w"], params["enc_norm_b"])

    # ---- decoder (tgt = same tensor, no causal mask, matching the reference forward) ----
    y = x
    for p in params["decoder_layers"]:
        y = decoder_layer(y, mem, p, kpm_bias, kpm_bias, num_heads)
    y = pallas_layer_norm(y, params["dec_norm_w"], params["dec_norm_b"])

    # ---- CTC head with fused masked log_softmax (vocab pre-padded to 128 lanes at prep time) ----
    logp = pallas_matmul(y.reshape(B * L, E), params["ctc_w_pad"], params["ctc_b_pad"],
                         activation="log_softmax", valid_n=num_tokens)
    return logp[:, :num_tokens].reshape(B, L, num_tokens)


# ----------------------------- Parameter init (PyTorch layout) + one-time prep -----------------------------

def init_params(key, *, Dc, Dtr, n_enc, n_dec, ffn, num_tokens):
    Dc_2 = Dc // 2
    keys = iter(jax.random.split(key, 512))
    scale = 0.05

    def dense(out_d, in_d):
        w = jax.random.normal(next(keys), (out_d, in_d), jnp.float32) * scale
        b = jax.random.normal(next(keys), (out_d,), jnp.float32) * scale
        return w, b

    def conv(out_c, in_c, k=3):
        w = jax.random.normal(next(keys), (out_c, in_c, k), jnp.float32) * scale
        b = jax.random.normal(next(keys), (out_c,), jnp.float32) * scale
        return w, b

    def mha():
        wi = jax.random.normal(next(keys), (3 * Dtr, Dtr), jnp.float32) * scale
        bi = jnp.zeros((3 * Dtr,), jnp.float32)
        wo, bo = dense(Dtr, Dtr)
        return dict(in_proj_weight=wi, in_proj_bias=bi, out_proj_weight=wo, out_proj_bias=bo)

    def norm():
        return jnp.ones((Dtr,), jnp.float32), jnp.zeros((Dtr,), jnp.float32)

    front_specs = [(80, Dc), (Dc_2, Dc), (Dc_2, Dc), (Dc_2, Dc), (Dc_2, Dc), (Dc_2, 2 * Dtr)]
    front_end = [conv(cout, cin) for (cin, cout) in front_specs]

    enc_layers = []
    for _ in range(n_enc):
        enc_layers.append(dict(self_attn=mha(),
                               linear1=dense(ffn, Dtr), linear2=dense(Dtr, ffn),
                               norm1=norm(), norm2=norm()))
    dec_layers = []
    for _ in range(n_dec):
        dec_layers.append(dict(self_attn=mha(), cross_attn=mha(),
                               linear1=dense(ffn, Dtr), linear2=dense(Dtr, ffn),
                               norm1=norm(), norm2=norm(), norm3=norm()))

    return dict(front_end=front_end, encoder_layers=enc_layers, decoder_layers=dec_layers,
                enc_norm=norm(), dec_norm=norm(), ctc=dense(num_tokens, Dtr))


def prepare_params(raw, *, Dtr, num_tokens):
    """One-time layout prep: pre-transpose, pre-cast to bf16, pre-pad the CTC vocab, stack slabs."""
    E = Dtr

    def prep_mha(p):
        wi, bi = p["in_proj_weight"], p["in_proj_bias"]
        qkv_w = jnp.stack([wi[s * E:(s + 1) * E].T for s in range(3)]).astype(jnp.bfloat16)   # (3,E,E)
        qkv_b = jnp.stack([bi[s * E:(s + 1) * E].reshape(1, E) for s in range(3)]
                          ).astype(jnp.float32)                                               # (3,1,E)
        return dict(qkv_w=qkv_w, qkv_b=qkv_b,
                    q_w=qkv_w[0], q_b=qkv_b[0],
                    kv_w=qkv_w[1:], kv_b=qkv_b[1:],
                    out_w=p["out_proj_weight"].T.astype(jnp.bfloat16),
                    out_b=p["out_proj_bias"].reshape(1, E).astype(jnp.float32))

    def prep_norm(n):
        g, b = n
        return g.reshape(1, E).astype(jnp.float32), b.reshape(1, E).astype(jnp.float32)

    def prep_dense(d):
        w, b = d
        return w.T.astype(jnp.bfloat16), b.reshape(1, -1).astype(jnp.float32)

    front = [dict(w=jnp.transpose(w, (2, 1, 0)).astype(jnp.bfloat16),   # (3, Cin, Cout)
                  b=b.reshape(1, -1).astype(jnp.float32))
             for (w, b) in raw["front_end"]]

    def prep_enc(p):
        l1w, l1b = prep_dense(p["linear1"])
        l2w, l2b = prep_dense(p["linear2"])
        n1w, n1b = prep_norm(p["norm1"])
        n2w, n2b = prep_norm(p["norm2"])
        return dict(self_attn=prep_mha(p["self_attn"]),
                    lin1_w=l1w, lin1_b=l1b, lin2_w=l2w, lin2_b=l2b,
                    norm1_w=n1w, norm1_b=n1b, norm2_w=n2w, norm2_b=n2b)

    def prep_dec(p):
        d = prep_enc(p)
        d["cross_attn"] = prep_mha(p["cross_attn"])
        d["norm3_w"], d["norm3_b"] = prep_norm(p["norm3"])
        return d

    ctc_w, ctc_b = raw["ctc"]                        # (num_tokens, E), (num_tokens,)
    n_pad = _round_up(max(num_tokens, 1), 128)
    ctc_w_pad = jnp.zeros((E, n_pad), jnp.float32).at[:, :num_tokens].set(ctc_w.T).astype(jnp.bfloat16)
    ctc_b_pad = jnp.zeros((1, n_pad), jnp.float32).at[0, :num_tokens].set(ctc_b)

    enc_nw, enc_nb = prep_norm(raw["enc_norm"])
    dec_nw, dec_nb = prep_norm(raw["dec_norm"])
    return dict(front_end=front,
                encoder_layers=[prep_enc(p) for p in raw["encoder_layers"]],
                decoder_layers=[prep_dec(p) for p in raw["decoder_layers"]],
                enc_norm_w=enc_nw, enc_norm_b=enc_nb,
                dec_norm_w=dec_nw, dec_norm_b=dec_nb,
                ctc_w_pad=ctc_w_pad, ctc_b_pad=ctc_b_pad,
                pe=build_positional_encoding(Dtr, 1000))


# ----------------------------- Main -----------------------------

if __name__ == "__main__":
    # Small synthetic hyperparameters consistent with the module's structure.
    Dc, Dtr, NUM_HEAD = 32, 16, 2
    N_ENC, N_DEC, FFN = 2, 2, 32
    NUM_TOKENS = 12                     # TODO(synk): stand-in for len(KOREAN_TOKENS)
    B, T = 2, 64                        # 3 stride-2 convs -> L = T // 8 = 8
    FRONT_STRIDES = (1, 2, 1, 2, 1, 2)  # STATIC (never traced)

    key = jax.random.PRNGKey(0)
    kp, kx = jax.random.split(key)
    raw_params = init_params(kp, Dc=Dc, Dtr=Dtr, n_enc=N_ENC, n_dec=N_DEC,
                             ffn=FFN, num_tokens=NUM_TOKENS)
    params = prepare_params(raw_params, Dtr=Dtr, num_tokens=NUM_TOKENS)

    input_tensor = jax.random.normal(kx, (B, 80, T), jnp.float32)   # NCL, 80 mel channels
    L_final = T // 8
    # key_padding_mask for the downsampled sequence (True = padded position)
    input_mask = jnp.zeros((B, L_final), dtype=bool).at[1, L_final - 1].set(True)

    fwd = jax.jit(functools.partial(transformer_stt_forward,
                                    num_heads=NUM_HEAD, num_tokens=NUM_TOKENS,
                                    front_strides=FRONT_STRIDES))
    out = jax.block_until_ready(fwd(params, input_tensor, input_mask))

    assert out.shape == (B, L_final, NUM_TOKENS), out.shape
    assert bool(jnp.all(jnp.isfinite(out)))
    # rows of log_softmax should sum (in prob space) to ~1
    assert bool(jnp.allclose(jnp.sum(jnp.exp(out), axis=-1), 1.0, atol=1e-3))
    print("KERNEL_OK")
</pallas_src>

<mosaic_0001>
module attributes {stable_mosaic.version = 11 : i64} {
  func.func @_conv3_glu_kernel(%arg0: i32, %arg1: i32, %arg2: memref<128x80xf32, #tpu.memory_space<vmem>>, %arg3: memref<128x80xf32, #tpu.memory_space<vmem>>, %arg4: memref<128x80xf32, #tpu.memory_space<vmem>>, %arg5: memref<3x80x32xbf16, #tpu.memory_space<vmem>>, %arg6: memref<1x32xf32, #tpu.memory_space<vmem>>, %arg7: memref<128x16xbf16, #tpu.memory_space<vmem>>, %arg8: memref<128x32xf32, #tpu.memory_space<vmem>>) attributes {dimension_semantics = [#tpu.dimension_semantics<parallel>, #tpu.dimension_semantics<arbitrary>], iteration_bounds = array<i64: 1, 1>, scalar_prefetch = 0 : i64, scratch_operands = 1 : i64, tpu.core_type = #tpu.core_type<tc>, window_params = [{transform_indices = @transform_0, window_bounds = array<i64: 128, 80>}, {transform_indices = @transform_1, window_bounds = array<i64: 128, 80>}, {transform_indices = @transform_2, window_bounds = array<i64: 128, 80>}, {transform_indices = @transform_3, window_bounds = array<i64: 3, 80, 32>}, {pipeline_mode = #tpu.pipeline_mode<synchronous>, transform_indices = @transform_4, window_bounds = array<i64: 1, 32>}, {transform_indices = @transform_5, window_bounds = array<i64: 128, 16>}]} {
    %c0_i32 = arith.constant 0 : i32
    %0 = arith.cmpi eq, %arg1, %c0_i32 : i32
    %1 = arith.extui %0 : i1 to i32
    %c0_i32_0 = arith.constant 0 : i32
    %2 = arith.cmpi ne, %1, %c0_i32_0 : i32
    scf.if %2 {
      %cst_29 = arith.constant 0.000000e+00 : f32
      %30 = vector.broadcast %cst_29 : f32 to vector<128x32xf32>
      %c0_30 = arith.constant 0 : index
      %c0_31 = arith.constant 0 : index
      %31 = vector.load %arg8[%c0_30, %c0_31] : memref<128x32xf32, #tpu.memory_space<vmem>>, vector<128x32xf32>
      tpu.vector_store %arg8[%c0_30, %c0_31], %30 {strides = array<i32>} : memref<128x32xf32, #tpu.memory_space<vmem>>, vector<128x32xf32>,
    } else {
    }
    %c0 = arith.constant 0 : index
    %c0_1 = arith.constant 0 : index
    %3 = vector.load %arg2[%c0, %c0_1] : memref<128x80xf32, #tpu.memory_space<vmem>>, vector<128x80xf32>
    %4 = arith.truncf %3 : vector<128x80xf32> to vector<128x80xbf16>
    %c0_2 = arith.constant 0 : index
    %c0_3 = arith.constant 0 : index
    %5 = vector.load %arg8[%c0_2, %c0_3] : memref<128x32xf32, #tpu.memory_space<vmem>>, vector<128x32xf32>
    %c0_4 = arith.constant 0 : index
    %c0_5 = arith.constant 0 : index
    %c0_6 = arith.constant 0 : index
    %6 = vector.load %arg5[%c0_4, %c0_5, %c0_6] : memref<3x80x32xbf16, #tpu.memory_space<vmem>>, vector<1x80x32xbf16>
    %7 = vector.shape_cast %6 : vector<1x80x32xbf16> to vector<80x32xbf16>
    %cst = arith.constant dense<0.000000e+00> : vector<128x32xf32>
    %8 = tpu.matmul %4, %7, %cst {dimension_numbers = #tpu.dot_dimension_numbers<[1], [0], [0], [1], [0, 0, 1, 1], [], []>} : vector<128x80xbf16>, vector<80x32xbf16>, vector<128x32xf32> -> vector<128x32xf32>
    %9 = arith.addf %5, %8 : vector<128x32xf32>
    %c0_7 = arith.constant 0 : index
    %c0_8 = arith.constant 0 : index
    %10 = vector.load %arg8[%c0_7, %c0_8] : memref<128x32xf32, #tpu.memory_space<vmem>>, vector<128x32xf32>
    tpu.vector_store %arg8[%c0_7, %c0_8], %9 {strides = array<i32>} : memref<128x32xf32, #tpu.memory_space<vmem>>, vector<128x32xf32>,
    %c0_9 = arith.constant 0 : index
    %c0_10 = arith.constant 0 : index
    %11 = vector.load %arg3[%c0_9, %c0_10] : memref<128x80xf32, #tpu.memory_space<vmem>>, vector<128x80xf32>
    %12 = arith.truncf %11 : vector<128x80xf32> to vector<128x80xbf16>
    %c0_11 = arith.constant 0 : index
    %c0_12 = arith.constant 0 : index
    %13 = vector.load %arg8[%c0_11, %c0_12] : memref<128x32xf32, #tpu.memory_space<vmem>>, vector<128x32xf32>
    %c1 = arith.constant 1 : index
    %c0_13 = arith.constant 0 : index
    %c0_14 = arith.constant 0 : index
    %14 = vector.load %arg5[%c1, %c0_13, %c0_14] : memref<3x80x32xbf16, #tpu.memory_space<vmem>>, vector<1x80x32xbf16>
    %15 = vector.shape_cast %14 : vector<1x80x32xbf16> to vector<80x32xbf16>
    %cst_15 = arith.constant dense<0.000000e+00> : vector<128x32xf32>
    %16 = tpu.matmul %12, %15, %cst_15 {dimension_numbers = #tpu.dot_dimension_numbers<[1], [0], [0], [1], [0, 0, 1, 1], [], []>} : vector<128x80xbf16>, vector<80x32xbf16>, vector<128x32xf32> -> vector<128x32xf32>
    %17 = arith.addf %13, %16 : vector<128x32xf32>
    %c0_16 = arith.constant 0 : index
    %c0_17 = arith.constant 0 : index
    %18 = vector.load %arg8[%c0_16, %c0_17] : memref<128x32xf32, #tpu.memory_space<vmem>>, vector<128x32xf32>
    tpu.vector_store %arg8[%c0_16, %c0_17], %17 {strides = array<i32>} : memref<128x32xf32, #tpu.memory_space<vmem>>, vector<128x32xf32>,
    %c0_18 = arith.constant 0 : index
    %c0_19 = arith.constant 0 : index
    %19 = vector.load %arg4[%c0_18, %c0_19] : memref<128x80xf32, #tpu.memory_space<vmem>>, vector<128x80xf32>
    %20 = arith.truncf %19 : vector<128x80xf32> to vector<128x80xbf16>
    %c0_20 = arith.constant 0 : index
    %c0_21 = arith.constant 0 : index
    %21 = vector.load %arg8[%c0_20, %c0_21] : memref<128x32xf32, #tpu.memory_space<vmem>>, vector<128x32xf32>
    %c2 = arith.constant 2 : index
    %c0_22 = arith.constant 0 : index
    %c0_23 = arith.constant 0 : index
    %22 = vector.load %arg5[%c2, %c0_22, %c0_23] : memref<3x80x32xbf16, #tpu.memory_space<vmem>>, vector<1x80x32xbf16>
    %23 = vector.shape_cast %22 : vector<1x80x32xbf16> to vector<80x32xbf16>
    %cst_24 = arith.constant dense<0.000000e+00> : vector<128x32xf32>
    %24 = tpu.matmul %20, %23, %cst_24 {dimension_numbers = #tpu.dot_dimension_numbers<[1], [0], [0], [1], [0, 0, 1, 1], [], []>} : vector<128x80xbf16>, vector<80x32xbf16>, vector<128x32xf32> -> vector<128x32xf32>
    %25 = arith.addf %21, %24 : vector<128x32xf32>
    %c0_25 = arith.constant 0 : index
    %c0_26 = arith.constant 0 : index
    %26 = vector.load %arg8[%c0_25, %c0_26] : memref<128x32xf32, #tpu.memory_space<vmem>>, vector<128x32xf32>
    tpu.vector_store %arg8[%c0_25, %c0_26], %25 {strides = array<i32>} : memref<128x32xf32, #tpu.memory_space<vmem>>, vector<128x32xf32>,
    %c0_i32_27 = arith.constant 0 : i32
    %27 = arith.cmpi eq, %arg1, %c0_i32_27 : i32
    %28 = arith.extui %27 : i1 to i32
    %c0_i32_28 = arith.constant 0 : i32
    %29 = arith.cmpi ne, %28, %c0_i32_28 : i32
    scf.if %29 {
      %c0_29 = arith.constant 0 : index
      %c0_30 = arith.constant 0 : index
      %30 = vector.load %arg8[%c0_29, %c0_30] : memref<128x32xf32, #tpu.memory_space<vmem>>, vector<128x32xf32>
      %c0_31 = arith.constant 0 : index
      %c0_32 = arith.constant 0 : index
      %31 = vector.load %arg6[%c0_31, %c0_32] : memref<1x32xf32, #tpu.memory_space<vmem>>, vector<1x32xf32>
      %32 = vector.broadcast %31 : vector<1x32xf32> to vector<128x32xf32>
      %33 = arith.addf %30, %32 : vector<128x32xf32>
      %34 = vector.extract_strided_slice %33 {offsets = [0, 0], sizes = [128, 16], strides = [1, 1]} : vector<128x32xf32> to vector<128x16xf32>
      %35 = vector.extract_strided_slice %33 {offsets = [0, 16], sizes = [128, 16], strides = [1, 1]} : vector<128x32xf32> to vector<128x16xf32>
      %36 = arith.negf %35 : vector<128x16xf32>
      %37 = math.exp %36 : vector<128x16xf32>
      %cst_33 = arith.constant 1.000000e+00 : f32
      %38 = vector.broadcast %cst_33 : f32 to vector<128x16xf32>
      %39 = arith.addf %38, %37 : vector<128x16xf32>
      %40 = arith.divf %38, %39 : vector<128x16xf32>
      %41 = arith.mulf %34, %40 : vector<128x16xf32>
      %42 = arith.truncf %41 : vector<128x16xf32> to vector<128x16xbf16>
      %c0_34 = arith.constant 0 : index
      %c0_35 = arith.constant 0 : index
      %43 = vector.load %arg7[%c0_34, %c0_35] : memref<128x16xbf16, #tpu.memory_space<vmem>>, vector<128x16xbf16>
      tpu.vector_store %arg7[%c0_34, %c0_35], %42 {strides = array<i32>} : memref<128x16xbf16, #tpu.memory_space<vmem>>, vector<128x16xbf16>,
    } else {
    }
    return
  }
  func.func @transform_0(%arg0: i32, %arg1: i32) -> (i32, i32) {
    %c0_i32 = arith.constant 0 : i32
    return %arg0, %arg1 : i32, i32
  }
  func.func @transform_1(%arg0: i32, %arg1: i32) -> (i32, i32) {
    %c0_i32 = arith.constant 0 : i32
    return %arg0, %arg1 : i32, i32
  }
  func.func @transform_2(%arg0: i32, %arg1: i32) -> (i32, i32) {
    %c0_i32 = arith.constant 0 : i32
    return %arg0, %arg1 : i32, i32
  }
  func.func @transform_3(%arg0: i32, %arg1: i32) -> (i32, i32, i32) {
    %c0_i32 = arith.constant 0 : i32
    %c0_i32_0 = arith.constant 0 : i32
    %c0_i32_1 = arith.constant 0 : i32
    return %c0_i32, %arg1, %c0_i32_0 : i32, i32, i32
  }
  func.func @transform_4(%arg0: i32, %arg1: i32) -> (i32, i32) {
    %c0_i32 = arith.constant 0 : i32
    %c0_i32_0 = arith.constant 0 : i32
    %c0_i32_1 = arith.constant 0 : i32
    return %c0_i32, %c0_i32_0 : i32, i32
  }
  func.func @transform_5(%arg0: i32, %arg1: i32) -> (i32, i32) {
    %c0_i32 = arith.constant 0 : i32
    %c0_i32_0 = arith.constant 0 : i32
    return %arg0, %c0_i32 : i32, i32
  }
}

module attributes {stable_mosaic.version = 11 : i64} {
  func.func @_conv3_glu_kernel(%arg0: i32, %arg1: i32, %arg2: memref<32x16xbf16, #tpu.memory_space<vmem>>, %arg3: memref<32x16xbf16, #tpu.memory_space<vmem>>, %arg4: memref<32x16xbf16, #tpu.memory_space<vmem>>, %arg5: memref<3x16x32xbf16, #tpu.memory_space<vmem>>, %arg6: memref<1x32xf32, #tpu.memory_space<vmem>>, %arg7: memref<32x16xbf16, #tpu.memory_space<vmem>>, %arg8: memref<32x32xf32, #tpu.memory_space<vmem>>) attributes {dimension_semantics = [#tpu.dimension_semantics<parallel>, #tpu.dimension_semantics<arbitrary>], iteration_bounds = array<i64: 1, 1>, scalar_prefetch = 0 : i64, scratch_operands = 1 : i64, tpu.core_type = #tpu.core_type<tc>, window_params = [{transform_indices = @transform_0, window_bounds = array<i64: 32, 16>}, {transform_indices = @transform_1, window_bounds = array<i64: 32, 16>}, {transform_indices = @transform_2, window_bounds = array<i64: 32, 16>}, {transform_indices = @transform_3, window_bounds = array<i64: 3, 16, 32>}, {pipeline_mode = #tpu.pipeline_mode<synchronous>, transform_indices = @transform_4, window_bounds = array<i64: 1, 32>}, {transform_indices = @transform_5, window_bounds = array<i64: 32, 16>}]} {
    %c0_i32 = arith.constant 0 : i32
    %0 = arith.cmpi eq, %arg1, %c0_i32 : i32
    %1 = arith.extui %0 : i1 to i32
    %c0_i32_0 = arith.constant 0 : i32
    %2 = arith.cmpi ne, %1, %c0_i32_0 : i32
    scf.if %2 {
      %cst_29 = arith.constant 0.000000e+00 : f32
      %27 = vector.broadcast %cst_29 : f32 to vector<32x32xf32>
      %c0_30 = arith.constant 0 : index
      %c0_31 = arith.constant 0 : index
      %28 = vector.load %arg8[%c0_30, %c0_31] : memref<32x32xf32, #tpu.memory_space<vmem>>, vector<32x32xf32>
      tpu.vector_store %arg8[%c0_30, %c0_31], %27 {strides = array<i32>} : memref<32x32xf32, #tpu.memory_space<vmem>>, vector<32x32xf32>,
    } else {
    }
    %c0 = arith.constant 0 : index
    %c0_1 = arith.constant 0 : index
    %3 = vector.load %arg2[%c0, %c0_1] : memref<32x16xbf16, #tpu.memory_space<vmem>>, vector<32x16xbf16>
    %c0_2 = arith.constant 0 : index
    %c0_3 = arith.constant 0 : index
    %4 = vector.load %arg8[%c0_2, %c0_3] : memref<32x32xf32, #tpu.memory_space<vmem>>, vector<32x32xf32>
    %c0_4 = arith.constant 0 : index
    %c0_5 = arith.constant 0 : index
    %c0_6 = arith.constant 0 : index
    %5 = vector.load %arg5[%c0_4, %c0_5, %c0_6] : memref<3x16x32xbf16, #tpu.memory_space<vmem>>, vector<1x16x32xbf16>
    %6 = vector.shape_cast %5 : vector<1x16x32xbf16> to vector<16x32xbf16>
    %cst = arith.constant dense<0.000000e+00> : vector<32x32xf32>
    %7 = tpu.matmul %3, %6, %cst {dimension_numbers = #tpu.dot_dimension_numbers<[1], [0], [0], [1], [0, 0, 1, 1], [], []>} : vector<32x16xbf16>, vector<16x32xbf16>, vector<32x32xf32> -> vector<32x32xf32>
    %8 = arith.addf %4, %7 : vector<32x32xf32>
    %c0_7 = arith.constant 0 : index
    %c0_8 = arith.constant 0 : index
    %9 = vector.load %arg8[%c0_7, %c0_8] : memref<32x32xf32, #tpu.memory_space<vmem>>, vector<32x32xf32>
    tpu.vector_store %arg8[%c0_7, %c0_8], %8 {strides = array<i32>} : memref<32x32xf32, #tpu.memory_space<vmem>>, vector<32x32xf32>,
    %c0_9 = arith.constant 0 : index
    %c0_10 = arith.constant 0 : index
    %10 = vector.load %arg3[%c0_9, %c0_10] : memref<32x16xbf16, #tpu.memory_space<vmem>>, vector<32x16xbf16>
    %c0_11 = arith.constant 0 : index
    %c0_12 = arith.constant 0 : index
    %11 = vector.load %arg8[%c0_11, %c0_12] : memref<32x32xf32, #tpu.memory_space<vmem>>, vector<32x32xf32>
    %c1 = arith.constant 1 : index
    %c0_13 = arith.constant 0 : index
    %c0_14 = arith.constant 0 : index
    %12 = vector.load %arg5[%c1, %c0_13, %c0_14] : memref<3x16x32xbf16, #tpu.memory_space<vmem>>, vector<1x16x32xbf16>
    %13 = vector.shape_cast %12 : vector<1x16x32xbf16> to vector<16x32xbf16>
    %cst_15 = arith.constant dense<0.000000e+00> : vector<32x32xf32>
    %14 = tpu.matmul %10, %13, %cst_15 {dimension_numbers = #tpu.dot_dimension_numbers<[1], [0], [0], [1], [0, 0, 1, 1], [], []>} : vector<32x16xbf16>, vector<16x32xbf16>, vector<32x32xf32> -> vector<32x32xf32>
    %15 = arith.addf %11, %14 : vector<32x32xf32>
    %c0_16 = arith.constant 0 : index
    %c0_17 = arith.constant 0 : index
    %16 = vector.load %arg8[%c0_16, %c0_17] : memref<32x32xf32, #tpu.memory_space<vmem>>, vector<32x32xf32>
    tpu.vector_store %arg8[%c0_16, %c0_17], %15 {strides = array<i32>} : memref<32x32xf32, #tpu.memory_space<vmem>>, vector<32x32xf32>,
    %c0_18 = arith.constant 0 : index
    %c0_19 = arith.constant 0 : index
    %17 = vector.load %arg4[%c0_18, %c0_19] : memref<32x16xbf16, #tpu.memory_space<vmem>>, vector<32x16xbf16>
    %c0_20 = arith.constant 0 : index
    %c0_21 = arith.constant 0 : index
    %18 = vector.load %arg8[%c0_20, %c0_21] : memref<32x32xf32, #tpu.memory_space<vmem>>, vector<32x32xf32>
    %c2 = arith.constant 2 : index
    %c0_22 = arith.constant 0 : index
    %c0_23 = arith.constant 0 : index
    %19 = vector.load %arg5[%c2, %c0_22, %c0_23] : memref<3x16x32xbf16, #tpu.memory_space<vmem>>, vector<1x16x32xbf16>
    %20 = vector.shape_cast %19 : vector<1x16x32xbf16> to vector<16x32xbf16>
    %cst_24 = arith.constant dense<0.000000e+00> : vector<32x32xf32>
    %21 = tpu.matmul %17, %20, %cst_24 {dimension_numbers = #tpu.dot_dimension_numbers<[1], [0], [0], [1], [0, 0, 1, 1], [], []>} : vector<32x16xbf16>, vector<16x32xbf16>, vector<32x32xf32> -> vector<32x32xf32>
    %22 = arith.addf %18, %21 : vector<32x32xf32>
    %c0_25 = arith.constant 0 : index
    %c0_26 = arith.constant 0 : index
    %23 = vector.load %arg8[%c0_25, %c0_26] : memref<32x32xf32, #tpu.memory_space<vmem>>, vector<32x32xf32>
    tpu.vector_store %arg8[%c0_25, %c0_26], %22 {strides = array<i32>} : memref<32x32xf32, #tpu.memory_space<vmem>>, vector<32x32xf32>,
    %c0_i32_27 = arith.constant 0 : i32
    %24 = arith.cmpi eq, %arg1, %c0_i32_27 : i32
    %25 = arith.extui %24 : i1 to i32
    %c0_i32_28 = arith.constant 0 : i32
    %26 = arith.cmpi ne, %25, %c0_i32_28 : i32
    scf.if %26 {
      %c0_29 = arith.constant 0 : index
      %c0_30 = arith.constant 0 : index
      %27 = vector.load %arg8[%c0_29, %c0_30] : memref<32x32xf32, #tpu.memory_space<vmem>>, vector<32x32xf32>
      %c0_31 = arith.constant 0 : index
      %c0_32 = arith.constant 0 : index
      %28 = vector.load %arg6[%c0_31, %c0_32] : memref<1x32xf32, #tpu.memory_space<vmem>>, vector<1x32xf32>
      %29 = vector.broadcast %28 : vector<1x32xf32> to vector<32x32xf32>
      %30 = arith.addf %27, %29 : vector<32x32xf32>
      %31 = vector.extract_strided_slice %30 {offsets = [0, 0], sizes = [32, 16], strides = [1, 1]} : vector<32x32xf32> to vector<32x16xf32>
      %32 = vector.extract_strided_slice %30 {offsets = [0, 16], sizes = [32, 16], strides = [1, 1]} : vector<32x32xf32> to vector<32x16xf32>
      %33 = arith.negf %32 : vector<32x16xf32>
      %34 = math.exp %33 : vector<32x16xf32>
      %cst_33 = arith.constant 1.000000e+00 : f32
      %35 = vector.broadcast %cst_33 : f32 to vector<32x16xf32>
      %36 = arith.addf %35, %34 : vector<32x16xf32>
      %37 = arith.divf %35, %36 : vector<32x16xf32>
      %38 = arith.mulf %31, %37 : vector<32x16xf32>
      %39 = arith.truncf %38 : vector<32x16xf32> to vector<32x16xbf16>
      %c0_34 = arith.constant 0 : index
      %c0_35 = arith.constant 0 : index
      %40 = vector.load %arg7[%c0_34, %c0_35] : memref<32x16xbf16, #tpu.memory_space<vmem>>, vector<32x16xbf16>
      tpu.vector_store %arg7[%c0_34, %c0_35], %39 {strides = array<i32>} : memref<32x16xbf16, #tpu.memory_space<vmem>>, vector<32x16xbf16>,
    } else {
    }
    return
  }
  func.func @transform_0(%arg0: i32, %arg1: i32) -> (i32, i32) {
    %c0_i32 = arith.constant 0 : i32
    return %arg0, %arg1 : i32, i32
  }
  func.func @transform_1(%arg0: i32, %arg1: i32) -> (i32, i32) {
    %c0_i32 = arith.constant 0 : i32
    return %arg0, %arg1 : i32, i32
  }
  func.func @transform_2(%arg0: i32, %arg1: i32) -> (i32, i32) {
    %c0_i32 = arith.constant 0 : i32
    return %arg0, %arg1 : i32, i32
  }
  func.func @transform_3(%arg0: i32, %arg1: i32) -> (i32, i32, i32) {
    %c0_i32 = arith.constant 0 : i32
    %c0_i32_0 = arith.constant 0 : i32
    %c0_i32_1 = arith.constant 0 : i32
    return %c0_i32, %arg1, %c0_i32_0 : i32, i32, i32
  }
  func.func @transform_4(%arg0: i32, %arg1: i32) -> (i32, i32) {
    %c0_i32 = arith.constant 0 : i32
    %c0_i32_0 = arith.constant 0 : i32
    %c0_i32_1 = arith.constant 0 : i32
    return %c0_i32, %c0_i32_0 : i32, i32
  }
  func.func @transform_5(%arg0: i32, %arg1: i32) -> (i32, i32) {
    %c0_i32 = arith.constant 0 : i32
    %c0_i32_0 = arith.constant 0 : i32
    return %arg0, %c0_i32 : i32, i32
  }
}

module attributes {stable_mosaic.version = 11 : i64} {
  func.func @_conv3_glu_kernel(%arg0: i32, %arg1: i32, %arg2: memref<64x16xbf16, #tpu.memory_space<vmem>>, %arg3: memref<64x16xbf16, #tpu.memory_space<vmem>>, %arg4: memref<64x16xbf16, #tpu.memory_space<vmem>>, %arg5: memref<3x16x32xbf16, #tpu.memory_space<vmem>>, %arg6: memref<1x32xf32, #tpu.memory_space<vmem>>, %arg7: memref<64x16xbf16, #tpu.memory_space<vmem>>, %arg8: memref<64x32xf32, #tpu.memory_space<vmem>>) attributes {dimension_semantics = [#tpu.dimension_semantics<parallel>, #tpu.dimension_semantics<arbitrary>], iteration_bounds = array<i64: 1, 1>, scalar_prefetch = 0 : i64, scratch_operands = 1 : i64, tpu.core_type = #tpu.core_type<tc>, window_params = [{transform_indices = @transform_0, window_bounds = array<i64: 64, 16>}, {transform_indices = @transform_1, window_bounds = array<i64: 64, 16>}, {transform_indices = @transform_2, window_bounds = array<i64: 64, 16>}, {transform_indices = @transform_3, window_bounds = array<i64: 3, 16, 32>}, {pipeline_mode = #tpu.pipeline_mode<synchronous>, transform_indices = @transform_4, window_bounds = array<i64: 1, 32>}, {transform_indices = @transform_5, window_bounds = array<i64: 64, 16>}]} {
    %c0_i32 = arith.constant 0 : i32
    %0 = arith.cmpi eq, %arg1, %c0_i32 : i32
    %1 = arith.extui %0 : i1 to i32
    %c0_i32_0 = arith.constant 0 : i32
    %2 = arith.cmpi ne, %1, %c0_i32_0 : i32
    scf.if %2 {
      %cst_29 = arith.constant 0.000000e+00 : f32
      %27 = vector.broadcast %cst_29 : f32 to vector<64x32xf32>
      %c0_30 = arith.constant 0 : index
      %c0_31 = arith.constant 0 : index
      %28 = vector.load %arg8[%c0_30, %c0_31] : memref<64x32xf32, #tpu.memory_space<vmem>>, vector<64x32xf32>
      tpu.vector_store %arg8[%c0_30, %c0_31], %27 {strides = array<i32>} : memref<64x32xf32, #tpu.memory_space<vmem>>, vector<64x32xf32>,
    } else {
    }
    %c0 = arith.constant 0 : index
    %c0_1 = arith.constant 0 : index
    %3 = vector.load %arg2[%c0, %c0_1] : memref<64x16xbf16, #tpu.memory_space<vmem>>, vector<64x16xbf16>
    %c0_2 = arith.constant 0 : index
    %c0_3 = arith.constant 0 : index
    %4 = vector.load %arg8[%c0_2, %c0_3] : memref<64x32xf32, #tpu.memory_space<vmem>>, vector<64x32xf32>
    %c0_4 = arith.constant 0 : index
    %c0_5 = arith.constant 0 : index
    %c0_6 = arith.constant 0 : index
    %5 = vector.load %arg5[%c0_4, %c0_5, %c0_6] : memref<3x16x32xbf16, #tpu.memory_space<vmem>>, vector<1x16x32xbf16>
    %6 = vector.shape_cast %5 : vector<1x16x32xbf16> to vector<16x32xbf16>
    %cst = arith.constant dense<0.000000e+00> : vector<64x32xf32>
    %7 = tpu.matmul %3, %6, %cst {dimension_numbers = #tpu.dot_dimension_numbers<[1], [0], [0], [1], [0, 0, 1, 1], [], []>} : vector<64x16xbf16>, vector<16x32xbf16>, vector<64x32xf32> -> vector<64x32xf32>
    %8 = arith.addf %4, %7 : vector<64x32xf32>
    %c0_7 = arith.constant 0 : index
    %c0_8 = arith.constant 0 : index
    %9 = vector.load %arg8[%c0_7, %c0_8] : memref<64x32xf32, #tpu.memory_space<vmem>>, vector<64x32xf32>
    tpu.vector_store %arg8[%c0_7, %c0_8], %8 {strides = array<i32>} : memref<64x32xf32, #tpu.memory_space<vmem>>, vector<64x32xf32>,
    %c0_9 = arith.constant 0 : index
    %c0_10 = arith.constant 0 : index
    %10 = vector.load %arg3[%c0_9, %c0_10] : memref<64x16xbf16, #tpu.memory_space<vmem>>, vector<64x16xbf16>
    %c0_11 = arith.constant 0 : index
    %c0_12 = arith.constant 0 : index
    %11 = vector.load %arg8[%c0_11, %c0_12] : memref<64x32xf32, #tpu.memory_space<vmem>>, vector<64x32xf32>
    %c1 = arith.constant 1 : index
    %c0_13 = arith.constant 0 : index
    %c0_14 = arith.constant 0 : index
    %12 = vector.load %arg5[%c1, %c0_13, %c0_14] : memref<3x16x32xbf16, #tpu.memory_space<vmem>>, vector<1x16x32xbf16>
    %13 = vector.shape_cast %12 : vector<1x16x32xbf16> to vector<16x32xbf16>
    %cst_15 = arith.constant dense<0.000000e+00> : vector<64x32xf32>
    %14 = tpu.matmul %10, %13, %cst_15 {dimension_numbers = #tpu.dot_dimension_numbers<[1], [0], [0], [1], [0, 0, 1, 1], [], []>} : vector<64x16xbf16>, vector<16x32xbf16>, vector<64x32xf32> -> vector<64x32xf32>
    %15 = arith.addf %11, %14 : vector<64x32xf32>
    %c0_16 = arith.constant 0 : index
    %c0_17 = arith.constant 0 : index
    %16 = vector.load %arg8[%c0_16, %c0_17] : memref<64x32xf32, #tpu.memory_space<vmem>>, vector<64x32xf32>
    tpu.vector_store %arg8[%c0_16, %c0_17], %15 {strides = array<i32>} : memref<64x32xf32, #tpu.memory_space<vmem>>, vector<64x32xf32>,
    %c0_18 = arith.constant 0 : index
    %c0_19 = arith.constant 0 : index
    %17 = vector.load %arg4[%c0_18, %c0_19] : memref<64x16xbf16, #tpu.memory_space<vmem>>, vector<64x16xbf16>
    %c0_20 = arith.constant 0 : index
    %c0_21 = arith.constant 0 : index
    %18 = vector.load %arg8[%c0_20, %c0_21] : memref<64x32xf32, #tpu.memory_space<vmem>>, vector<64x32xf32>
    %c2 = arith.constant 2 : index
    %c0_22 = arith.constant 0 : index
    %c0_23 = arith.constant 0 : index
    %19 = vector.load %arg5[%c2, %c0_22, %c0_23] : memref<3x16x32xbf16, #tpu.memory_space<vmem>>, vector<1x16x32xbf16>
    %20 = vector.shape_cast %19 : vector<1x16x32xbf16> to vector<16x32xbf16>
    %cst_24 = arith.constant dense<0.000000e+00> : vector<64x32xf32>
    %21 = tpu.matmul %17, %20, %cst_24 {dimension_numbers = #tpu.dot_dimension_numbers<[1], [0], [0], [1], [0, 0, 1, 1], [], []>} : vector<64x16xbf16>, vector<16x32xbf16>, vector<64x32xf32> -> vector<64x32xf32>
    %22 = arith.addf %18, %21 : vector<64x32xf32>
    %c0_25 = arith.constant 0 : index
    %c0_26 = arith.constant 0 : index
    %23 = vector.load %arg8[%c0_25, %c0_26] : memref<64x32xf32, #tpu.memory_space<vmem>>, vector<64x32xf32>
    tpu.vector_store %arg8[%c0_25, %c0_26], %22 {strides = array<i32>} : memref<64x32xf32, #tpu.memory_space<vmem>>, vector<64x32xf32>,
    %c0_i32_27 = arith.constant 0 : i32
    %24 = arith.cmpi eq, %arg1, %c0_i32_27 : i32
    %25 = arith.extui %24 : i1 to i32
    %c0_i32_28 = arith.constant 0 : i32
    %26 = arith.cmpi ne, %25, %c0_i32_28 : i32
    scf.if %26 {
      %c0_29 = arith.constant 0 : index
      %c0_30 = arith.constant 0 : index
      %27 = vector.load %arg8[%c0_29, %c0_30] : memref<64x32xf32, #tpu.memory_space<vmem>>, vector<64x32xf32>
      %c0_31 = arith.constant 0 : index
      %c0_32 = arith.constant 0 : index
      %28 = vector.load %arg6[%c0_31, %c0_32] : memref<1x32xf32, #tpu.memory_space<vmem>>, vector<1x32xf32>
      %29 = vector.broadcast %28 : vector<1x32xf32> to vector<64x32xf32>
      %30 = arith.addf %27, %29 : vector<64x32xf32>
      %31 = vector.extract_strided_slice %30 {offsets = [0, 0], sizes = [64, 16], strides = [1, 1]} : vector<64x32xf32> to vector<64x16xf32>
      %32 = vector.extract_strided_slice %30 {offsets = [0, 16], sizes = [64, 16], strides = [1, 1]} : vector<64x32xf32> to vector<64x16xf32>
      %33 = arith.negf %32 : vector<64x16xf32>
      %34 = math.exp %33 : vector<64x16xf32>
      %cst_33 = arith.constant 1.000000e+00 : f32
      %35 = vector.broadcast %cst_33 : f32 to vector<64x16xf32>
      %36 = arith.addf %35, %34 : vector<64x16xf32>
      %37 = arith.divf %35, %36 : vector<64x16xf32>
      %38 = arith.mulf %31, %37 : vector<64x16xf32>
      %39 = arith.truncf %38 : vector<64x16xf32> to vector<64x16xbf16>
      %c0_34 = arith.constant 0 : index
      %c0_35 = arith.constant 0 : index
      %40 = vector.load %arg7[%c0_34, %c0_35] : memref<64x16xbf16, #tpu.memory_space<vmem>>, vector<64x16xbf16>
      tpu.vector_store %arg7[%c0_34, %c0_35], %39 {strides = array<i32>} : memref<64x16xbf16, #tpu.memory_space<vmem>>, vector<64x16xbf16>,
    } else {
    }
    return
  }
  func.func @transform_0(%arg0: i32, %arg1: i32) -> (i32, i32) {
    %c0_i32 = arith.constant 0 : i32
    return %arg0, %arg1 : i32, i32
  }
  func.func @transform_1(%arg0: i32, %arg1: i32) -> (i32, i32) {
    %c0_i32 = arith.constant 0 : i32
    return %arg0, %arg1 : i32, i32
  }
  func.func @transform_2(%arg0: i32, %arg1: i32) -> (i32, i32) {
    %c0_i32 = arith.constant 0 : i32
    return %arg0, %arg1 : i32, i32
  }
  func.func @transform_3(%arg0: i32, %arg1: i32) -> (i32, i32, i32) {
    %c0_i32 = arith.constant 0 : i32
    %c0_i32_0 = arith.constant 0 : i32
    %c0_i32_1 = arith.constant 0 : i32
    return %c0_i32, %arg1, %c0_i32_0 : i32, i32, i32
  }
  func.func @transform_4(%arg0: i32, %arg1: i32) -> (i32, i32) {
    %c0_i32 = arith.constant 0 : i32
    %c0_i32_0 = arith.constant 0 : i32
    %c0_i32_1 = arith.constant 0 : i32
    return %c0_i32, %c0_i32_0 : i32, i32
  }
  func.func @transform_5(%arg0: i32, %arg1: i32) -> (i32, i32) {
    %c0_i32 = arith.constant 0 : i32
    %c0_i32_0 = arith.constant 0 : i32
    return %arg0, %c0_i32 : i32, i32
  }
}

module attributes {stable_mosaic.version = 11 : i64} {
  func.func @_fused_proj_kernel(%arg0: i32, %arg1: i32, %arg2: i32, %arg3: memref<16x16xf32, #tpu.memory_space<vmem>>, %arg4: memref<1x16x16xbf16, #tpu.memory_space<vmem>>, %arg5: memref<1x1x16xf32, #tpu.memory_space<vmem>>, %arg6: memref<1x16x16xbf16, #tpu.memory_space<vmem>>, %arg7: memref<16x16xf32, #tpu.memory_space<vmem>>) attributes {dimension_semantics = [#tpu.dimension_semantics<parallel>, #tpu.dimension_semantics<parallel>, #tpu.dimension_semantics<arbitrary>], iteration_bounds = array<i64: 1, 3, 1>, scalar_prefetch = 0 : i64, scratch_operands = 1 : i64, tpu.core_type = #tpu.core_type<tc>, window_params = [{transform_indices = @transform_0, window_bounds = array<i64: 16, 16>}, {transform_indices = @transform_1, window_bounds = array<i64: 1, 16, 16>}, {transform_indices = @transform_2, window_bounds = array<i64: 1, 1, 16>}, {transform_indices = @transform_3, window_bounds = array<i64: 1, 16, 16>}]} {
    %c0_i32 = arith.constant 0 : i32
    %0 = arith.cmpi eq, %arg2, %c0_i32 : i32
    %1 = arith.extui %0 : i1 to i32
    %c0_i32_0 = arith.constant 0 : i32
    %2 = arith.cmpi ne, %1, %c0_i32_0 : i32
    scf.if %2 {
      %cst_11 = arith.constant 0.000000e+00 : f32
      %14 = vector.broadcast %cst_11 : f32 to vector<16x16xf32>
      %c0_12 = arith.constant 0 : index
      %c0_13 = arith.constant 0 : index
      %15 = vector.load %arg7[%c0_12, %c0_13] : memref<16x16xf32, #tpu.memory_space<vmem>>, vector<16x16xf32>
      tpu.vector_store %arg7[%c0_12, %c0_13], %14 {strides = array<i32>} : memref<16x16xf32, #tpu.memory_space<vmem>>, vector<16x16xf32>,
    } else {
    }
    %c0 = arith.constant 0 : index
    %c0_1 = arith.constant 0 : index
    %3 = vector.load %arg3[%c0, %c0_1] : memref<16x16xf32, #tpu.memory_space<vmem>>, vector<16x16xf32>
    %4 = arith.truncf %3 : vector<16x16xf32> to vector<16x16xbf16>
    %c0_2 = arith.constant 0 : index
    %c0_3 = arith.constant 0 : index
    %5 = vector.load %arg7[%c0_2, %c0_3] : memref<16x16xf32, #tpu.memory_space<vmem>>, vector<16x16xf32>
    %c0_4 = arith.constant 0 : index
    %c0_5 = arith.constant 0 : index
    %c0_6 = arith.constant 0 : index
    %6 = vector.load %arg4[%c0_4, %c0_5, %c0_6] : memref<1x16x16xbf16, #tpu.memory_space<vmem>>, vector<1x16x16xbf16>
    %7 = vector.shape_cast %6 : vector<1x16x16xbf16> to vector<16x16xbf16>
    %cst = arith.constant dense<0.000000e+00> : vector<16x16xf32>
    %8 = tpu.matmul %4, %7, %cst {dimension_numbers = #tpu.dot_dimension_numbers<[1], [0], [0], [1], [0, 0, 1, 1], [], []>} : vector<16x16xbf16>, vector<16x16xbf16>, vector<16x16xf32> -> vector<16x16xf32>
    %9 = arith.addf %5, %8 : vector<16x16xf32>
    %c0_7 = arith.constant 0 : index
    %c0_8 = arith.constant 0 : index
    %10 = vector.load %arg7[%c0_7, %c0_8] : memref<16x16xf32, #tpu.memory_space<vmem>>, vector<16x16xf32>
    tpu.vector_store %arg7[%c0_7, %c0_8], %9 {strides = array<i32>} : memref<16x16xf32, #tpu.memory_space<vmem>>, vector<16x16xf32>,
    %c0_i32_9 = arith.constant 0 : i32
    %11 = arith.cmpi eq, %arg2, %c0_i32_9 : i32
    %12 = arith.extui %11 : i1 to i32
    %c0_i32_10 = arith.constant 0 : i32
    %13 = arith.cmpi ne, %12, %c0_i32_10 : i32
    scf.if %13 {
      %c0_11 = arith.constant 0 : index
      %c0_12 = arith.constant 0 : index
      %14 = vector.load %arg7[%c0_11, %c0_12] : memref<16x16xf32, #tpu.memory_space<vmem>>, vector<16x16xf32>
      %c0_13 = arith.constant 0 : index
      %c0_14 = arith.constant 0 : index
      %c0_15 = arith.constant 0 : index
      %15 = vector.load %arg5[%c0_13, %c0_14, %c0_15] : memref<1x1x16xf32, #tpu.memory_space<vmem>>, vector<1x1x16xf32>
      %16 = vector.shape_cast %15 : vector<1x1x16xf32> to vector<1x16xf32>
      %17 = vector.broadcast %16 : vector<1x16xf32> to vector<16x16xf32>
      %18 = arith.addf %14, %17 : vector<16x16xf32>
      %19 = arith.truncf %18 : vector<16x16xf32> to vector<16x16xbf16>
      %c0_16 = arith.constant 0 : index
      %c0_17 = arith.constant 0 : index
      %c0_18 = arith.constant 0 : index
      %20 = vector.load %arg6[%c0_16, %c0_17, %c0_18] : memref<1x16x16xbf16, #tpu.memory_space<vmem>>, vector<1x16x16xbf16>
      %21 = vector.shape_cast %20 : vector<1x16x16xbf16> to vector<16x16xbf16>
      %22 = vector.shape_cast %19 : vector<16x16xbf16> to vector<1x16x16xbf16>
      tpu.vector_store %arg6[%c0_16, %c0_17, %c0_18], %22 {strides = array<i32>} : memref<1x16x16xbf16, #tpu.memory_space<vmem>>, vector<1x16x16xbf16>,
    } else {
    }
    return
  }
  func.func @transform_0(%arg0: i32, %arg1: i32, %arg2: i32) -> (i32, i32) {
    %c0_i32 = arith.constant 0 : i32
    return %arg0, %arg2 : i32, i32
  }
  func.func @transform_1(%arg0: i32, %arg1: i32, %arg2: i32) -> (i32, i32, i32) {
    %c0_i32 = arith.constant 0 : i32
    %c0_i32_0 = arith.constant 0 : i32
    return %arg1, %arg2, %c0_i32 : i32, i32, i32
  }
  func.func @transform_2(%arg0: i32, %arg1: i32, %arg2: i32) -> (i32, i32, i32) {
    %c0_i32 = arith.constant 0 : i32
    %c0_i32_0 = arith.constant 0 : i32
    %c0_i32_1 = arith.constant 0 : i32
    return %arg1, %c0_i32, %c0_i32_0 : i32, i32, i32
  }
  func.func @transform_3(%arg0: i32, %arg1: i32, %arg2: i32) -> (i32, i32, i32) {
    %c0_i32 = arith.constant 0 : i32
    %c0_i32_0 = arith.constant 0 : i32
    return %arg1, %arg0, %c0_i32 : i32, i32, i32
  }
}

module attributes {stable_mosaic.version = 11 : i64} {
  func.func @_conv3_glu_kernel(%arg0: i32, %arg1: i32, %arg2: memref<16x16xbf16, #tpu.memory_space<vmem>>, %arg3: memref<16x16xbf16, #tpu.memory_space<vmem>>, %arg4: memref<16x16xbf16, #tpu.memory_space<vmem>>, %arg5: memref<3x16x32xbf16, #tpu.memory_space<vmem>>, %arg6: memref<1x32xf32, #tpu.memory_space<vmem>>, %arg7: memref<16x16xf32, #tpu.memory_space<vmem>>, %arg8: memref<16x32xf32, #tpu.memory_space<vmem>>) attributes {dimension_semantics = [#tpu.dimension_semantics<parallel>, #tpu.dimension_semantics<arbitrary>], iteration_bounds = array<i64: 1, 1>, scalar_prefetch = 0 : i64, scratch_operands = 1 : i64, tpu.core_type = #tpu.core_type<tc>, window_params = [{transform_indices = @transform_0, window_bounds = array<i64: 16, 16>}, {transform_indices = @transform_1, window_bounds = array<i64: 16, 16>}, {transform_indices = @transform_2, window_bounds = array<i64: 16, 16>}, {transform_indices = @transform_3, window_bounds = array<i64: 3, 16, 32>}, {pipeline_mode = #tpu.pipeline_mode<synchronous>, transform_indices = @transform_4, window_bounds = array<i64: 1, 32>}, {transform_indices = @transform_5, window_bounds = array<i64: 16, 16>}]} {
    %c0_i32 = arith.constant 0 : i32
    %0 = arith.cmpi eq, %arg1, %c0_i32 : i32
    %1 = arith.extui %0 : i1 to i32
    %c0_i32_0 = arith.constant 0 : i32
    %2 = arith.cmpi ne, %1, %c0_i32_0 : i32
    scf.if %2 {
      %cst_29 = arith.constant 0.000000e+00 : f32
      %27 = vector.broadcast %cst_29 : f32 to vector<16x32xf32>
      %c0_30 = arith.constant 0 : index
      %c0_31 = arith.constant 0 : index
      %28 = vector.load %arg8[%c0_30, %c0_31] : memref<16x32xf32, #tpu.memory_space<vmem>>, vector<16x32xf32>
      tpu.vector_store %arg8[%c0_30, %c0_31], %27 {strides = array<i32>} : memref<16x32xf32, #tpu.memory_space<vmem>>, vector<16x32xf32>,
    } else {
    }
    %c0 = arith.constant 0 : index
    %c0_1 = arith.constant 0 : index
    %3 = vector.load %arg2[%c0, %c0_1] : memref<16x16xbf16, #tpu.memory_space<vmem>>, vector<16x16xbf16>
    %c0_2 = arith.constant 0 : index
    %c0_3 = arith.constant 0 : index
    %4 = vector.load %arg8[%c0_2, %c0_3] : memref<16x32xf32, #tpu.memory_space<vmem>>, vector<16x32xf32>
    %c0_4 = arith.constant 0 : index
    %c0_5 = arith.constant 0 : index
    %c0_6 = arith.constant 0 : index
    %5 = vector.load %arg5[%c0_4, %c0_5, %c0_6] : memref<3x16x32xbf16, #tpu.memory_space<vmem>>, vector<1x16x32xbf16>
    %6 = vector.shape_cast %5 : vector<1x16x32xbf16> to vector<16x32xbf16>
    %cst = arith.constant dense<0.000000e+00> : vector<16x32xf32>
    %7 = tpu.matmul %3, %6, %cst {dimension_numbers = #tpu.dot_dimension_numbers<[1], [0], [0], [1], [0, 0, 1, 1], [], []>} : vector<16x16xbf16>, vector<16x32xbf16>, vector<16x32xf32> -> vector<16x32xf32>
    %8 = arith.addf %4, %7 : vector<16x32xf32>
    %c0_7 = arith.constant 0 : index
    %c0_8 = arith.constant 0 : index
    %9 = vector.load %arg8[%c0_7, %c0_8] : memref<16x32xf32, #tpu.memory_space<vmem>>, vector<16x32xf32>
    tpu.vector_store %arg8[%c0_7, %c0_8], %8 {strides = array<i32>} : memref<16x32xf32, #tpu.memory_space<vmem>>, vector<16x32xf32>,
    %c0_9 = arith.constant 0 : index
    %c0_10 = arith.constant 0 : index
    %10 = vector.load %arg3[%c0_9, %c0_10] : memref<16x16xbf16, #tpu.memory_space<vmem>>, vector<16x16xbf16>
    %c0_11 = arith.constant 0 : index
    %c0_12 = arith.constant 0 : index
    %11 = vector.load %arg8[%c0_11, %c0_12] : memref<16x32xf32, #tpu.memory_space<vmem>>, vector<16x32xf32>
    %c1 = arith.constant 1 : index
    %c0_13 = arith.constant 0 : index
    %c0_14 = arith.constant 0 : index
    %12 = vector.load %arg5[%c1, %c0_13, %c0_14] : memref<3x16x32xbf16, #tpu.memory_space<vmem>>, vector<1x16x32xbf16>
    %13 = vector.shape_cast %12 : vector<1x16x32xbf16> to vector<16x32xbf16>
    %cst_15 = arith.constant dense<0.000000e+00> : vector<16x32xf32>
    %14 = tpu.matmul %10, %13, %cst_15 {dimension_numbers = #tpu.dot_dimension_numbers<[1], [0], [0], [1], [0, 0, 1, 1], [], []>} : vector<16x16xbf16>, vector<16x32xbf16>, vector<16x32xf32> -> vector<16x32xf32>
    %15 = arith.addf %11, %14 : vector<16x32xf32>
    %c0_16 = arith.constant 0 : index
    %c0_17 = arith.constant 0 : index
    %16 = vector.load %arg8[%c0_16, %c0_17] : memref<16x32xf32, #tpu.memory_space<vmem>>, vector<16x32xf32>
    tpu.vector_store %arg8[%c0_16, %c0_17], %15 {strides = array<i32>} : memref<16x32xf32, #tpu.memory_space<vmem>>, vector<16x32xf32>,
    %c0_18 = arith.constant 0 : index
    %c0_19 = arith.constant 0 : index
    %17 = vector.load %arg4[%c0_18, %c0_19] : memref<16x16xbf16, #tpu.memory_space<vmem>>, vector<16x16xbf16>
    %c0_20 = arith.constant 0 : index
    %c0_21 = arith.constant 0 : index
    %18 = vector.load %arg8[%c0_20, %c0_21] : memref<16x32xf32, #tpu.memory_space<vmem>>, vector<16x32xf32>
    %c2 = arith.constant 2 : index
    %c0_22 = arith.constant 0 : index
    %c0_23 = arith.constant 0 : index
    %19 = vector.load %arg5[%c2, %c0_22, %c0_23] : memref<3x16x32xbf16, #tpu.memory_space<vmem>>, vector<1x16x32xbf16>
    %20 = vector.shape_cast %19 : vector<1x16x32xbf16> to vector<16x32xbf16>
    %cst_24 = arith.constant dense<0.000000e+00> : vector<16x32xf32>
    %21 = tpu.matmul %17, %20, %cst_24 {dimension_numbers = #tpu.dot_dimension_numbers<[1], [0], [0], [1], [0, 0, 1, 1], [], []>} : vector<16x16xbf16>, vector<16x32xbf16>, vector<16x32xf32> -> vector<16x32xf32>
    %22 = arith.addf %18, %21 : vector<16x32xf32>
    %c0_25 = arith.constant 0 : index
    %c0_26 = arith.constant 0 : index
    %23 = vector.load %arg8[%c0_25, %c0_26] : memref<16x32xf32, #tpu.memory_space<vmem>>, vector<16x32xf32>
    tpu.vector_store %arg8[%c0_25, %c0_26], %22 {strides = array<i32>} : memref<16x32xf32, #tpu.memory_space<vmem>>, vector<16x32xf32>,
    %c0_i32_27 = arith.constant 0 : i32
    %24 = arith.cmpi eq, %arg1, %c0_i32_27 : i32
    %25 = arith.extui %24 : i1 to i32
    %c0_i32_28 = arith.constant 0 : i32
    %26 = arith.cmpi ne, %25, %c0_i32_28 : i32
    scf.if %26 {
      %c0_29 = arith.constant 0 : index
      %c0_30 = arith.constant 0 : index
      %27 = vector.load %arg8[%c0_29, %c0_30] : memref<16x32xf32, #tpu.memory_space<vmem>>, vector<16x32xf32>
      %c0_31 = arith.constant 0 : index
      %c0_32 = arith.constant 0 : index
      %28 = vector.load %arg6[%c0_31, %c0_32] : memref<1x32xf32, #tpu.memory_space<vmem>>, vector<1x32xf32>
      %29 = vector.broadcast %28 : vector<1x32xf32> to vector<16x32xf32>
      %30 = arith.addf %27, %29 : vector<16x32xf32>
      %31 = vector.extract_strided_slice %30 {offsets = [0, 0], sizes = [16, 16], strides = [1, 1]} : vector<16x32xf32> to vector<16x16xf32>
      %32 = vector.extract_strided_slice %30 {offsets = [0, 16], sizes = [16, 16], strides = [1, 1]} : vector<16x32xf32> to vector<16x16xf32>
      %33 = arith.negf %32 : vector<16x16xf32>
      %34 = math.exp %33 : vector<16x16xf32>
      %cst_33 = arith.constant 1.000000e+00 : f32
      %35 = vector.broadcast %cst_33 : f32 to vector<16x16xf32>
      %36 = arith.addf %35, %34 : vector<16x16xf32>
      %37 = arith.divf %35, %36 : vector<16x16xf32>
      %38 = arith.mulf %31, %37 : vector<16x16xf32>
      %c0_34 = arith.constant 0 : index
      %c0_35 = arith.constant 0 : index
      %39 = vector.load %arg7[%c0_34, %c0_35] : memref<16x16xf32, #tpu.memory_space<vmem>>, vector<16x16xf32>
      tpu.vector_store %arg7[%c0_34, %c0_35], %38 {strides = array<i32>} : memref<16x16xf32, #tpu.memory_space<vmem>>, vector<16x16xf32>,
    } else {
    }
    return
  }
  func.func @transform_0(%arg0: i32, %arg1: i32) -> (i32, i32) {
    %c0_i32 = arith.constant 0 : i32
    return %arg0, %arg1 : i32, i32
  }
  func.func @transform_1(%arg0: i32, %arg1: i32) -> (i32, i32) {
    %c0_i32 = arith.constant 0 : i32
    return %arg0, %arg1 : i32, i32
  }
  func.func @transform_2(%arg0: i32, %arg1: i32) -> (i32, i32) {
    %c0_i32 = arith.constant 0 : i32
    return %arg0, %arg1 : i32, i32
  }
  func.func @transform_3(%arg0: i32, %arg1: i32) -> (i32, i32, i32) {
    %c0_i32 = arith.constant 0 : i32
    %c0_i32_0 = arith.constant 0 : i32
    %c0_i32_1 = arith.constant 0 : i32
    return %c0_i32, %arg1, %c0_i32_0 : i32, i32, i32
  }
  func.func @transform_4(%arg0: i32, %arg1: i32) -> (i32, i32) {
    %c0_i32 = arith.constant 0 : i32
    %c0_i32_0 = arith.constant 0 : i32
    %c0_i32_1 = arith.constant 0 : i32
    return %c0_i32, %c0_i32_0 : i32, i32
  }
  func.func @transform_5(%arg0: i32, %arg1: i32) -> (i32, i32) {
    %c0_i32 = arith.constant 0 : i32
    %c0_i32_0 = arith.constant 0 : i32
    return %arg0, %c0_i32 : i32, i32
  }
}

module attributes {stable_mosaic.version = 11 : i64} {
  func.func @_flash_attn_kernel(%arg0: i32, %arg1: i32, %arg2: i32, %arg3: memref<1x8x16xbf16, #tpu.memory_space<vmem>>, %arg4: memref<1x8x16xbf16, #tpu.memory_space<vmem>>, %arg5: memref<1x8x16xbf16, #tpu.memory_space<vmem>>, %arg6: memref<1x1x8xf32, #tpu.memory_space<vmem>>, %arg7: memref<1x8x16xbf16, #tpu.memory_space<vmem>>, %arg8: memref<2x8x1xf32, #tpu.memory_space<vmem>>, %arg9: memref<2x8x1xf32, #tpu.memory_space<vmem>>, %arg10: memref<2x8x8xf32, #tpu.memory_space<vmem>>) attributes {dimension_semantics = [#tpu.dimension_semantics<parallel>, #tpu.dimension_semantics<parallel>, #tpu.dimension_semantics<arbitrary>], iteration_bounds = array<i64: 2, 1, 1>, scalar_prefetch = 0 : i64, scratch_operands = 3 : i64, tpu.core_type = #tpu.core_type<tc>, window_params = [{transform_indices = @transform_0, window_bounds = array<i64: 1, 8, 16>}, {transform_indices = @transform_1, window_bounds = array<i64: 1, 8, 16>}, {transform_indices = @transform_2, window_bounds = array<i64: 1, 8, 16>}, {transform_indices = @transform_3, window_bounds = array<i64: 1, 1, 8>}, {transform_indices = @transform_4, window_bounds = array<i64: 1, 8, 16>}]} {
    %c0_i32 = arith.constant 0 : i32
    %0 = arith.cmpi eq, %arg2, %c0_i32 : i32
    %1 = arith.extui %0 : i1 to i32
    %c0_i32_0 = arith.constant 0 : i32
    %2 = arith.cmpi ne, %1, %c0_i32_0 : i32
    scf.if %2 {
      %cst_58 = arith.constant 0xFF800000 : f32
      %94 = vector.broadcast %cst_58 : f32 to vector<2x8x1xf32>
      %c0_59 = arith.constant 0 : index
      %c0_60 = arith.constant 0 : index
      %c0_61 = arith.constant 0 : index
      %95 = vector.load %arg8[%c0_59, %c0_60, %c0_61] : memref<2x8x1xf32, #tpu.memory_space<vmem>>, vector<2x8x1xf32>
      tpu.vector_store %arg8[%c0_59, %c0_60, %c0_61], %94 {strides = array<i32>} : memref<2x8x1xf32, #tpu.memory_space<vmem>>, vector<2x8x1xf32>,
      %cst_62 = arith.constant 0.000000e+00 : f32
      %96 = vector.broadcast %cst_62 : f32 to vector<2x8x1xf32>
      %c0_63 = arith.constant 0 : index
      %c0_64 = arith.constant 0 : index
      %c0_65 = arith.constant 0 : index
      %97 = vector.load %arg9[%c0_63, %c0_64, %c0_65] : memref<2x8x1xf32, #tpu.memory_space<vmem>>, vector<2x8x1xf32>
      tpu.vector_store %arg9[%c0_63, %c0_64, %c0_65], %96 {strides = array<i32>} : memref<2x8x1xf32, #tpu.memory_space<vmem>>, vector<2x8x1xf32>,
      %cst_66 = arith.constant 0.000000e+00 : f32
      %98 = vector.broadcast %cst_66 : f32 to vector<2x8x8xf32>
      %c0_67 = arith.constant 0 : index
      %c0_68 = arith.constant 0 : index
      %c0_69 = arith.constant 0 : index
      %99 = vector.load %arg10[%c0_67, %c0_68, %c0_69] : memref<2x8x8xf32, #tpu.memory_space<vmem>>, vector<2x8x8xf32>
      tpu.vector_store %arg10[%c0_67, %c0_68, %c0_69], %98 {strides = array<i32>} : memref<2x8x8xf32, #tpu.memory_space<vmem>>, vector<2x8x8xf32>,
    } else {
    }
    %c0 = arith.constant 0 : index
    %c0_1 = arith.constant 0 : index
    %c0_2 = arith.constant 0 : index
    %3 = vector.load %arg3[%c0, %c0_1, %c0_2] : memref<1x8x16xbf16, #tpu.memory_space<vmem>>, vector<1x8x16xbf16>
    %4 = vector.shape_cast %3 : vector<1x8x16xbf16> to vector<8x16xbf16>
    %c0_3 = arith.constant 0 : index
    %c0_4 = arith.constant 0 : index
    %c0_5 = arith.constant 0 : index
    %5 = vector.load %arg4[%c0_3, %c0_4, %c0_5] : memref<1x8x16xbf16, #tpu.memory_space<vmem>>, vector<1x8x16xbf16>
    %6 = vector.shape_cast %5 : vector<1x8x16xbf16> to vector<8x16xbf16>
    %c0_6 = arith.constant 0 : index
    %c0_7 = arith.constant 0 : index
    %c0_8 = arith.constant 0 : index
    %7 = vector.load %arg5[%c0_6, %c0_7, %c0_8] : memref<1x8x16xbf16, #tpu.memory_space<vmem>>, vector<1x8x16xbf16>
    %8 = vector.shape_cast %7 : vector<1x8x16xbf16> to vector<8x16xbf16>
    %c0_9 = arith.constant 0 : index
    %c0_10 = arith.constant 0 : index
    %c0_11 = arith.constant 0 : index
    %9 = vector.load %arg6[%c0_9, %c0_10, %c0_11] : memref<1x1x8xf32, #tpu.memory_space<vmem>>, vector<1x1x8xf32>
    %10 = vector.shape_cast %9 : vector<1x1x8xf32> to vector<1x8xf32>
    %11 = vector.extract_strided_slice %4 {offsets = [0, 0], sizes = [8, 8], strides = [1, 1]} : vector<8x16xbf16> to vector<8x8xbf16>
    %12 = vector.extract_strided_slice %6 {offsets = [0, 0], sizes = [8, 8], strides = [1, 1]} : vector<8x16xbf16> to vector<8x8xbf16>
    %cst = arith.constant dense<0.000000e+00> : vector<8x8xf32>
    %13 = tpu.matmul %11, %12, %cst {dimension_numbers = #tpu.dot_dimension_numbers<[1], [1], [0], [0], [0, 0, 1, 0], [], []>} : vector<8x8xbf16>, vector<8x8xbf16>, vector<8x8xf32> -> vector<8x8xf32>
    %cst_12 = arith.constant 0.353553385 : f32
    %14 = vector.broadcast %cst_12 : f32 to vector<8x8xf32>
    %15 = arith.mulf %13, %14 : vector<8x8xf32>
    %16 = vector.broadcast %10 : vector<1x8xf32> to vector<8x8xf32>
    %17 = arith.addf %15, %16 : vector<8x8xf32>
    %c0_13 = arith.constant 0 : index
    %c0_14 = arith.constant 0 : index
    %c0_15 = arith.constant 0 : index
    %18 = vector.load %arg8[%c0_13, %c0_14, %c0_15] : memref<2x8x1xf32, #tpu.memory_space<vmem>>, vector<1x8x1xf32>
    %19 = vector.shape_cast %18 : vector<1x8x1xf32> to vector<8x1xf32>
    %cst_16 = arith.constant dense<0xFF800000> : vector<8xf32>
    %20 = vector.multi_reduction <maximumf>, %17, %cst_16 [1] : vector<8x8xf32> to vector<8xf32>
    %21 = vector.shape_cast %20 : vector<8xf32> to vector<8x1xf32>
    %22 = arith.maximumf %19, %21 : vector<8x1xf32>
    %23 = arith.subf %19, %22 : vector<8x1xf32>
    %24 = math.exp %23 : vector<8x1xf32>
    %25 = vector.broadcast %22 : vector<8x1xf32> to vector<8x8xf32>
    %26 = arith.subf %17, %25 : vector<8x8xf32>
    %27 = math.exp %26 : vector<8x8xf32>
    %c0_17 = arith.constant 0 : index
    %c0_18 = arith.constant 0 : index
    %c0_19 = arith.constant 0 : index
    %28 = vector.load %arg9[%c0_17, %c0_18, %c0_19] : memref<2x8x1xf32, #tpu.memory_space<vmem>>, vector<1x8x1xf32>
    %29 = vector.shape_cast %28 : vector<1x8x1xf32> to vector<8x1xf32>
    %30 = arith.mulf %24, %29 : vector<8x1xf32>
    %cst_20 = arith.constant dense<0.000000e+00> : vector<8xf32>
    %31 = vector.multi_reduction <add>, %27, %cst_20 [1] : vector<8x8xf32> to vector<8xf32>
    %32 = vector.shape_cast %31 : vector<8xf32> to vector<8x1xf32>
    %33 = arith.addf %30, %32 : vector<8x1xf32>
    %c0_21 = arith.constant 0 : index
    %c0_22 = arith.constant 0 : index
    %c0_23 = arith.constant 0 : index
    %34 = vector.load %arg9[%c0_21, %c0_22, %c0_23] : memref<2x8x1xf32, #tpu.memory_space<vmem>>, vector<1x8x1xf32>
    %35 = vector.shape_cast %34 : vector<1x8x1xf32> to vector<8x1xf32>
    %36 = vector.shape_cast %33 : vector<8x1xf32> to vector<1x8x1xf32>
    tpu.vector_store %arg9[%c0_21, %c0_22, %c0_23], %36 {strides = array<i32>} : memref<2x8x1xf32, #tpu.memory_space<vmem>>, vector<1x8x1xf32>,
    %c0_24 = arith.constant 0 : index
    %c0_25 = arith.constant 0 : index
    %c0_26 = arith.constant 0 : index
    %37 = vector.load %arg10[%c0_24, %c0_25, %c0_26] : memref<2x8x8xf32, #tpu.memory_space<vmem>>, vector<1x8x8xf32>
    %38 = vector.shape_cast %37 : vector<1x8x8xf32> to vector<8x8xf32>
    %39 = vector.broadcast %24 : vector<8x1xf32> to vector<8x8xf32>
    %40 = arith.mulf %39, %38 : vector<8x8xf32>
    %41 = arith.truncf %27 : vector<8x8xf32> to vector<8x8xbf16>
    %42 = vector.extract_strided_slice %8 {offsets = [0, 0], sizes = [8, 8], strides = [1, 1]} : vector<8x16xbf16> to vector<8x8xbf16>
    %cst_27 = arith.constant dense<0.000000e+00> : vector<8x8xf32>
    %43 = tpu.matmul %41, %42, %cst_27 {dimension_numbers = #tpu.dot_dimension_numbers<[1], [0], [0], [1], [0, 0, 1, 1], [], []>} : vector<8x8xbf16>, vector<8x8xbf16>, vector<8x8xf32> -> vector<8x8xf32>
    %44 = arith.addf %40, %43 : vector<8x8xf32>
    %c0_28 = arith.constant 0 : index
    %c0_29 = arith.constant 0 : index
    %c0_30 = arith.constant 0 : index
    %45 = vector.load %arg10[%c0_28, %c0_29, %c0_30] : memref<2x8x8xf32, #tpu.memory_space<vmem>>, vector<1x8x8xf32>
    %46 = vector.shape_cast %45 : vector<1x8x8xf32> to vector<8x8xf32>
    %47 = vector.shape_cast %44 : vector<8x8xf32> to vector<1x8x8xf32>
    tpu.vector_store %arg10[%c0_28, %c0_29, %c0_30], %47 {strides = array<i32>} : memref<2x8x8xf32, #tpu.memory_space<vmem>>, vector<1x8x8xf32>,
    %c0_31 = arith.constant 0 : index
    %c0_32 = arith.constant 0 : index
    %c0_33 = arith.constant 0 : index
    %48 = vector.load %arg8[%c0_31, %c0_32, %c0_33] : memref<2x8x1xf32, #tpu.memory_space<vmem>>, vector<1x8x1xf32>
    %49 = vector.shape_cast %48 : vector<1x8x1xf32> to vector<8x1xf32>
    %50 = vector.shape_cast %22 : vector<8x1xf32> to vector<1x8x1xf32>
    tpu.vector_store %arg8[%c0_31, %c0_32, %c0_33], %50 {strides = array<i32>} : memref<2x8x1xf32, #tpu.memory_space<vmem>>, vector<1x8x1xf32>,
    %51 = vector.extract_strided_slice %4 {offsets = [0, 8], sizes = [8, 8], strides = [1, 1]} : vector<8x16xbf16> to vector<8x8xbf16>
    %52 = vector.extract_strided_slice %6 {offsets = [0, 8], sizes = [8, 8], strides = [1, 1]} : vector<8x16xbf16> to vector<8x8xbf16>
    %cst_34 = arith.constant dense<0.000000e+00> : vector<8x8xf32>
    %53 = tpu.matmul %51, %52, %cst_34 {dimension_numbers = #tpu.dot_dimension_numbers<[1], [1], [0], [0], [0, 0, 1, 0], [], []>} : vector<8x8xbf16>, vector<8x8xbf16>, vector<8x8xf32> -> vector<8x8xf32>
    %cst_35 = arith.constant 0.353553385 : f32
    %54 = vector.broadcast %cst_35 : f32 to vector<8x8xf32>
    %55 = arith.mulf %53, %54 : vector<8x8xf32>
    %56 = vector.broadcast %10 : vector<1x8xf32> to vector<8x8xf32>
    %57 = arith.addf %55, %56 : vector<8x8xf32>
    %c1 = arith.constant 1 : index
    %c0_36 = arith.constant 0 : index
    %c0_37 = arith.constant 0 : index
    %58 = vector.load %arg8[%c1, %c0_36, %c0_37] : memref<2x8x1xf32, #tpu.memory_space<vmem>>, vector<1x8x1xf32>
    %59 = vector.shape_cast %58 : vector<1x8x1xf32> to vector<8x1xf32>
    %cst_38 = arith.constant dense<0xFF800000> : vector<8xf32>
    %60 = vector.multi_reduction <maximumf>, %57, %cst_38 [1] : vector<8x8xf32> to vector<8xf32>
    %61 = vector.shape_cast %60 : vector<8xf32> to vector<8x1xf32>
    %62 = arith.maximumf %59, %61 : vector<8x1xf32>
    %63 = arith.subf %59, %62 : vector<8x1xf32>
    %64 = math.exp %63 : vector<8x1xf32>
    %65 = vector.broadcast %62 : vector<8x1xf32> to vector<8x8xf32>
    %66 = arith.subf %57, %65 : vector<8x8xf32>
    %67 = math.exp %66 : vector<8x8xf32>
    %c1_39 = arith.constant 1 : index
    %c0_40 = arith.constant 0 : index
    %c0_41 = arith.constant 0 : index
    %68 = vector.load %arg9[%c1_39, %c0_40, %c0_41] : memref<2x8x1xf32, #tpu.memory_space<vmem>>, vector<1x8x1xf32>
    %69 = vector.shape_cast %68 : vector<1x8x1xf32> to vector<8x1xf32>
    %70 = arith.mulf %64, %69 : vector<8x1xf32>
    %cst_42 = arith.constant dense<0.000000e+00> : vector<8xf32>
    %71 = vector.multi_reduction <add>, %67, %cst_42 [1] : vector<8x8xf32> to vector<8xf32>
    %72 = vector.shape_cast %71 : vector<8xf32> to vector<8x1xf32>
    %73 = arith.addf %70, %72 : vector<8x1xf32>
    %c1_43 = arith.constant 1 : index
    %c0_44 = arith.constant 0 : index
    %c0_45 = arith.constant 0 : index
    %74 = vector.load %arg9[%c1_43, %c0_44, %c0_45] : memref<2x8x1xf32, #tpu.memory_space<vmem>>, vector<1x8x1xf32>
    %75 = vector.shape_cast %74 : vector<1x8x1xf32> to vector<8x1xf32>
    %76 = vector.shape_cast %73 : vector<8x1xf32> to vector<1x8x1xf32>
    tpu.vector_store %arg9[%c1_43, %c0_44, %c0_45], %76 {strides = array<i32>} : memref<2x8x1xf32, #tpu.memory_space<vmem>>, vector<1x8x1xf32>,
    %c1_46 = arith.constant 1 : index
    %c0_47 = arith.constant 0 : index
    %c0_48 = arith.constant 0 : index
    %77 = vector.load %arg10[%c1_46, %c0_47, %c0_48] : memref<2x8x8xf32, #tpu.memory_space<vmem>>, vector<1x8x8xf32>
    %78 = vector.shape_cast %77 : vector<1x8x8xf32> to vector<8x8xf32>
    %79 = vector.broadcast %64 : vector<8x1xf32> to vector<8x8xf32>
    %80 = arith.mulf %79, %78 : vector<8x8xf32>
    %81 = arith.truncf %67 : vector<8x8xf32> to vector<8x8xbf16>
    %82 = vector.extract_strided_slice %8 {offsets = [0, 8], sizes = [8, 8], strides = [1, 1]} : vector<8x16xbf16> to vector<8x8xbf16>
    %cst_49 = arith.constant dense<0.000000e+00> : vector<8x8xf32>
    %83 = tpu.matmul %81, %82, %cst_49 {dimension_numbers = #tpu.dot_dimension_numbers<[1], [0], [0], [1], [0, 0, 1, 1], [], []>} : vector<8x8xbf16>, vector<8x8xbf16>, vector<8x8xf32> -> vector<8x8xf32>
    %84 = arith.addf %80, %83 : vector<8x8xf32>
    %c1_50 = arith.constant 1 : index
    %c0_51 = arith.constant 0 : index
    %c0_52 = arith.constant 0 : index
    %85 = vector.load %arg10[%c1_50, %c0_51, %c0_52] : memref<2x8x8xf32, #tpu.memory_space<vmem>>, vector<1x8x8xf32>
    %86 = vector.shape_cast %85 : vector<1x8x8xf32> to vector<8x8xf32>
    %87 = vector.shape_cast %84 : vector<8x8xf32> to vector<1x8x8xf32>
    tpu.vector_store %arg10[%c1_50, %c0_51, %c0_52], %87 {strides = array<i32>} : memref<2x8x8xf32, #tpu.memory_space<vmem>>, vector<1x8x8xf32>,
    %c1_53 = arith.constant 1 : index
    %c0_54 = arith.constant 0 : index
    %c0_55 = arith.constant 0 : index
    %88 = vector.load %arg8[%c1_53, %c0_54, %c0_55] : memref<2x8x1xf32, #tpu.memory_space<vmem>>, vector<1x8x1xf32>
    %89 = vector.shape_cast %88 : vector<1x8x1xf32> to vector<8x1xf32>
    %90 = vector.shape_cast %62 : vector<8x1xf32> to vector<1x8x1xf32>
    tpu.vector_store %arg8[%c1_53, %c0_54, %c0_55], %90 {strides = array<i32>} : memref<2x8x1xf32, #tpu.memory_space<vmem>>, vector<1x8x1xf32>,
    %c0_i32_56 = arith.constant 0 : i32
    %91 = arith.cmpi eq, %arg2, %c0_i32_56 : i32
    %92 = arith.extui %91 : i1 to i32
    %c0_i32_57 = arith.constant 0 : i32
    %93 = arith.cmpi ne, %92, %c0_i32_57 : i32
    scf.if %93 {
      %c0_58 = arith.constant 0 : index
      %c0_59 = arith.constant 0 : index
      %c0_60 = arith.constant 0 : index
      %94 = vector.load %arg10[%c0_58, %c0_59, %c0_60] : memref<2x8x8xf32, #tpu.memory_space<vmem>>, vector<1x8x8xf32>
      %95 = vector.shape_cast %94 : vector<1x8x8xf32> to vector<8x8xf32>
      %c0_61 = arith.constant 0 : index
      %c0_62 = arith.constant 0 : index
      %c0_63 = arith.constant 0 : index
      %96 = vector.load %arg9[%c0_61, %c0_62, %c0_63] : memref<2x8x1xf32, #tpu.memory_space<vmem>>, vector<1x8x1xf32>
      %97 = vector.shape_cast %96 : vector<1x8x1xf32> to vector<8x1xf32>
      %98 = tpu.reciprocal %97 {approx = true} : vector<8x1xf32> -> vector<8x1xf32>
      %99 = vector.broadcast %98 : vector<8x1xf32> to vector<8x8xf32>
      %100 = arith.mulf %95, %99 : vector<8x8xf32>
      %c1_64 = arith.constant 1 : index
      %c0_65 = arith.constant 0 : index
      %c0_66 = arith.constant 0 : index
      %101 = vector.load %arg10[%c1_64, %c0_65, %c0_66] : memref<2x8x8xf32, #tpu.memory_space<vmem>>, vector<1x8x8xf32>
      %102 = vector.shape_cast %101 : vector<1x8x8xf32> to vector<8x8xf32>
      %c1_67 = arith.constant 1 : index
      %c0_68 = arith.constant 0 : index
      %c0_69 = arith.constant 0 : index
      %103 = vector.load %arg9[%c1_67, %c0_68, %c0_69] : memref<2x8x1xf32, #tpu.memory_space<vmem>>, vector<1x8x1xf32>
      %104 = vector.shape_cast %103 : vector<1x8x1xf32> to vector<8x1xf32>
      %105 = tpu.reciprocal %104 {approx = true} : vector<8x1xf32> -> vector<8x1xf32>
      %106 = vector.broadcast %105 : vector<8x1xf32> to vector<8x8xf32>
      %107 = arith.mulf %102, %106 : vector<8x8xf32>
      %108 = tpu.concatenate %100, %107 in 1 : vector<8x8xf32>, vector<8x8xf32> -> vector<8x16xf32>
      %109 = arith.truncf %108 : vector<8x16xf32> to vector<8x16xbf16>
      %c0_70 = arith.constant 0 : index
      %c0_71 = arith.constant 0 : index
      %c0_72 = arith.constant 0 : index
      %110 = vector.load %arg7[%c0_70, %c0_71, %c0_72] : memref<1x8x16xbf16, #tpu.memory_space<vmem>>, vector<1x8x16xbf16>
      %111 = vector.shape_cast %110 : vector<1x8x16xbf16> to vector<8x16xbf16>
      %112 = vector.shape_cast %109 : vector<8x16xbf16> to vector<1x8x16xbf16>
      tpu.vector_store %arg7[%c0_70, %c0_71, %c0_72], %112 {strides = array<i32>} : memref<1x8x16xbf16, #tpu.memory_space<vmem>>, vector<1x8x16xbf16>,
    } else {
    }
    return
  }
  func.func @transform_0(%arg0: i32, %arg1: i32, %arg2: i32) -> (i32, i32, i32) {
    %c0_i32 = arith.constant 0 : i32
    %c0_i32_0 = arith.constant 0 : i32
    return %arg0, %arg1, %c0_i32 : i32, i32, i32
  }
  func.func @transform_1(%arg0: i32, %arg1: i32, %arg2: i32) -> (i32, i32, i32) {
    %c0_i32 = arith.constant 0 : i32
    %c0_i32_0 = arith.constant 0 : i32
    return %arg0, %arg2, %c0_i32 : i32, i32, i32
  }
  func.func @transform_2(%arg0: i32, %arg1: i32, %arg2: i32) -> (i32, i32, i32) {
    %c0_i32 = arith.constant 0 : i32
    %c0_i32_0 = arith.constant 0 : i32
    return %arg0, %arg2, %c0_i32 : i32, i32, i32
  }
  func.func @transform_3(%arg0: i32, %arg1: i32, %arg2: i32) -> (i32, i32, i32) {
    %c0_i32 = arith.constant 0 : i32
    %c0_i32_0 = arith.constant 0 : i32
    return %arg0, %c0_i32, %arg2 : i32, i32, i32
  }
  func.func @transform_4(%arg0: i32, %arg1: i32, %arg2: i32) -> (i32, i32, i32) {
    %c0_i32 = arith.constant 0 : i32
    %c0_i32_0 = arith.constant 0 : i32
    return %arg0, %arg1, %c0_i32 : i32, i32, i32
  }
}

module attributes {stable_mosaic.version = 11 : i64} {
  func.func @_matmul_add_ln_kernel(%arg0: i32, %arg1: i32, %arg2: i32, %arg3: memref<16x16xbf16, #tpu.memory_space<vmem>>, %arg4: memref<16x16xbf16, #tpu.memory_space<vmem>>, %arg5: memref<1x16xf32, #tpu.memory_space<vmem>>, %arg6: memref<16x16xf32, #tpu.memory_space<vmem>>, %arg7: memref<1x16xf32, #tpu.memory_space<vmem>>, %arg8: memref<1x16xf32, #tpu.memory_space<vmem>>, %arg9: memref<16x16xf32, #tpu.memory_space<vmem>>, %arg10: memref<16x16xf32, #tpu.memory_space<vmem>>) attributes {dimension_semantics = [#tpu.dimension_semantics<parallel>, #tpu.dimension_semantics<parallel>, #tpu.dimension_semantics<arbitrary>], iteration_bounds = array<i64: 1, 1, 1>, scalar_prefetch = 0 : i64, scratch_operands = 1 : i64, tpu.core_type = #tpu.core_type<tc>, window_params = [{transform_indices = @transform_0, window_bounds = array<i64: 16, 16>}, {transform_indices = @transform_1, window_bounds = array<i64: 16, 16>}, {transform_indices = @transform_2, window_bounds = array<i64: 1, 16>}, {transform_indices = @transform_3, window_bounds = array<i64: 16, 16>}, {pipeline_mode = #tpu.pipeline_mode<synchronous>, transform_indices = @transform_4, window_bounds = array<i64: 1, 16>}, {pipeline_mode = #tpu.pipeline_mode<synchronous>, transform_indices = @transform_5, window_bounds = array<i64: 1, 16>}, {transform_indices = @transform_6, window_bounds = array<i64: 16, 16>}]} {
    %c0_i32 = arith.constant 0 : i32
    %0 = arith.cmpi eq, %arg2, %c0_i32 : i32
    %1 = arith.extui %0 : i1 to i32
    %c0_i32_0 = arith.constant 0 : i32
    %2 = arith.cmpi ne, %1, %c0_i32_0 : i32
    scf.if %2 {
      %cst_10 = arith.constant 0.000000e+00 : f32
      %12 = vector.broadcast %cst_10 : f32 to vector<16x16xf32>
      %c0_11 = arith.constant 0 : index
      %c0_12 = arith.constant 0 : index
      %13 = vector.load %arg10[%c0_11, %c0_12] : memref<16x16xf32, #tpu.memory_space<vmem>>, vector<16x16xf32>
      tpu.vector_store %arg10[%c0_11, %c0_12], %12 {strides = array<i32>} : memref<16x16xf32, #tpu.memory_space<vmem>>, vector<16x16xf32>,
    } else {
    }
    %c0 = arith.constant 0 : index
    %c0_1 = arith.constant 0 : index
    %3 = vector.load %arg3[%c0, %c0_1] : memref<16x16xbf16, #tpu.memory_space<vmem>>, vector<16x16xbf16>
    %c0_2 = arith.constant 0 : index
    %c0_3 = arith.constant 0 : index
    %4 = vector.load %arg10[%c0_2, %c0_3] : memref<16x16xf32, #tpu.memory_space<vmem>>, vector<16x16xf32>
    %c0_4 = arith.constant 0 : index
    %c0_5 = arith.constant 0 : index
    %5 = vector.load %arg4[%c0_4, %c0_5] : memref<16x16xbf16, #tpu.memory_space<vmem>>, vector<16x16xbf16>
    %cst = arith.constant dense<0.000000e+00> : vector<16x16xf32>
    %6 = tpu.matmul %3, %5, %cst {dimension_numbers = #tpu.dot_dimension_numbers<[1], [0], [0], [1], [0, 0, 1, 1], [], []>} : vector<16x16xbf16>, vector<16x16xbf16>, vector<16x16xf32> -> vector<16x16xf32>
    %7 = arith.addf %4, %6 : vector<16x16xf32>
    %c0_6 = arith.constant 0 : index
    %c0_7 = arith.constant 0 : index
    %8 = vector.load %arg10[%c0_6, %c0_7] : memref<16x16xf32, #tpu.memory_space<vmem>>, vector<16x16xf32>
    tpu.vector_store %arg10[%c0_6, %c0_7], %7 {strides = array<i32>} : memref<16x16xf32, #tpu.memory_space<vmem>>, vector<16x16xf32>,
    %c0_i32_8 = arith.constant 0 : i32
    %9 = arith.cmpi eq, %arg2, %c0_i32_8 : i32
    %10 = arith.extui %9 : i1 to i32
    %c0_i32_9 = arith.constant 0 : i32
    %11 = arith.cmpi ne, %10, %c0_i32_9 : i32
    scf.if %11 {
      %c0_10 = arith.constant 0 : index
      %c0_11 = arith.constant 0 : index
      %12 = vector.load %arg10[%c0_10, %c0_11] : memref<16x16xf32, #tpu.memory_space<vmem>>, vector<16x16xf32>
      %c0_12 = arith.constant 0 : index
      %c0_13 = arith.constant 0 : index
      %13 = vector.load %arg5[%c0_12, %c0_13] : memref<1x16xf32, #tpu.memory_space<vmem>>, vector<1x16xf32>
      %14 = vector.broadcast %13 : vector<1x16xf32> to vector<16x16xf32>
      %15 = arith.addf %12, %14 : vector<16x16xf32>
      %c0_14 = arith.constant 0 : index
      %c0_15 = arith.constant 0 : index
      %16 = vector.load %arg6[%c0_14, %c0_15] : memref<16x16xf32, #tpu.memory_space<vmem>>, vector<16x16xf32>
      %17 = arith.addf %15, %16 : vector<16x16xf32>
      %c0_16 = arith.constant 0 : index
      %c0_17 = arith.constant 0 : index
      %18 = vector.load %arg7[%c0_16, %c0_17] : memref<1x16xf32, #tpu.memory_space<vmem>>, vector<1x16xf32>
      %c0_18 = arith.constant 0 : index
      %c0_19 = arith.constant 0 : index
      %19 = vector.load %arg8[%c0_18, %c0_19] : memref<1x16xf32, #tpu.memory_space<vmem>>, vector<1x16xf32>
      %cst_20 = arith.constant dense<0.000000e+00> : vector<16xf32>
      %20 = vector.multi_reduction <add>, %17, %cst_20 [1] : vector<16x16xf32> to vector<16xf32>
      %21 = vector.shape_cast %20 : vector<16xf32> to vector<16x1xf32>
      %cst_21 = arith.constant 1.600000e+01 : f32
      %22 = vector.broadcast %cst_21 : f32 to vector<16x1xf32>
      %23 = arith.divf %21, %22 : vector<16x1xf32>
      %24 = vector.broadcast %23 : vector<16x1xf32> to vector<16x16xf32>
      %25 = arith.subf %17, %24 : vector<16x16xf32>
      %26 = arith.mulf %25, %25 : vector<16x16xf32>
      %cst_22 = arith.constant dense<0.000000e+00> : vector<16xf32>
      %27 = vector.multi_reduction <add>, %26, %cst_22 [1] : vector<16x16xf32> to vector<16xf32>
      %28 = vector.shape_cast %27 : vector<16xf32> to vector<16x1xf32>
      %cst_23 = arith.constant 1.600000e+01 : f32
      %29 = vector.broadcast %cst_23 : f32 to vector<16x1xf32>
      %30 = arith.divf %28, %29 : vector<16x1xf32>
      %31 = vector.broadcast %23 : vector<16x1xf32> to vector<16x16xf32>
      %32 = arith.subf %17, %31 : vector<16x16xf32>
      %cst_24 = arith.constant 9.99999974E-6 : f32
      %33 = vector.broadcast %cst_24 : f32 to vector<16x1xf32>
      %34 = arith.addf %30, %33 : vector<16x1xf32>
      %35 = math.rsqrt %34 : vector<16x1xf32>
      %36 = vector.broadcast %35 : vector<16x1xf32> to vector<16x16xf32>
      %37 = arith.mulf %32, %36 : vector<16x16xf32>
      %38 = vector.broadcast %18 : vector<1x16xf32> to vector<16x16xf32>
      %39 = arith.mulf %37, %38 : vector<16x16xf32>
      %40 = vector.broadcast %19 : vector<1x16xf32> to vector<16x16xf32>
      %41 = arith.addf %39, %40 : vector<16x16xf32>
      %c0_25 = arith.constant 0 : index
      %c0_26 = arith.constant 0 : index
      %42 = vector.load %arg9[%c0_25, %c0_26] : memref<16x16xf32, #tpu.memory_space<vmem>>, vector<16x16xf32>
      tpu.vector_store %arg9[%c0_25, %c0_26], %41 {strides = array<i32>} : memref<16x16xf32, #tpu.memory_space<vmem>>, vector<16x16xf32>,
    } else {
    }
    return
  }
  func.func @transform_0(%arg0: i32, %arg1: i32, %arg2: i32) -> (i32, i32) {
    %c0_i32 = arith.constant 0 : i32
    return %arg0, %arg2 : i32, i32
  }
  func.func @transform_1(%arg0: i32, %arg1: i32, %arg2: i32) -> (i32, i32) {
    %c0_i32 = arith.constant 0 : i32
    return %arg2, %arg1 : i32, i32
  }
  func.func @transform_2(%arg0: i32, %arg1: i32, %arg2: i32) -> (i32, i32) {
    %c0_i32 = arith.constant 0 : i32
    %c0_i32_0 = arith.constant 0 : i32
    return %c0_i32, %arg1 : i32, i32
  }
  func.func @transform_3(%arg0: i32, %arg1: i32, %arg2: i32) -> (i32, i32) {
    %c0_i32 = arith.constant 0 : i32
    %c0_i32_0 = arith.constant 0 : i32
    return %arg0, %c0_i32 : i32, i32
  }
  func.func @transform_4(%arg0: i32, %arg1: i32, %arg2: i32) -> (i32, i32) {
    %c0_i32 = arith.constant 0 : i32
    %c0_i32_0 = arith.constant 0 : i32
    %c0_i32_1 = arith.constant 0 : i32
    return %c0_i32, %c0_i32_0 : i32, i32
  }
  func.func @transform_5(%arg0: i32, %arg1: i32, %arg2: i32) -> (i32, i32) {
    %c0_i32 = arith.constant 0 : i32
    %c0_i32_0 = arith.constant 0 : i32
    %c0_i32_1 = arith.constant 0 : i32
    return %c0_i32, %c0_i32_0 : i32, i32
  }
  func.func @transform_6(%arg0: i32, %arg1: i32, %arg2: i32) -> (i32, i32) {
    %c0_i32 = arith.constant 0 : i32
    return %arg0, %arg1 : i32, i32
  }
}

module attributes {stable_mosaic.version = 11 : i64} {
  func.func @_matmul_kernel(%arg0: i32, %arg1: i32, %arg2: i32, %arg3: memref<16x16xf32, #tpu.memory_space<vmem>>, %arg4: memref<16x32xbf16, #tpu.memory_space<vmem>>, %arg5: memref<1x32xf32, #tpu.memory_space<vmem>>, %arg6: memref<16x32xbf16, #tpu.memory_space<vmem>>, %arg7: memref<16x32xf32, #tpu.memory_space<vmem>>) attributes {dimension_semantics = [#tpu.dimension_semantics<parallel>, #tpu.dimension_semantics<parallel>, #tpu.dimension_semantics<arbitrary>], iteration_bounds = array<i64: 1, 1, 1>, scalar_prefetch = 0 : i64, scratch_operands = 1 : i64, tpu.core_type = #tpu.core_type<tc>, window_params = [{transform_indices = @transform_0, window_bounds = array<i64: 16, 16>}, {transform_indices = @transform_1, window_bounds = array<i64: 16, 32>}, {transform_indices = @transform_2, window_bounds = array<i64: 1, 32>}, {transform_indices = @transform_3, window_bounds = array<i64: 16, 32>}]} {
    %c0_i32 = arith.constant 0 : i32
    %0 = arith.cmpi eq, %arg2, %c0_i32 : i32
    %1 = arith.extui %0 : i1 to i32
    %c0_i32_0 = arith.constant 0 : i32
    %2 = arith.cmpi ne, %1, %c0_i32_0 : i32
    scf.if %2 {
      %cst_10 = arith.constant 0.000000e+00 : f32
      %13 = vector.broadcast %cst_10 : f32 to vector<16x32xf32>
      %c0_11 = arith.constant 0 : index
      %c0_12 = arith.constant 0 : index
      %14 = vector.load %arg7[%c0_11, %c0_12] : memref<16x32xf32, #tpu.memory_space<vmem>>, vector<16x32xf32>
      tpu.vector_store %arg7[%c0_11, %c0_12], %13 {strides = array<i32>} : memref<16x32xf32, #tpu.memory_space<vmem>>, vector<16x32xf32>,
    } else {
    }
    %c0 = arith.constant 0 : index
    %c0_1 = arith.constant 0 : index
    %3 = vector.load %arg3[%c0, %c0_1] : memref<16x16xf32, #tpu.memory_space<vmem>>, vector<16x16xf32>
    %4 = arith.truncf %3 : vector<16x16xf32> to vector<16x16xbf16>
    %c0_2 = arith.constant 0 : index
    %c0_3 = arith.constant 0 : index
    %5 = vector.load %arg7[%c0_2, %c0_3] : memref<16x32xf32, #tpu.memory_space<vmem>>, vector<16x32xf32>
    %c0_4 = arith.constant 0 : index
    %c0_5 = arith.constant 0 : index
    %6 = vector.load %arg4[%c0_4, %c0_5] : memref<16x32xbf16, #tpu.memory_space<vmem>>, vector<16x32xbf16>
    %cst = arith.constant dense<0.000000e+00> : vector<16x32xf32>
    %7 = tpu.matmul %4, %6, %cst {dimension_numbers = #tpu.dot_dimension_numbers<[1], [0], [0], [1], [0, 0, 1, 1], [], []>} : vector<16x16xbf16>, vector<16x32xbf16>, vector<16x32xf32> -> vector<16x32xf32>
    %8 = arith.addf %5, %7 : vector<16x32xf32>
    %c0_6 = arith.constant 0 : index
    %c0_7 = arith.constant 0 : index
    %9 = vector.load %arg7[%c0_6, %c0_7] : memref<16x32xf32, #tpu.memory_space<vmem>>, vector<16x32xf32>
    tpu.vector_store %arg7[%c0_6, %c0_7], %8 {strides = array<i32>} : memref<16x32xf32, #tpu.memory_space<vmem>>, vector<16x32xf32>,
    %c0_i32_8 = arith.constant 0 : i32
    %10 = arith.cmpi eq, %arg2, %c0_i32_8 : i32
    %11 = arith.extui %10 : i1 to i32
    %c0_i32_9 = arith.constant 0 : i32
    %12 = arith.cmpi ne, %11, %c0_i32_9 : i32
    scf.if %12 {
      %c0_10 = arith.constant 0 : index
      %c0_11 = arith.constant 0 : index
      %13 = vector.load %arg7[%c0_10, %c0_11] : memref<16x32xf32, #tpu.memory_space<vmem>>, vector<16x32xf32>
      %c0_12 = arith.constant 0 : index
      %c0_13 = arith.constant 0 : index
      %14 = vector.load %arg5[%c0_12, %c0_13] : memref<1x32xf32, #tpu.memory_space<vmem>>, vector<1x32xf32>
      %15 = vector.broadcast %14 : vector<1x32xf32> to vector<16x32xf32>
      %16 = arith.addf %13, %15 : vector<16x32xf32>
      %cst_14 = arith.constant 0.000000e+00 : f32
      %17 = vector.broadcast %cst_14 : f32 to vector<16x32xf32>
      %18 = arith.maximumf %16, %17 : vector<16x32xf32>
      %19 = arith.truncf %18 : vector<16x32xf32> to vector<16x32xbf16>
      %c0_15 = arith.constant 0 : index
      %c0_16 = arith.constant 0 : index
      %20 = vector.load %arg6[%c0_15, %c0_16] : memref<16x32xbf16, #tpu.memory_space<vmem>>, vector<16x32xbf16>
      tpu.vector_store %arg6[%c0_15, %c0_16], %19 {strides = array<i32>} : memref<16x32xbf16, #tpu.memory_space<vmem>>, vector<16x32xbf16>,
    } else {
    }
    return
  }
  func.func @transform_0(%arg0: i32, %arg1: i32, %arg2: i32) -> (i32, i32) {
    %c0_i32 = arith.constant 0 : i32
    return %arg0, %arg2 : i32, i32
  }
  func.func @transform_1(%arg0: i32, %arg1: i32, %arg2: i32) -> (i32, i32) {
    %c0_i32 = arith.constant 0 : i32
    return %arg2, %arg1 : i32, i32
  }
  func.func @transform_2(%arg0: i32, %arg1: i32, %arg2: i32) -> (i32, i32) {
    %c0_i32 = arith.constant 0 : i32
    %c0_i32_0 = arith.constant 0 : i32
    return %c0_i32, %arg1 : i32, i32
  }
  func.func @transform_3(%arg0: i32, %arg1: i32, %arg2: i32) -> (i32, i32) {
    %c0_i32 = arith.constant 0 : i32
    return %arg0, %arg1 : i32, i32
  }
}

module attributes {stable_mosaic.version = 11 : i64} {
  func.func @_matmul_add_ln_kernel(%arg0: i32, %arg1: i32, %arg2: i32, %arg3: memref<16x32xbf16, #tpu.memory_space<vmem>>, %arg4: memref<32x16xbf16, #tpu.memory_space<vmem>>, %arg5: memref<1x16xf32, #tpu.memory_space<vmem>>, %arg6: memref<16x16xf32, #tpu.memory_space<vmem>>, %arg7: memref<1x16xf32, #tpu.memory_space<vmem>>, %arg8: memref<1x16xf32, #tpu.memory_space<vmem>>, %arg9: memref<16x16xf32, #tpu.memory_space<vmem>>, %arg10: memref<16x16xf32, #tpu.memory_space<vmem>>) attributes {dimension_semantics = [#tpu.dimension_semantics<parallel>, #tpu.dimension_semantics<parallel>, #tpu.dimension_semantics<arbitrary>], iteration_bounds = array<i64: 1, 1, 1>, scalar_prefetch = 0 : i64, scratch_operands = 1 : i64, tpu.core_type = #tpu.core_type<tc>, window_params = [{transform_indices = @transform_0, window_bounds = array<i64: 16, 32>}, {transform_indices = @transform_1, window_bounds = array<i64: 32, 16>}, {transform_indices = @transform_2, window_bounds = array<i64: 1, 16>}, {transform_indices = @transform_3, window_bounds = array<i64: 16, 16>}, {pipeline_mode = #tpu.pipeline_mode<synchronous>, transform_indices = @transform_4, window_bounds = array<i64: 1, 16>}, {pipeline_mode = #tpu.pipeline_mode<synchronous>, transform_indices = @transform_5, window_bounds = array<i64: 1, 16>}, {transform_indices = @transform_6, window_bounds = array<i64: 16, 16>}]} {
    %c0_i32 = arith.constant 0 : i32
    %0 = arith.cmpi eq, %arg2, %c0_i32 : i32
    %1 = arith.extui %0 : i1 to i32
    %c0_i32_0 = arith.constant 0 : i32
    %2 = arith.cmpi ne, %1, %c0_i32_0 : i32
    scf.if %2 {
      %cst_10 = arith.constant 0.000000e+00 : f32
      %12 = vector.broadcast %cst_10 : f32 to vector<16x16xf32>
      %c0_11 = arith.constant 0 : index
      %c0_12 = arith.constant 0 : index
      %13 = vector.load %arg10[%c0_11, %c0_12] : memref<16x16xf32, #tpu.memory_space<vmem>>, vector<16x16xf32>
      tpu.vector_store %arg10[%c0_11, %c0_12], %12 {strides = array<i32>} : memref<16x16xf32, #tpu.memory_space<vmem>>, vector<16x16xf32>,
    } else {
    }
    %c0 = arith.constant 0 : index
    %c0_1 = arith.constant 0 : index
    %3 = vector.load %arg3[%c0, %c0_1] : memref<16x32xbf16, #tpu.memory_space<vmem>>, vector<16x32xbf16>
    %c0_2 = arith.constant 0 : index
    %c0_3 = arith.constant 0 : index
    %4 = vector.load %arg10[%c0_2, %c0_3] : memref<16x16xf32, #tpu.memory_space<vmem>>, vector<16x16xf32>
    %c0_4 = arith.constant 0 : index
    %c0_5 = arith.constant 0 : index
    %5 = vector.load %arg4[%c0_4, %c0_5] : memref<32x16xbf16, #tpu.memory_space<vmem>>, vector<32x16xbf16>
    %cst = arith.constant dense<0.000000e+00> : vector<16x16xf32>
    %6 = tpu.matmul %3, %5, %cst {dimension_numbers = #tpu.dot_dimension_numbers<[1], [0], [0], [1], [0, 0, 1, 1], [], []>} : vector<16x32xbf16>, vector<32x16xbf16>, vector<16x16xf32> -> vector<16x16xf32>
    %7 = arith.addf %4, %6 : vector<16x16xf32>
    %c0_6 = arith.constant 0 : index
    %c0_7 = arith.constant 0 : index
    %8 = vector.load %arg10[%c0_6, %c0_7] : memref<16x16xf32, #tpu.memory_space<vmem>>, vector<16x16xf32>
    tpu.vector_store %arg10[%c0_6, %c0_7], %7 {strides = array<i32>} : memref<16x16xf32, #tpu.memory_space<vmem>>, vector<16x16xf32>,
    %c0_i32_8 = arith.constant 0 : i32
    %9 = arith.cmpi eq, %arg2, %c0_i32_8 : i32
    %10 = arith.extui %9 : i1 to i32
    %c0_i32_9 = arith.constant 0 : i32
    %11 = arith.cmpi ne, %10, %c0_i32_9 : i32
    scf.if %11 {
      %c0_10 = arith.constant 0 : index
      %c0_11 = arith.constant 0 : index
      %12 = vector.load %arg10[%c0_10, %c0_11] : memref<16x16xf32, #tpu.memory_space<vmem>>, vector<16x16xf32>
      %c0_12 = arith.constant 0 : index
      %c0_13 = arith.constant 0 : index
      %13 = vector.load %arg5[%c0_12, %c0_13] : memref<1x16xf32, #tpu.memory_space<vmem>>, vector<1x16xf32>
      %14 = vector.broadcast %13 : vector<1x16xf32> to vector<16x16xf32>
      %15 = arith.addf %12, %14 : vector<16x16xf32>
      %c0_14 = arith.constant 0 : index
      %c0_15 = arith.constant 0 : index
      %16 = vector.load %arg6[%c0_14, %c0_15] : memref<16x16xf32, #tpu.memory_space<vmem>>, vector<16x16xf32>
      %17 = arith.addf %15, %16 : vector<16x16xf32>
      %c0_16 = arith.constant 0 : index
      %c0_17 = arith.constant 0 : index
      %18 = vector.load %arg7[%c0_16, %c0_17] : memref<1x16xf32, #tpu.memory_space<vmem>>, vector<1x16xf32>
      %c0_18 = arith.constant 0 : index
      %c0_19 = arith.constant 0 : index
      %19 = vector.load %arg8[%c0_18, %c0_19] : memref<1x16xf32, #tpu.memory_space<vmem>>, vector<1x16xf32>
      %cst_20 = arith.constant dense<0.000000e+00> : vector<16xf32>
      %20 = vector.multi_reduction <add>, %17, %cst_20 [1] : vector<16x16xf32> to vector<16xf32>
      %21 = vector.shape_cast %20 : vector<16xf32> to vector<16x1xf32>
      %cst_21 = arith.constant 1.600000e+01 : f32
      %22 = vector.broadcast %cst_21 : f32 to vector<16x1xf32>
      %23 = arith.divf %21, %22 : vector<16x1xf32>
      %24 = vector.broadcast %23 : vector<16x1xf32> to vector<16x16xf32>
      %25 = arith.subf %17, %24 : vector<16x16xf32>
      %26 = arith.mulf %25, %25 : vector<16x16xf32>
      %cst_22 = arith.constant dense<0.000000e+00> : vector<16xf32>
      %27 = vector.multi_reduction <add>, %26, %cst_22 [1] : vector<16x16xf32> to vector<16xf32>
      %28 = vector.shape_cast %27 : vector<16xf32> to vector<16x1xf32>
      %cst_23 = arith.constant 1.600000e+01 : f32
      %29 = vector.broadcast %cst_23 : f32 to vector<16x1xf32>
      %30 = arith.divf %28, %29 : vector<16x1xf32>
      %31 = vector.broadcast %23 : vector<16x1xf32> to vector<16x16xf32>
      %32 = arith.subf %17, %31 : vector<16x16xf32>
      %cst_24 = arith.constant 9.99999974E-6 : f32
      %33 = vector.broadcast %cst_24 : f32 to vector<16x1xf32>
      %34 = arith.addf %30, %33 : vector<16x1xf32>
      %35 = math.rsqrt %34 : vector<16x1xf32>
      %36 = vector.broadcast %35 : vector<16x1xf32> to vector<16x16xf32>
      %37 = arith.mulf %32, %36 : vector<16x16xf32>
      %38 = vector.broadcast %18 : vector<1x16xf32> to vector<16x16xf32>
      %39 = arith.mulf %37, %38 : vector<16x16xf32>
      %40 = vector.broadcast %19 : vector<1x16xf32> to vector<16x16xf32>
      %41 = arith.addf %39, %40 : vector<16x16xf32>
      %c0_25 = arith.constant 0 : index
      %c0_26 = arith.constant 0 : index
      %42 = vector.load %arg9[%c0_25, %c0_26] : memref<16x16xf32, #tpu.memory_space<vmem>>, vector<16x16xf32>
      tpu.vector_store %arg9[%c0_25, %c0_26], %41 {strides = array<i32>} : memref<16x16xf32, #tpu.memory_space<vmem>>, vector<16x16xf32>,
    } else {
    }
    return
  }
  func.func @transform_0(%arg0: i32, %arg1: i32, %arg2: i32) -> (i32, i32) {
    %c0_i32 = arith.constant 0 : i32
    return %arg0, %arg2 : i32, i32
  }
  func.func @transform_1(%arg0: i32, %arg1: i32, %arg2: i32) -> (i32, i32) {
    %c0_i32 = arith.constant 0 : i32
    return %arg2, %arg1 : i32, i32
  }
  func.func @transform_2(%arg0: i32, %arg1: i32, %arg2: i32) -> (i32, i32) {
    %c0_i32 = arith.constant 0 : i32
    %c0_i32_0 = arith.constant 0 : i32
    return %c0_i32, %arg1 : i32, i32
  }
  func.func @transform_3(%arg0: i32, %arg1: i32, %arg2: i32) -> (i32, i32) {
    %c0_i32 = arith.constant 0 : i32
    %c0_i32_0 = arith.constant 0 : i32
    return %arg0, %c0_i32 : i32, i32
  }
  func.func @transform_4(%arg0: i32, %arg1: i32, %arg2: i32) -> (i32, i32) {
    %c0_i32 = arith.constant 0 : i32
    %c0_i32_0 = arith.constant 0 : i32
    %c0_i32_1 = arith.constant 0 : i32
    return %c0_i32, %c0_i32_0 : i32, i32
  }
  func.func @transform_5(%arg0: i32, %arg1: i32, %arg2: i32) -> (i32, i32) {
    %c0_i32 = arith.constant 0 : i32
    %c0_i32_0 = arith.constant 0 : i32
    %c0_i32_1 = arith.constant 0 : i32
    return %c0_i32, %c0_i32_0 : i32, i32
  }
  func.func @transform_6(%arg0: i32, %arg1: i32, %arg2: i32) -> (i32, i32) {
    %c0_i32 = arith.constant 0 : i32
    return %arg0, %arg1 : i32, i32
  }
}

module attributes {stable_mosaic.version = 11 : i64} {
  func.func @_layernorm_kernel(%arg0: i32, %arg1: memref<16x16xf32, #tpu.memory_space<vmem>>, %arg2: memref<1x16xf32, #tpu.memory_space<vmem>>, %arg3: memref<1x16xf32, #tpu.memory_space<vmem>>, %arg4: memref<16x16xf32, #tpu.memory_space<vmem>>) attributes {dimension_semantics = [#tpu.dimension_semantics<parallel>], iteration_bounds = array<i64: 1>, scalar_prefetch = 0 : i64, scratch_operands = 0 : i64, tpu.core_type = #tpu.core_type<tc>, window_params = [{transform_indices = @transform_0, window_bounds = array<i64: 16, 16>}, {pipeline_mode = #tpu.pipeline_mode<synchronous>, transform_indices = @transform_1, window_bounds = array<i64: 1, 16>}, {pipeline_mode = #tpu.pipeline_mode<synchronous>, transform_indices = @transform_2, window_bounds = array<i64: 1, 16>}, {transform_indices = @transform_3, window_bounds = array<i64: 16, 16>}]} {
    %c0 = arith.constant 0 : index
    %c0_0 = arith.constant 0 : index
    %0 = vector.load %arg1[%c0, %c0_0] : memref<16x16xf32, #tpu.memory_space<vmem>>, vector<16x16xf32>
    %c0_1 = arith.constant 0 : index
    %c0_2 = arith.constant 0 : index
    %1 = vector.load %arg2[%c0_1, %c0_2] : memref<1x16xf32, #tpu.memory_space<vmem>>, vector<1x16xf32>
    %c0_3 = arith.constant 0 : index
    %c0_4 = arith.constant 0 : index
    %2 = vector.load %arg3[%c0_3, %c0_4] : memref<1x16xf32, #tpu.memory_space<vmem>>, vector<1x16xf32>
    %cst = arith.constant dense<0.000000e+00> : vector<16xf32>
    %3 = vector.multi_reduction <add>, %0, %cst [1] : vector<16x16xf32> to vector<16xf32>
    %4 = vector.shape_cast %3 : vector<16xf32> to vector<16x1xf32>
    %cst_5 = arith.constant 1.600000e+01 : f32
    %5 = vector.broadcast %cst_5 : f32 to vector<16x1xf32>
    %6 = arith.divf %4, %5 : vector<16x1xf32>
    %7 = vector.broadcast %6 : vector<16x1xf32> to vector<16x16xf32>
    %8 = arith.subf %0, %7 : vector<16x16xf32>
    %9 = arith.mulf %8, %8 : vector<16x16xf32>
    %cst_6 = arith.constant dense<0.000000e+00> : vector<16xf32>
    %10 = vector.multi_reduction <add>, %9, %cst_6 [1] : vector<16x16xf32> to vector<16xf32>
    %11 = vector.shape_cast %10 : vector<16xf32> to vector<16x1xf32>
    %cst_7 = arith.constant 1.600000e+01 : f32
    %12 = vector.broadcast %cst_7 : f32 to vector<16x1xf32>
    %13 = arith.divf %11, %12 : vector<16x1xf32>
    %14 = vector.broadcast %6 : vector<16x1xf32> to vector<16x16xf32>
    %15 = arith.subf %0, %14 : vector<16x16xf32>
    %cst_8 = arith.constant 9.99999974E-6 : f32
    %16 = vector.broadcast %cst_8 : f32 to vector<16x1xf32>
    %17 = arith.addf %13, %16 : vector<16x1xf32>
    %18 = math.rsqrt %17 : vector<16x1xf32>
    %19 = vector.broadcast %18 : vector<16x1xf32> to vector<16x16xf32>
    %20 = arith.mulf %15, %19 : vector<16x16xf32>
    %21 = vector.broadcast %1 : vector<1x16xf32> to vector<16x16xf32>
    %22 = arith.mulf %20, %21 : vector<16x16xf32>
    %23 = vector.broadcast %2 : vector<1x16xf32> to vector<16x16xf32>
    %24 = arith.addf %22, %23 : vector<16x16xf32>
    %c0_9 = arith.constant 0 : index
    %c0_10 = arith.constant 0 : index
    %25 = vector.load %arg4[%c0_9, %c0_10] : memref<16x16xf32, #tpu.memory_space<vmem>>, vector<16x16xf32>
    tpu.vector_store %arg4[%c0_9, %c0_10], %24 {strides = array<i32>} : memref<16x16xf32, #tpu.memory_space<vmem>>, vector<16x16xf32>,
    return
  }
  func.func @transform_0(%arg0: i32) -> (i32, i32) {
    %c0_i32 = arith.constant 0 : i32
    %c0_i32_0 = arith.constant 0 : i32
    return %arg0, %c0_i32 : i32, i32
  }
  func.func @transform_1(%arg0: i32) -> (i32, i32) {
    %c0_i32 = arith.constant 0 : i32
    %c0_i32_0 = arith.constant 0 : i32
    %c0_i32_1 = arith.constant 0 : i32
    return %c0_i32, %c0_i32_0 : i32, i32
  }
  func.func @transform_2(%arg0: i32) -> (i32, i32) {
    %c0_i32 = arith.constant 0 : i32
    %c0_i32_0 = arith.constant 0 : i32
    %c0_i32_1 = arith.constant 0 : i32
    return %c0_i32, %c0_i32_0 : i32, i32
  }
  func.func @transform_3(%arg0: i32) -> (i32, i32) {
    %c0_i32 = arith.constant 0 : i32
    %c0_i32_0 = arith.constant 0 : i32
    return %arg0, %c0_i32 : i32, i32
  }
}

module attributes {stable_mosaic.version = 11 : i64} {
  func.func @_fused_proj_kernel(%arg0: i32, %arg1: i32, %arg2: i32, %arg3: memref<16x16xf32, #tpu.memory_space<vmem>>, %arg4: memref<1x16x16xbf16, #tpu.memory_space<vmem>>, %arg5: memref<1x1x16xf32, #tpu.memory_space<vmem>>, %arg6: memref<1x16x16xbf16, #tpu.memory_space<vmem>>, %arg7: memref<16x16xf32, #tpu.memory_space<vmem>>) attributes {dimension_semantics = [#tpu.dimension_semantics<parallel>, #tpu.dimension_semantics<parallel>, #tpu.dimension_semantics<arbitrary>], iteration_bounds = array<i64: 1, 2, 1>, scalar_prefetch = 0 : i64, scratch_operands = 1 : i64, tpu.core_type = #tpu.core_type<tc>, window_params = [{transform_indices = @transform_0, window_bounds = array<i64: 16, 16>}, {transform_indices = @transform_1, window_bounds = array<i64: 1, 16, 16>}, {transform_indices = @transform_2, window_bounds = array<i64: 1, 1, 16>}, {transform_indices = @transform_3, window_bounds = array<i64: 1, 16, 16>}]} {
    %c0_i32 = arith.constant 0 : i32
    %0 = arith.cmpi eq, %arg2, %c0_i32 : i32
    %1 = arith.extui %0 : i1 to i32
    %c0_i32_0 = arith.constant 0 : i32
    %2 = arith.cmpi ne, %1, %c0_i32_0 : i32
    scf.if %2 {
      %cst_11 = arith.constant 0.000000e+00 : f32
      %14 = vector.broadcast %cst_11 : f32 to vector<16x16xf32>
      %c0_12 = arith.constant 0 : index
      %c0_13 = arith.constant 0 : index
      %15 = vector.load %arg7[%c0_12, %c0_13] : memref<16x16xf32, #tpu.memory_space<vmem>>, vector<16x16xf32>
      tpu.vector_store %arg7[%c0_12, %c0_13], %14 {strides = array<i32>} : memref<16x16xf32, #tpu.memory_space<vmem>>, vector<16x16xf32>,
    } else {
    }
    %c0 = arith.constant 0 : index
    %c0_1 = arith.constant 0 : index
    %3 = vector.load %arg3[%c0, %c0_1] : memref<16x16xf32, #tpu.memory_space<vmem>>, vector<16x16xf32>
    %4 = arith.truncf %3 : vector<16x16xf32> to vector<16x16xbf16>
    %c0_2 = arith.constant 0 : index
    %c0_3 = arith.constant 0 : index
    %5 = vector.load %arg7[%c0_2, %c0_3] : memref<16x16xf32, #tpu.memory_space<vmem>>, vector<16x16xf32>
    %c0_4 = arith.constant 0 : index
    %c0_5 = arith.constant 0 : index
    %c0_6 = arith.constant 0 : index
    %6 = vector.load %arg4[%c0_4, %c0_5, %c0_6] : memref<1x16x16xbf16, #tpu.memory_space<vmem>>, vector<1x16x16xbf16>
    %7 = vector.shape_cast %6 : vector<1x16x16xbf16> to vector<16x16xbf16>
    %cst = arith.constant dense<0.000000e+00> : vector<16x16xf32>
    %8 = tpu.matmul %4, %7, %cst {dimension_numbers = #tpu.dot_dimension_numbers<[1], [0], [0], [1], [0, 0, 1, 1], [], []>} : vector<16x16xbf16>, vector<16x16xbf16>, vector<16x16xf32> -> vector<16x16xf32>
    %9 = arith.addf %5, %8 : vector<16x16xf32>
    %c0_7 = arith.constant 0 : index
    %c0_8 = arith.constant 0 : index
    %10 = vector.load %arg7[%c0_7, %c0_8] : memref<16x16xf32, #tpu.memory_space<vmem>>, vector<16x16xf32>
    tpu.vector_store %arg7[%c0_7, %c0_8], %9 {strides = array<i32>} : memref<16x16xf32, #tpu.memory_space<vmem>>, vector<16x16xf32>,
    %c0_i32_9 = arith.constant 0 : i32
    %11 = arith.cmpi eq, %arg2, %c0_i32_9 : i32
    %12 = arith.extui %11 : i1 to i32
    %c0_i32_10 = arith.constant 0 : i32
    %13 = arith.cmpi ne, %12, %c0_i32_10 : i32
    scf.if %13 {
      %c0_11 = arith.constant 0 : index
      %c0_12 = arith.constant 0 : index
      %14 = vector.load %arg7[%c0_11, %c0_12] : memref<16x16xf32, #tpu.memory_space<vmem>>, vector<16x16xf32>
      %c0_13 = arith.constant 0 : index
      %c0_14 = arith.constant 0 : index
      %c0_15 = arith.constant 0 : index
      %15 = vector.load %arg5[%c0_13, %c0_14, %c0_15] : memref<1x1x16xf32, #tpu.memory_space<vmem>>, vector<1x1x16xf32>
      %16 = vector.shape_cast %15 : vector<1x1x16xf32> to vector<1x16xf32>
      %17 = vector.broadcast %16 : vector<1x16xf32> to vector<16x16xf32>
      %18 = arith.addf %14, %17 : vector<16x16xf32>
      %19 = arith.truncf %18 : vector<16x16xf32> to vector<16x16xbf16>
      %c0_16 = arith.constant 0 : index
      %c0_17 = arith.constant 0 : index
      %c0_18 = arith.constant 0 : index
      %20 = vector.load %arg6[%c0_16, %c0_17, %c0_18] : memref<1x16x16xbf16, #tpu.memory_space<vmem>>, vector<1x16x16xbf16>
      %21 = vector.shape_cast %20 : vector<1x16x16xbf16> to vector<16x16xbf16>
      %22 = vector.shape_cast %19 : vector<16x16xbf16> to vector<1x16x16xbf16>
      tpu.vector_store %arg6[%c0_16, %c0_17, %c0_18], %22 {strides = array<i32>} : memref<1x16x16xbf16, #tpu.memory_space<vmem>>, vector<1x16x16xbf16>,
    } else {
    }
    return
  }
  func.func @transform_0(%arg0: i32, %arg1: i32, %arg2: i32) -> (i32, i32) {
    %c0_i32 = arith.constant 0 : i32
    return %arg0, %arg2 : i32, i32
  }
  func.func @transform_1(%arg0: i32, %arg1: i32, %arg2: i32) -> (i32, i32, i32) {
    %c0_i32 = arith.constant 0 : i32
    %c0_i32_0 = arith.constant 0 : i32
    return %arg1, %arg2, %c0_i32 : i32, i32, i32
  }
  func.func @transform_2(%arg0: i32, %arg1: i32, %arg2: i32) -> (i32, i32, i32) {
    %c0_i32 = arith.constant 0 : i32
    %c0_i32_0 = arith.constant 0 : i32
    %c0_i32_1 = arith.constant 0 : i32
    return %arg1, %c0_i32, %c0_i32_0 : i32, i32, i32
  }
  func.func @transform_3(%arg0: i32, %arg1: i32, %arg2: i32) -> (i32, i32, i32) {
    %c0_i32 = arith.constant 0 : i32
    %c0_i32_0 = arith.constant 0 : i32
    return %arg1, %arg0, %c0_i32 : i32, i32, i32
  }
}

module attributes {stable_mosaic.version = 11 : i64} {
  func.func @_matmul_kernel(%arg0: i32, %arg1: i32, %arg2: i32, %arg3: memref<16x16xf32, #tpu.memory_space<vmem>>, %arg4: memref<16x16xbf16, #tpu.memory_space<vmem>>, %arg5: memref<1x16xf32, #tpu.memory_space<vmem>>, %arg6: memref<16x16xbf16, #tpu.memory_space<vmem>>, %arg7: memref<16x16xf32, #tpu.memory_space<vmem>>) attributes {dimension_semantics = [#tpu.dimension_semantics<parallel>, #tpu.dimension_semantics<parallel>, #tpu.dimension_semantics<arbitrary>], iteration_bounds = array<i64: 1, 1, 1>, scalar_prefetch = 0 : i64, scratch_operands = 1 : i64, tpu.core_type = #tpu.core_type<tc>, window_params = [{transform_indices = @transform_0, window_bounds = array<i64: 16, 16>}, {transform_indices = @transform_1, window_bounds = array<i64: 16, 16>}, {transform_indices = @transform_2, window_bounds = array<i64: 1, 16>}, {transform_indices = @transform_3, window_bounds = array<i64: 16, 16>}]} {
    %c0_i32 = arith.constant 0 : i32
    %0 = arith.cmpi eq, %arg2, %c0_i32 : i32
    %1 = arith.extui %0 : i1 to i32
    %c0_i32_0 = arith.constant 0 : i32
    %2 = arith.cmpi ne, %1, %c0_i32_0 : i32
    scf.if %2 {
      %cst_10 = arith.constant 0.000000e+00 : f32
      %13 = vector.broadcast %cst_10 : f32 to vector<16x16xf32>
      %c0_11 = arith.constant 0 : index
      %c0_12 = arith.constant 0 : index
      %14 = vector.load %arg7[%c0_11, %c0_12] : memref<16x16xf32, #tpu.memory_space<vmem>>, vector<16x16xf32>
      tpu.vector_store %arg7[%c0_11, %c0_12], %13 {strides = array<i32>} : memref<16x16xf32, #tpu.memory_space<vmem>>, vector<16x16xf32>,
    } else {
    }
    %c0 = arith.constant 0 : index
    %c0_1 = arith.constant 0 : index
    %3 = vector.load %arg3[%c0, %c0_1] : memref<16x16xf32, #tpu.memory_space<vmem>>, vector<16x16xf32>
    %4 = arith.truncf %3 : vector<16x16xf32> to vector<16x16xbf16>
    %c0_2 = arith.constant 0 : index
    %c0_3 = arith.constant 0 : index
    %5 = vector.load %arg7[%c0_2, %c0_3] : memref<16x16xf32, #tpu.memory_space<vmem>>, vector<16x16xf32>
    %c0_4 = arith.constant 0 : index
    %c0_5 = arith.constant 0 : index
    %6 = vector.load %arg4[%c0_4, %c0_5] : memref<16x16xbf16, #tpu.memory_space<vmem>>, vector<16x16xbf16>
    %cst = arith.constant dense<0.000000e+00> : vector<16x16xf32>
    %7 = tpu.matmul %4, %6, %cst {dimension_numbers = #tpu.dot_dimension_numbers<[1], [0], [0], [1], [0, 0, 1, 1], [], []>} : vector<16x16xbf16>, vector<16x16xbf16>, vector<16x16xf32> -> vector<16x16xf32>
    %8 = arith.addf %5, %7 : vector<16x16xf32>
    %c0_6 = arith.constant 0 : index
    %c0_7 = arith.constant 0 : index
    %9 = vector.load %arg7[%c0_6, %c0_7] : memref<16x16xf32, #tpu.memory_space<vmem>>, vector<16x16xf32>
    tpu.vector_store %arg7[%c0_6, %c0_7], %8 {strides = array<i32>} : memref<16x16xf32, #tpu.memory_space<vmem>>, vector<16x16xf32>,
    %c0_i32_8 = arith.constant 0 : i32
    %10 = arith.cmpi eq, %arg2, %c0_i32_8 : i32
    %11 = arith.extui %10 : i1 to i32
    %c0_i32_9 = arith.constant 0 : i32
    %12 = arith.cmpi ne, %11, %c0_i32_9 : i32
    scf.if %12 {
      %c0_10 = arith.constant 0 : index
      %c0_11 = arith.constant 0 : index
      %13 = vector.load %arg7[%c0_10, %c0_11] : memref<16x16xf32, #tpu.memory_space<vmem>>, vector<16x16xf32>
      %c0_12 = arith.constant 0 : index
      %c0_13 = arith.constant 0 : index
      %14 = vector.load %arg5[%c0_12, %c0_13] : memref<1x16xf32, #tpu.memory_space<vmem>>, vector<1x16xf32>
      %15 = vector.broadcast %14 : vector<1x16xf32> to vector<16x16xf32>
      %16 = arith.addf %13, %15 : vector<16x16xf32>
      %17 = arith.truncf %16 : vector<16x16xf32> to vector<16x16xbf16>
      %c0_14 = arith.constant 0 : index
      %c0_15 = arith.constant 0 : index
      %18 = vector.load %arg6[%c0_14, %c0_15] : memref<16x16xbf16, #tpu.memory_space<vmem>>, vector<16x16xbf16>
      tpu.vector_store %arg6[%c0_14, %c0_15], %17 {strides = array<i32>} : memref<16x16xbf16, #tpu.memory_space<vmem>>, vector<16x16xbf16>,
    } else {
    }
    return
  }
  func.func @transform_0(%arg0: i32, %arg1: i32, %arg2: i32) -> (i32, i32) {
    %c0_i32 = arith.constant 0 : i32
    return %arg0, %arg2 : i32, i32
  }
  func.func @transform_1(%arg0: i32, %arg1: i32, %arg2: i32) -> (i32, i32) {
    %c0_i32 = arith.constant 0 : i32
    return %arg2, %arg1 : i32, i32
  }
  func.func @transform_2(%arg0: i32, %arg1: i32, %arg2: i32) -> (i32, i32) {
    %c0_i32 = arith.constant 0 : i32
    %c0_i32_0 = arith.constant 0 : i32
    return %c0_i32, %arg1 : i32, i32
  }
  func.func @transform_3(%arg0: i32, %arg1: i32, %arg2: i32) -> (i32, i32) {
    %c0_i32 = arith.constant 0 : i32
    return %arg0, %arg1 : i32, i32
  }
}

module attributes {stable_mosaic.version = 11 : i64} {
  func.func @_matmul_kernel(%arg0: i32, %arg1: i32, %arg2: i32, %arg3: memref<16x16xf32, #tpu.memory_space<vmem>>, %arg4: memref<16x128xbf16, #tpu.memory_space<vmem>>, %arg5: memref<1x128xf32, #tpu.memory_space<vmem>>, %arg6: memref<16x128xf32, #tpu.memory_space<vmem>>, %arg7: memref<16x128xf32, #tpu.memory_space<vmem>>) attributes {dimension_semantics = [#tpu.dimension_semantics<parallel>, #tpu.dimension_semantics<parallel>, #tpu.dimension_semantics<arbitrary>], iteration_bounds = array<i64: 1, 1, 1>, scalar_prefetch = 0 : i64, scratch_operands = 1 : i64, tpu.core_type = #tpu.core_type<tc>, window_params = [{transform_indices = @transform_0, window_bounds = array<i64: 16, 16>}, {transform_indices = @transform_1, window_bounds = array<i64: 16, 128>}, {transform_indices = @transform_2, window_bounds = array<i64: 1, 128>}, {transform_indices = @transform_3, window_bounds = array<i64: 16, 128>}]} {
    %c0_i32 = arith.constant 0 : i32
    %0 = arith.cmpi eq, %arg2, %c0_i32 : i32
    %1 = arith.extui %0 : i1 to i32
    %c0_i32_0 = arith.constant 0 : i32
    %2 = arith.cmpi ne, %1, %c0_i32_0 : i32
    scf.if %2 {
      %cst_10 = arith.constant 0.000000e+00 : f32
      %13 = vector.broadcast %cst_10 : f32 to vector<16x128xf32>
      %c0_11 = arith.constant 0 : index
      %c0_12 = arith.constant 0 : index
      %14 = vector.load %arg7[%c0_11, %c0_12] : memref<16x128xf32, #tpu.memory_space<vmem>>, vector<16x128xf32>
      tpu.vector_store %arg7[%c0_11, %c0_12], %13 {strides = array<i32>} : memref<16x128xf32, #tpu.memory_space<vmem>>, vector<16x128xf32>,
    } else {
    }
    %c0 = arith.constant 0 : index
    %c0_1 = arith.constant 0 : index
    %3 = vector.load %arg3[%c0, %c0_1] : memref<16x16xf32, #tpu.memory_space<vmem>>, vector<16x16xf32>
    %4 = arith.truncf %3 : vector<16x16xf32> to vector<16x16xbf16>
    %c0_2 = arith.constant 0 : index
    %c0_3 = arith.constant 0 : index
    %5 = vector.load %arg7[%c0_2, %c0_3] : memref<16x128xf32, #tpu.memory_space<vmem>>, vector<16x128xf32>
    %c0_4 = arith.constant 0 : index
    %c0_5 = arith.constant 0 : index
    %6 = vector.load %arg4[%c0_4, %c0_5] : memref<16x128xbf16, #tpu.memory_space<vmem>>, vector<16x128xbf16>
    %cst = arith.constant dense<0.000000e+00> : vector<16x128xf32>
    %7 = tpu.matmul %4, %6, %cst {dimension_numbers = #tpu.dot_dimension_numbers<[1], [0], [0], [1], [0, 0, 1, 1], [], []>} : vector<16x16xbf16>, vector<16x128xbf16>, vector<16x128xf32> -> vector<16x128xf32>
    %8 = arith.addf %5, %7 : vector<16x128xf32>
    %c0_6 = arith.constant 0 : index
    %c0_7 = arith.constant 0 : index
    %9 = vector.load %arg7[%c0_6, %c0_7] : memref<16x128xf32, #tpu.memory_space<vmem>>, vector<16x128xf32>
    tpu.vector_store %arg7[%c0_6, %c0_7], %8 {strides = array<i32>} : memref<16x128xf32, #tpu.memory_space<vmem>>, vector<16x128xf32>,
    %c0_i32_8 = arith.constant 0 : i32
    %10 = arith.cmpi eq, %arg2, %c0_i32_8 : i32
    %11 = arith.extui %10 : i1 to i32
    %c0_i32_9 = arith.constant 0 : i32
    %12 = arith.cmpi ne, %11, %c0_i32_9 : i32
    scf.if %12 {
      %c0_10 = arith.constant 0 : index
      %c0_11 = arith.constant 0 : index
      %13 = vector.load %arg7[%c0_10, %c0_11] : memref<16x128xf32, #tpu.memory_space<vmem>>, vector<16x128xf32>
      %c0_12 = arith.constant 0 : index
      %c0_13 = arith.constant 0 : index
      %14 = vector.load %arg5[%c0_12, %c0_13] : memref<1x128xf32, #tpu.memory_space<vmem>>, vector<1x128xf32>
      %15 = vector.broadcast %14 : vector<1x128xf32> to vector<16x128xf32>
      %16 = arith.addf %13, %15 : vector<16x128xf32>
      %17 = tpu.iota {dimensions = array<i32: 1>} : vector<16x128xi32>
      %c12_i32 = arith.constant 12 : i32
      %18 = vector.broadcast %c12_i32 : i32 to vector<16x128xi32>
      %19 = arith.cmpi slt, %17, %18 : vector<16x128xi32>
      %cst_14 = arith.constant 0xFF800000 : f32
      %20 = vector.broadcast %cst_14 : f32 to vector<16x128xf32>
      %21 = arith.select %19, %16, %20 : vector<16x128xi1>, vector<16x128xf32>
      %cst_15 = arith.constant dense<0xFF800000> : vector<16xf32>
      %22 = vector.multi_reduction <maximumf>, %21, %cst_15 [1] : vector<16x128xf32> to vector<16xf32>
      %23 = vector.shape_cast %22 : vector<16xf32> to vector<16x1xf32>
      %24 = vector.broadcast %23 : vector<16x1xf32> to vector<16x128xf32>
      %25 = arith.subf %21, %24 : vector<16x128xf32>
      %26 = math.exp %25 : vector<16x128xf32>
      %cst_16 = arith.constant dense<0.000000e+00> : vector<16xf32>
      %27 = vector.multi_reduction <add>, %26, %cst_16 [1] : vector<16x128xf32> to vector<16xf32>
      %28 = vector.shape_cast %27 : vector<16xf32> to vector<16x1xf32>
      %29 = math.log %28 : vector<16x1xf32>
      %30 = vector.broadcast %29 : vector<16x1xf32> to vector<16x128xf32>
      %31 = arith.subf %25, %30 : vector<16x128xf32>
      %c0_17 = arith.constant 0 : index
      %c0_18 = arith.constant 0 : index
      %32 = vector.load %arg6[%c0_17, %c0_18] : memref<16x128xf32, #tpu.memory_space<vmem>>, vector<16x128xf32>
      tpu.vector_store %arg6[%c0_17, %c0_18], %31 {strides = array<i32>} : memref<16x128xf32, #tpu.memory_space<vmem>>, vector<16x128xf32>,
    } else {
    }
    return
  }
  func.func @transform_0(%arg0: i32, %arg1: i32, %arg2: i32) -> (i32, i32) {
    %c0_i32 = arith.constant 0 : i32
    return %arg0, %arg2 : i32, i32
  }
  func.func @transform_1(%arg0: i32, %arg1: i32, %arg2: i32) -> (i32, i32) {
    %c0_i32 = arith.constant 0 : i32
    return %arg2, %arg1 : i32, i32
  }
  func.func @transform_2(%arg0: i32, %arg1: i32, %arg2: i32) -> (i32, i32) {
    %c0_i32 = arith.constant 0 : i32
    %c0_i32_0 = arith.constant 0 : i32
    return %c0_i32, %arg1 : i32, i32
  }
  func.func @transform_3(%arg0: i32, %arg1: i32, %arg2: i32) -> (i32, i32) {
    %c0_i32 = arith.constant 0 : i32
    return %arg0, %arg1 : i32, i32
  }
}

</mosaic_0001>

<bundles_post_ra>
// kernel: transformer_stt_forward.40
= control target key start
LH: loop header
LB: loop body
LE: loop exit
PB: predicated region body
PF: predicated region fallthrough
CT: control target
= control target key end

     0   :  { %vm25_vm0 = vcmask 261120   ;;  %v414_v3 = vmov 0.0   ;;  %vm56_vm1 = vcmask 130048   ;;  %s524_s3 = inlined_call_operand.vmem [shape: bf16[3,16,32], index: 3, kind: input, shape index: {}]   ;;  %s525_s0 = inlined_call_operand.vmem [shape: bf16[32,16], index: 0, kind: input, shape index: {}]   ;;  %s526_s1 = inlined_call_operand.vmem [shape: bf16[32,16], index: 1, kind: input, shape index: {}]   ;;  %s527_s2 = inlined_call_operand.vmem [shape: bf16[32,16], index: 2, kind: input, shape index: {}]   ;;  %s528_s4 = inlined_call_operand.vmem [shape: f32[1,32], index: 4, kind: input, shape index: {}]   ;;  %s529_s5 = inlined_call_operand.vmem [shape: bf16[32,16], index: 5, kind: output, shape index: {}]  }
   0x1   :  { %v387_v0 = vld [vmem:[%s524_s3] sm:$0xff]  ;;  %v390_v1 = vld [vmem:[%s524_s3 + $0x8] sm:$0xff]  ;;  %v393_v2 = vld [vmem:[%s524_s3 + $0x10] sm:$0xff]  ;;  %26 = vst.msk [vmem:[#allocation2] sm:$0xff] %vm25_vm0, %v414_v3 }
   0x2   :  { %v385_v4 = vld [vmem:[%s525_s0] sm:$0xff]  ;;  %v386_v5 = vld [vmem:[%s525_s0 + $0x8] sm:$0xff]  ;;  %27 = vst.msk [vmem:[#allocation2 + $0x8] sm:$0xff] %vm25_vm0, %v414_v3  ;;  %70 = vmatpush.bf16.msra.mxu0 %v387_v0  ;;  %394 = vmatpush.bf16.msra.mxu3 %v387_v0 }
   0x3   :  { %v388_v6 = vld [vmem:[%s526_s1] sm:$0xff]  ;;  %28 = vst.msk [vmem:[#allocation2 + $0x10] sm:$0xff] %vm25_vm0, %v414_v3  ;;  %131 = vmatpush.bf16.msra.mxu1 %v390_v1  ;;  %191 = vmatpush.bf16.msra.mxu2 %v393_v2  ;;  %v389_v8 = vld [vmem:[%s526_s1 + $0x8] sm:$0xff] }
   0x4   :  { %v391_v7 = vld [vmem:[%s527_s2] sm:$0xff]  ;;  %29 = vst.msk [vmem:[#allocation2 + $0x18] sm:$0xff] %vm25_vm0, %v414_v3  ;;  %v392_v9 = vld [vmem:[%s527_s2 + $0x8] sm:$0xff] }
   0x5   :  { %347 = vmatmul.msk.bf16.vlgmr.msra.gmra.mxu0 %vm56_vm1, %v385_v4  ;;  %348 = vmatmul.msk.bf16.vlgmr.msra.gmra.mxu3 %vm56_vm1, %v386_v5  ;;  %v397_v40 = vld [vmem:[%s528_s4] ss:$0 sm:$0xff]  ;;  %s415_s4 = smov 112  }
   0x6   :  { %363 = vmatmul.msk.bf16.vlgmr.msra.gmra.mxu1 %vm56_vm1, %v388_v6  ;;  %379 = vmatmul.msk.bf16.vlgmr.msra.gmra.mxu2 %vm56_vm1, %v391_v7 }
   0x8   :  { %v34_v10 = vld [vmem:[#allocation2] sm:$0xff] }
   0x9   :  { %v35_v16 = vld [vmem:[#allocation2 + $0x8] sm:$0xff] }
   0xa   :  { %v36_v14 = vld [vmem:[#allocation2 + $0x10] sm:$0xff] }
   0xb   :  { %v37_v24 = vld [vmem:[#allocation2 + $0x18] sm:$0xff] }
  0x16   :  { %364 = vmatmul.msk.bf16.gmra.mxu1 %vm56_vm1, %v389_v8  ;;  %380 = vmatmul.msk.bf16.gmra.mxu2 %vm56_vm1, %v392_v9 }
  0x82   :  { %v72_v11 = vpop.f32.mrf.mxu0 }
  0x83   :  { %v82_v12 = vadd.f32 %v72_v11, %v34_v10  ;;  %v133_v13 = vpop.f32.mrf.mxu1 }
  0x85   :  { %87 = vst.msk [vmem:[#allocation2] sm:$0xff] %vm25_vm0, %v82_v12 }
  0x88   :  { %v77_v15 = vpop.f32.mrf.mxu3 }
  0x89   :  { %v84_v17 = vadd.f32 %v77_v15, %v36_v14  ;;  %v193_v18 = vpop.f32.mrf.mxu2 }
  0x8a   :  { %v74_v19 = vpop.f32.mrf.mxu0 }
  0x8b   :  { %89 = vst.msk [vmem:[#allocation2 + $0x10] sm:$0xff] %vm25_vm0, %v84_v17  ;;  %v83_v20 = vadd.f32 %v74_v19, %v35_v16  ;;  %v135_v21 = vpop.f32.mrf.mxu1 }
  0x8c   :  { %v95_v22 = vld [vmem:[#allocation2] sm:$0xff] }
  0x8d   :  { %v143_v23 = vadd.f32 %v133_v13, %v95_v22  ;;  %88 = vst.msk [vmem:[#allocation2 + $0x8] sm:$0xff] %vm25_vm0, %v83_v20 }
  0x8f   :  { %147 = vst.msk [vmem:[#allocation2] sm:$0xff] %vm25_vm0, %v143_v23 }
  0x90   :  { %v79_v25 = vpop.f32.mrf.mxu3 }
  0x91   :  { %v85_v26 = vadd.f32 %v79_v25, %v37_v24  ;;  %v195_v27 = vpop.f32.mrf.mxu2 }
  0x92   :  { %v97_v28 = vld [vmem:[#allocation2 + $0x10] sm:$0xff] }
  0x93   :  { %90 = vst.msk [vmem:[#allocation2 + $0x18] sm:$0xff] %vm25_vm0, %v85_v26  ;;  %v138_v29 = vpop.f32.mrf.mxu1 }
  0x94   :  { %v96_v30 = vld [vmem:[#allocation2 + $0x8] sm:$0xff]  ;;  %v145_v31 = vadd.f32 %v138_v29, %v97_v28 }
  0x95   :  { %v144_v32 = vadd.f32 %v135_v21, %v96_v30 }
  0x96   :  { %v155_v33 = vld [vmem:[#allocation2] sm:$0xff]  ;;  %149 = vst.msk [vmem:[#allocation2 + $0x10] sm:$0xff] %vm25_vm0, %v145_v31 }
  0x97   :  { %v203_v34 = vadd.f32 %v193_v18, %v155_v33  ;;  %148 = vst.msk [vmem:[#allocation2 + $0x8] sm:$0xff] %vm25_vm0, %v144_v32 }
  0x99   :  { %207 = vst.msk [vmem:[#allocation2] sm:$0xff] %vm25_vm0, %v203_v34  ;;  %v198_v36 = vpop.f32.mrf.mxu2 }
  0x9a   :  { %v98_v35 = vld [vmem:[#allocation2 + $0x18] sm:$0xff] }
  0x9b   :  { %v140_v37 = vpop.f32.mrf.mxu1 }
  0x9c   :  { %v146_v38 = vadd.f32 %v140_v37, %v98_v35 }
  0x9d   :  { %v157_v39 = vld [vmem:[#allocation2 + $0x10] sm:$0xff] }
  0x9e   :  { %v156_v41 = vld [vmem:[#allocation2 + $0x8] sm:$0xff]  ;;  %v205_v42 = vadd.f32 %v198_v36, %v157_v39  ;;  %150 = vst.msk [vmem:[#allocation2 + $0x18] sm:$0xff] %vm25_vm0, %v146_v38 }
  0x9f   :  { %v204_v43 = vadd.f32 %v195_v27, %v156_v41 }
  0xa0   :  { %209 = vst.msk [vmem:[#allocation2 + $0x10] sm:$0xff] %vm25_vm0, %v205_v42  ;;  %v214_v44 = vld [vmem:[#allocation2] sm:$0xff] }
  0xa1   :  { %208 = vst.msk [vmem:[#allocation2 + $0x8] sm:$0xff] %vm25_vm0, %v204_v43  ;;  %v491_v45 = vadd.f32 %v397_v40, %v214_v44  ;;  %v200_v48 = vpop.f32.mrf.mxu2 }
  0xa3   :  { %v381_v46 = vmul.f32 -1.442695, %v491_v45 }
  0xa5   :  { %v158_v47 = vld [vmem:[#allocation2 + $0x18] sm:$0xff]  ;;  %398 = vpow2.f32 %v381_v46 }
  0xa6   :  { %v206_v49 = vadd.f32 %v200_v48, %v158_v47 }
  0xa7   :  { %v216_v50 = vld [vmem:[#allocation2 + $0x10] sm:$0xff] }
  0xa8   :  { %210 = vst.msk [vmem:[#allocation2 + $0x18] sm:$0xff] %vm25_vm0, %v206_v49  ;;  %v495_v51 = vadd.f32 %v397_v40, %v216_v50  ;;  %v215_v52 = vld [vmem:[#allocation2 + $0x8] sm:$0xff] }
  0xa9   :  { %v497_v53 = vadd.f32 %v397_v40, %v215_v52 }
  0xaa   :  { %v383_v54 = vmul.f32 -1.442695, %v495_v51 }
  0xab   :  { %v399_v55 = vpop.eup %398  ;;  %v382_v56 = vmul.f32 -1.442695, %v497_v53 }
  0xac   :  { %v238_v57 = vadd.f32 1.0, %v399_v55  ;;  %400 = vpow2.f32 %v383_v54 }
  0xad   :  { %402 = vpow2.f32 %v382_v56 }
  0xae   :  { %404 = vrcp.f32 %v238_v57  ;;  %v253_v4 = vand.u32 2147483648, %v238_v57  ;;  %v251_v6 = vand.u32 2147483647, %v238_v57  ;;  %vm247_vm3 = vweird.f32 %v238_v57 }
  0xaf   :  { %v217_v58 = vld [vmem:[#allocation2 + $0x18] sm:$0xff] }
  0xb0   :  { %v501_v59 = vadd.f32 %v397_v40, %v217_v58  ;;  %v254_v12 = vor.u32 1.1754944e-38, %v253_v4  ;;  %vm252_vm5 = vcmp.eq.f32.partialorder %v251_v6, 8.507059e+37 }
  0xb2   :  { %v401_v60 = vpop.eup %400  ;;  %v384_v61 = vmul.f32 -1.442695, %v501_v59 }
  0xb3   :  { %v403_v62 = vpop.eup %402  ;;  %v240_v63 = vadd.f32 1.0, %v401_v60 }
  0xb4   :  { %v405_v0 = vpop.eup %404  ;;  %v239_v1 = vadd.f32 1.0, %v403_v62  ;;  %406 = vpow2.f32 %v384_v61 }
  0xb5   :  { %v243_v2 = vmul.f32 %v405_v0, %v238_v57  ;;  %408 = vrcp.f32 %v240_v63  ;;  %vm248_vm2 = vweird.f32 %v405_v0  ;;  %v283_v18 = vand.u32 2147483648, %v240_v63 }
  0xb6   :  { %410 = vrcp.f32 %v239_v1  ;;  %vm249_vm4 = vmor %vm247_vm3, %vm248_vm2  ;;  %v281_v21 = vand.u32 2147483647, %v240_v63  ;;  %v268_v22 = vand.u32 2147483648, %v239_v1  ;;  %v266_v24 = vand.u32 2147483647, %v239_v1 }
  0xb7   :  { %v244_v3 = vsub.f32 1.0, %v243_v2  ;;  %vm277_vm8 = vweird.f32 %v240_v63  ;;  %v284_v27 = vor.u32 1.1754944e-38, %v283_v18  ;;  %vm262_vm10 = vweird.f32 %v239_v1 }
  0xb8   :  { %vm282_vm11 = vcmp.eq.f32.partialorder %v281_v21, 8.507059e+37  ;;  %v269_v30 = vor.u32 1.1754944e-38, %v268_v22  ;;  %vm267_vm13 = vcmp.eq.f32.partialorder %v266_v24, 8.507059e+37  ;;  %vm326_vm2 = vcmask 125952  }
  0xb9   :  { %v245_v5 = vmul.f32 %v405_v0, %v244_v3 }
  0xba   :  { %v407_v7 = vpop.eup %406 }
  0xbb   :  { %v409_v8 = vpop.eup %408  ;;  %v246_v9 = vadd.f32 %v405_v0, %v245_v5  ;;  %v241_v10 = vadd.f32 1.0, %v407_v7 }
  0xbc   :  { %v411_v11 = vpop.eup %410  ;;  %v273_v13 = vmul.f32 %v409_v8, %v240_v63  ;;  %vm278_vm6 = vweird.f32 %v409_v8 }
  0xbd   :  { %v250_v14 = vsel %vm249_vm4, %v405_v0, %v246_v9  ;;  %v258_v15 = vmul.f32 %v411_v11, %v239_v1  ;;  %412 = vrcp.f32 %v241_v10  ;;  %vm263_vm7 = vweird.f32 %v411_v11  ;;  %vm279_vm9 = vmor %vm277_vm8, %vm278_vm6 }
  0xbe   :  { %v255_v16 = vsel %vm252_vm5, %v254_v12, %v250_v14  ;;  %v274_v17 = vsub.f32 1.0, %v273_v13  ;;  %vm264_vm12 = vmor %vm262_vm10, %vm263_vm7  ;;  %v298_v36 = vand.u32 2147483648, %v241_v10  ;;  %v296_v38 = vand.u32 2147483647, %v241_v10 }
  0xbf   :  { %306 = vrot.lane.b32.xlu0 %v255_v16, %s415_s4  ;;  %v259_v19 = vsub.f32 1.0, %v258_v15  ;;  %vm292_vm15 = vweird.f32 %v241_v10 }
  0xc0   :  { %v275_v20 = vmul.f32 %v409_v8, %v274_v17  ;;  %v299_v40 = vor.u32 1.1754944e-38, %v298_v36  ;;  %vm297_vm1 = vcmp.eq.f32.partialorder %v296_v38, 8.507059e+37 }
  0xc1   :  { %v260_v23 = vmul.f32 %v411_v11, %v259_v19 }
  0xc2   :  { %v276_v25 = vadd.f32 %v409_v8, %v275_v20 }
  0xc3   :  { %v413_v26 = vpop.eup %412  ;;  %v261_v28 = vadd.f32 %v411_v11, %v260_v23 }
  0xc4   :  { %v280_v29 = vsel %vm279_vm9, %v409_v8, %v276_v25  ;;  %v288_v31 = vmul.f32 %v413_v26, %v241_v10  ;;  %vm293_vm14 = vweird.f32 %v413_v26 }
  0xc5   :  { %v285_v32 = vsel %vm282_vm11, %v284_v27, %v280_v29  ;;  %v265_v33 = vsel %vm264_vm12, %v411_v11, %v261_v28  ;;  %vm294_vm0 = vmor %vm292_vm15, %vm293_vm14 }
  0xc6   :  { %310 = vrot.lane.b32.xlu1 %v285_v32, %s415_s4  ;;  %v270_v34 = vsel %vm267_vm13, %v269_v30, %v265_v33  ;;  %v289_v35 = vsub.f32 1.0, %v288_v31 }
  0xc7   :  { %308 = vrot.lane.b32.xlu0 %v270_v34, %s415_s4 }
  0xc8   :  { %v290_v37 = vmul.f32 %v413_v26, %v289_v35 }
  0xca   :  { %v291_v39 = vadd.f32 %v413_v26, %v290_v37 }
  0xcc   :  { %v295_v41 = vsel %vm294_vm0, %v413_v26, %v291_v39 }
  0xcd   :  { %v300_v42 = vsel %vm297_vm1, %v299_v40, %v295_v41 }
  0xce   :  { %312 = vrot.lane.b32.xlu1 %v300_v42, %s415_s4 }
 0x131   :  { %v307_v43 = vpop.permute.xlu0 %306 }
 0x132   :  { %v318_v44 = vmul.f32 %v307_v43, %v491_v45 }
 0x134   :  { %v322_v46 = vpack.c.bf16 %v318_v44, %v318_v44 }
 0x136   :  { %327 = vst.msk [vmem:[%s529_s5] sm:$0xf] %vm326_vm2, %v322_v46 }
 0x138   :  { %v311_v47 = vpop.permute.xlu1 %310 }
 0x139   :  { %v320_v48 = vmul.f32 %v311_v47, %v495_v51  ;;  %v309_v49 = vpop.permute.xlu0 %308 }
 0x13a   :  { %v319_v50 = vmul.f32 %v309_v49, %v497_v53 }
 0x13b   :  { %v324_v52 = vpack.c.bf16 %v320_v48, %v320_v48 }
 0x13c   :  { %v323_v54 = vpack.c.bf16 %v319_v50, %v319_v50 }
 0x13d   :  { %329 = vst.msk [vmem:[%s529_s5 + $0x8] sm:$0xf] %vm326_vm2, %v324_v52 }
 0x13e   :  { %328 = vst.msk [vmem:[%s529_s5 + $0x4] sm:$0xf] %vm326_vm2, %v323_v54 }
 0x140   :  { %v313_v45 = vpop.permute.xlu1 %312 }
 0x141   :  { %v321_v55 = vmul.f32 %v313_v45, %v501_v59 }
 0x143   :  { %v325_v56 = vpack.c.bf16 %v321_v55, %v321_v55 }
 0x145   :  { %330 = vst.msk [vmem:[%s529_s5 + $0xc] sm:$0xf] %vm326_vm2, %v325_v56 }

// kernel: transformer_stt_forward.37
= control target key start
LH: loop header
LB: loop body
LE: loop exit
PB: predicated region body
PF: predicated region fallthrough
CT: control target
= control target key end

     0   :  { %vm122_vm0 = vcmask 654336   ;;  %vm25_vm1 = vcmask 261120   ;;  %v1278_v63 = vmov 0.0   ;;  %s1901_s3 = inlined_call_operand.vmem [shape: bf16[3,80,32], index: 3, kind: input, shape index: {}]   ;;  %s1902_s0 = inlined_call_operand.vmem [shape: f32[128,80], index: 0, kind: input, shape index: {}]   ;;  %s1903_s1 = inlined_call_operand.vmem [shape: f32[128,80], index: 1, kind: input, shape index: {}]   ;;  %s1904_s2 = inlined_call_operand.vmem [shape: f32[128,80], index: 2, kind: input, shape index: {}]   ;;  %s1905_s4 = inlined_call_operand.vmem [shape: f32[1,32], index: 4, kind: input, shape index: {}]   ;;  %s1906_s5 = inlined_call_operand.vmem [shape: bf16[128,16], index: 5, kind: output, shape index: {}]  }
   0x1   :  { %v1185_v0 = vld [vmem:[%s1901_s3 + $0x20] sm:$0xff]  ;;  %v1190_v1 = vld [vmem:[%s1901_s3 + $0x48] sm:$0xff]  ;;  %v1319_v2 = vld [vmem:[%s1901_s3 + $0x70] sm:$0xff]  ;;  %26 = vst.msk [vmem:[#allocation2] sm:$0xff] %vm25_vm1, %v1278_v63 }
   0x2   :  { %150 = vmatpush.bf16.msra.mxu0 %v1185_v0  ;;  %1196 = vmatpush.bf16.msra.mxu3 %v1185_v0  ;;  %v1184_v3 = vld [vmem:[%s1901_s3 + $0x18] sm:$0xff]  ;;  %v1189_v4 = vld [vmem:[%s1901_s3 + $0x40] sm:$0xff]  ;;  %v1331_v5 = vld [vmem:[%s1901_s3 + $0x68] sm:$0xff]  ;;  %27 = vst.msk [vmem:[#allocation2 + $0x8] sm:$0xff] %vm25_vm1, %v1278_v63 }
   0x3   :  { %337 = vmatpush.bf16.msra.mxu1 %v1190_v1  ;;  %523 = vmatpush.bf16.msra.mxu2 %v1319_v2  ;;  %v1183_v6 = vld [vmem:[%s1901_s3 + $0x10] sm:$0xff]  ;;  %v1188_v7 = vld [vmem:[%s1901_s3 + $0x38] sm:$0xff]  ;;  %v1343_v8 = vld [vmem:[%s1901_s3 + $0x60] sm:$0xff]  ;;  %28 = vst.msk [vmem:[#allocation2 + $0x10] sm:$0xff] %vm25_vm1, %v1278_v63 }
   0x4   :  { %v1182_v9 = vld [vmem:[%s1901_s3 + $0x8] sm:$0xff]  ;;  %v1187_v10 = vld [vmem:[%s1901_s3 + $0x30] sm:$0xff]  ;;  %v1355_v11 = vld [vmem:[%s1901_s3 + $0x58] sm:$0xff]  ;;  %29 = vst.msk [vmem:[#allocation2 + $0x18] sm:$0xff] %vm25_vm1, %v1278_v63 }
   0x5   :  { %v1181_v12 = vld [vmem:[%s1901_s3] sm:$0xff]  ;;  %v1186_v13 = vld [vmem:[%s1901_s3 + $0x28] sm:$0xff]  ;;  %v1191_v20 = vld [vmem:[%s1901_s3 + $0x50] sm:$0xff]  ;;  %30 = vst.msk [vmem:[#allocation2 + $0x20] sm:$0xff] %vm25_vm1, %v1278_v63 }
   0x6   :  { %151 = vmatpush.bf16.msra.mxu0 %v1184_v3  ;;  %1197 = vmatpush.bf16.msra.mxu3 %v1184_v3  ;;  %v42_v14 = vld [vmem:[%s1902_s0] sm:$0xff]  ;;  %v43_v15 = vld [vmem:[%s1902_s0 + $0x8] sm:$0xff]  ;;  %v44_v27 = vld [vmem:[%s1902_s0 + $0x10] sm:$0xff]  ;;  %31 = vst.msk [vmem:[#allocation2 + $0x28] sm:$0xff] %vm25_vm1, %v1278_v63 }
   0x7   :  { %338 = vmatpush.bf16.msra.mxu1 %v1189_v4  ;;  %524 = vmatpush.bf16.msra.mxu2 %v1331_v5  ;;  %v54_v16 = vld [vmem:[%s1902_s0 + $0x60] sm:$0xff]  ;;  %v55_v17 = vld [vmem:[%s1902_s0 + $0x68] sm:$0xff]  ;;  %v58_v23 = vpack.c.bf16 %v43_v15, %v42_v14  ;;  %v45_v28 = vld [vmem:[%s1902_s0 + $0x18] sm:$0xff]  ;;  %32 = vst.msk [vmem:[#allocation2 + $0x30] sm:$0xff] %vm25_vm1, %v1278_v63 }
   0x8   :  { %v229_v18 = vld [vmem:[%s1903_s1] sm:$0xff]  ;;  %v230_v19 = vld [vmem:[%s1903_s1 + $0x8] sm:$0xff]  ;;  %v64_v24 = vpack.c.bf16 %v55_v17, %v54_v16  ;;  %v56_v29 = vld [vmem:[%s1902_s0 + $0x70] sm:$0xff]  ;;  %v59_v35 = vpack.c.bf16 %v45_v28, %v44_v27  ;;  %33 = vst.msk [vmem:[#allocation2 + $0x38] sm:$0xff] %vm25_vm1, %v1278_v63 }
   0x9   :  { %v415_v21 = vld [vmem:[%s1904_s2] sm:$0xff]  ;;  %v416_v22 = vld [vmem:[%s1904_s2 + $0x8] sm:$0xff]  ;;  %v245_v25 = vpack.c.bf16 %v230_v19, %v229_v18  ;;  %v57_v30 = vld [vmem:[%s1902_s0 + $0x78] sm:$0xff]  ;;  %34 = vst.msk [vmem:[#allocation2 + $0x40] sm:$0xff] %vm25_vm1, %v1278_v63 }
   0xa   :  { %152 = vmatpush.bf16.msra.mxu0 %v1183_v6  ;;  %1198 = vmatpush.bf16.msra.mxu3 %v1183_v6  ;;  %v431_v26 = vpack.c.bf16 %v416_v22, %v415_v21  ;;  %v231_v31 = vld [vmem:[%s1903_s1 + $0x10] sm:$0xff]  ;;  %v232_v32 = vld [vmem:[%s1903_s1 + $0x18] sm:$0xff]  ;;  %v65_v36 = vpack.c.bf16 %v57_v30, %v56_v29  ;;  %v46_v39 = vld [vmem:[%s1902_s0 + $0x20] sm:$0xff]  ;;  %35 = vst.msk [vmem:[#allocation2 + $0x48] sm:$0xff] %vm25_vm1, %v1278_v63 }
   0xb   :  { %339 = vmatpush.bf16.msra.mxu1 %v1188_v7  ;;  %525 = vmatpush.bf16.msra.mxu2 %v1343_v8  ;;  %v417_v33 = vld [vmem:[%s1904_s2 + $0x10] sm:$0xff]  ;;  %v418_v34 = vld [vmem:[%s1904_s2 + $0x18] sm:$0xff]  ;;  %v246_v37 = vpack.c.bf16 %v232_v32, %v231_v31  ;;  %v47_v40 = vld [vmem:[%s1902_s0 + $0x28] sm:$0xff]  ;;  %36 = vst.msk [vmem:[#allocation2 + $0x50] sm:$0xff] %vm25_vm1, %v1278_v63 }
   0xc   :  { %v432_v38 = vpack.c.bf16 %v418_v34, %v417_v33  ;;  %v241_v41 = vld [vmem:[%s1903_s1 + $0x60] sm:$0xff]  ;;  %v242_v42 = vld [vmem:[%s1903_s1 + $0x68] sm:$0xff]  ;;  %v60_v47 = vpack.c.bf16 %v47_v40, %v46_v39  ;;  %v48_v51 = vld [vmem:[%s1902_s0 + $0x30] sm:$0xff]  ;;  %37 = vst.msk [vmem:[#allocation2 + $0x58] sm:$0xff] %vm25_vm1, %v1278_v63 }
   0xd   :  { %v233_v43 = vld [vmem:[%s1903_s1 + $0x20] sm:$0xff]  ;;  %v234_v44 = vld [vmem:[%s1903_s1 + $0x28] sm:$0xff]  ;;  %v251_v48 = vpack.c.bf16 %v242_v42, %v241_v41  ;;  %v49_v52 = vld [vmem:[%s1902_s0 + $0x38] sm:$0xff]  ;;  %38 = vst.msk [vmem:[#allocation2 + $0x60] sm:$0xff] %vm25_vm1, %v1278_v63 }
   0xe   :  { %153 = vmatpush.bf16.msra.mxu0 %v1182_v9  ;;  %1199 = vmatpush.bf16.msra.mxu3 %v1182_v9  ;;  %v419_v45 = vld [vmem:[%s1904_s2 + $0x20] sm:$0xff]  ;;  %v420_v46 = vld [vmem:[%s1904_s2 + $0x28] sm:$0xff]  ;;  %v247_v49 = vpack.c.bf16 %v234_v44, %v233_v43  ;;  %v243_v53 = vld [vmem:[%s1903_s1 + $0x70] sm:$0xff]  ;;  %v61_v59 = vpack.c.bf16 %v49_v52, %v48_v51  ;;  %39 = vst.msk [vmem:[#allocation2 + $0x68] sm:$0xff] %vm25_vm1, %v1278_v63 }
   0xf   :  { %340 = vmatpush.bf16.msra.mxu1 %v1187_v10  ;;  %526 = vmatpush.bf16.msra.mxu2 %v1355_v11  ;;  %v433_v50 = vpack.c.bf16 %v420_v46, %v419_v45  ;;  %v244_v54 = vld [vmem:[%s1903_s1 + $0x78] sm:$0xff]  ;;  %v235_v55 = vld [vmem:[%s1903_s1 + $0x30] sm:$0xff]  ;;  %v50_v0 = vld [vmem:[%s1902_s0 + $0x40] sm:$0xff]  ;;  %40 = vst.msk [vmem:[#allocation2 + $0x70] sm:$0xff] %vm25_vm1, %v1278_v63 }
  0x10   :  { %v236_v56 = vld [vmem:[%s1903_s1 + $0x38] sm:$0xff]  ;;  %v421_v57 = vld [vmem:[%s1904_s2 + $0x30] sm:$0xff]  ;;  %v252_v60 = vpack.c.bf16 %v244_v54, %v243_v53  ;;  %v428_v3 = vld [vmem:[%s1904_s2 + $0x68] sm:$0xff]  ;;  %41 = vst.msk [vmem:[#allocation2 + $0x78] sm:$0xff] %vm25_vm1, %v1278_v63 }
  0x11   :  { %v422_v58 = vld [vmem:[%s1904_s2 + $0x38] sm:$0xff]  ;;  %v248_v61 = vpack.c.bf16 %v236_v56, %v235_v55  ;;  %v423_v6 = vld [vmem:[%s1904_s2 + $0x40] sm:$0xff]  ;;  %v429_v14 = vld [vmem:[%s1904_s2 + $0x70] sm:$0xff] }
  0x12   :  { %154 = vmatpush.bf16.msra.mxu0 %v1181_v12  ;;  %1200 = vmatpush.bf16.msra.mxu3 %v1181_v12  ;;  %v434_v62 = vpack.c.bf16 %v422_v58, %v421_v57  ;;  %v52_v12 = vld [vmem:[%s1902_s0 + $0x50] sm:$0xff]  ;;  %v430_v15 = vld [vmem:[%s1904_s2 + $0x78] sm:$0xff]  ;;  %v67_v30 = vld [vmem:[#allocation2 + $0x8] sm:$0xff] }
  0x13   :  { %341 = vmatpush.bf16.msra.mxu1 %v1186_v13  ;;  %527 = vmatpush.bf16.msra.mxu2 %v1191_v20  ;;  %v239_v16 = vld [vmem:[%s1903_s1 + $0x50] sm:$0xff]  ;;  %v240_v17 = vld [vmem:[%s1903_s1 + $0x58] sm:$0xff]  ;;  %v438_v21 = vpack.c.bf16 %v430_v15, %v429_v14 }
  0x14   :  { %v425_v18 = vld [vmem:[%s1904_s2 + $0x50] sm:$0xff]  ;;  %v426_v19 = vld [vmem:[%s1904_s2 + $0x58] sm:$0xff]  ;;  %v250_v22 = vpack.c.bf16 %v240_v17, %v239_v16  ;;  %v78_v28 = vld [vmem:[#allocation2 + $0x60] sm:$0xff] }
  0x15   :  { %1081 = vmatmul.msk.bf16.vlgmr.msra.gmra.mxu0 %vm122_vm0, %v58_v23  ;;  %1087 = vmatmul.msk.bf16.vlgmr.msra.gmra.mxu3 %vm122_vm0, %v64_v24  ;;  %v436_v23 = vpack.c.bf16 %v426_v19, %v425_v18  ;;  %v66_v24 = vld [vmem:[#allocation2] sm:$0xff]  ;;  %v68_v40 = vld [vmem:[#allocation2 + $0x10] sm:$0xff]  ;;  %v69_v52 = vld [vmem:[#allocation2 + $0x18] sm:$0xff] }
  0x16   :  { %1201 = vmatpush.bf16.msrb.mxu3 %v1190_v1  ;;  %1119 = vmatmul.msk.bf16.vlgmr.msra.gmra.mxu1 %vm122_vm0, %v245_v25  ;;  %v51_v1 = vld [vmem:[%s1902_s0 + $0x48] sm:$0xff] }
  0x17   :  { %1157 = vmatmul.msk.bf16.vlgmr.msra.gmra.mxu2 %vm122_vm0, %v431_v26  ;;  %v71_v16 = vld [vmem:[#allocation2 + $0x28] sm:$0xff] }
  0x1a   :  { %1202 = vmatpush.bf16.msrb.mxu3 %v1189_v4  ;;  %v237_v4 = vld [vmem:[%s1903_s1 + $0x40] sm:$0xff] }
  0x1e   :  { %1203 = vmatpush.bf16.msrb.mxu3 %v1188_v7  ;;  %v424_v7 = vld [vmem:[%s1904_s2 + $0x48] sm:$0xff] }
  0x22   :  { %1204 = vmatpush.bf16.msrb.mxu3 %v1187_v10 }
  0x25   :  { %1082 = vmatmul.msk.bf16.gmra.mxu0 %vm122_vm0, %v59_v35  ;;  %1088 = vmatmul.msk.bf16.gmra.mxu3 %vm122_vm0, %v65_v36 }
  0x26   :  { %1205 = vmatpush.bf16.msrb.mxu3 %v1186_v13  ;;  %1120 = vmatmul.msk.bf16.gmra.mxu1 %vm122_vm0, %v246_v37  ;;  %v53_v13 = vld [vmem:[%s1902_s0 + $0x58] sm:$0xff] }
  0x27   :  { %1158 = vmatmul.msk.bf16.gmra.mxu2 %vm122_vm0, %v432_v38  ;;  %v79_v38 = vld [vmem:[#allocation2 + $0x68] sm:$0xff] }
  0x2a   :  { %1206 = vmatpush.bf16.msra.mxu3 %v1319_v2  ;;  %v427_v2 = vld [vmem:[%s1904_s2 + $0x60] sm:$0xff] }
  0x2b   :  { %v437_v9 = vpack.c.bf16 %v428_v3, %v427_v2 }
  0x2e   :  { %1207 = vmatpush.bf16.msra.mxu3 %v1331_v5  ;;  %v238_v5 = vld [vmem:[%s1903_s1 + $0x48] sm:$0xff] }
  0x2f   :  { %v249_v10 = vpack.c.bf16 %v238_v5, %v237_v4 }
  0x32   :  { %1208 = vmatpush.bf16.msra.mxu3 %v1343_v8  ;;  %v62_v8 = vpack.c.bf16 %v51_v1, %v50_v0  ;;  %v70_v1 = vld [vmem:[#allocation2 + $0x20] sm:$0xff] }
  0x35   :  { %1083 = vmatmul.msk.bf16.gmra.mxu0 %vm122_vm0, %v60_v47  ;;  %1125 = vmatmul.msk.bf16.vlgmr.msrb.gmra.mxu3 %vm122_vm0, %v251_v48 }
  0x36   :  { %1209 = vmatpush.bf16.msra.mxu3 %v1355_v11  ;;  %1121 = vmatmul.msk.bf16.gmra.mxu1 %vm122_vm0, %v247_v49  ;;  %v435_v11 = vpack.c.bf16 %v424_v7, %v423_v6  ;;  %v80_v49 = vld [vmem:[#allocation2 + $0x70] sm:$0xff] }
  0x37   :  { %1159 = vmatmul.msk.bf16.gmra.mxu2 %vm122_vm0, %v433_v50 }
  0x3a   :  { %1210 = vmatpush.bf16.msra.mxu3 %v1191_v20  ;;  %v63_v20 = vpack.c.bf16 %v53_v13, %v52_v12 }
  0x45   :  { %1084 = vmatmul.msk.bf16.gmra.mxu0 %vm122_vm0, %v61_v59  ;;  %1126 = vmatmul.msk.bf16.gmra.mxu3 %vm122_vm0, %v252_v60  ;;  %v1568_v60 = vld [vmem:[%s1905_s4] ss:$0 sm:$0xff]  ;;  %s1279_s4 = smov 112  }
  0x46   :  { %1122 = vmatmul.msk.bf16.gmra.mxu1 %vm122_vm0, %v248_v61 }
  0x47   :  { %1160 = vmatmul.msk.bf16.gmra.mxu2 %vm122_vm0, %v434_v62  ;;  %v81_v62 = vld [vmem:[#allocation2 + $0x78] sm:$0xff] }
  0x55   :  { %1085 = vmatmul.msk.bf16.gmra.mxu0 %vm122_vm0, %v62_v8  ;;  %1163 = vmatmul.msk.bf16.vlgmr.msra.gmra.mxu3 %vm122_vm0, %v437_v9 }
  0x56   :  { %1123 = vmatmul.msk.bf16.gmra.mxu1 %vm122_vm0, %v249_v10 }
  0x57   :  { %1161 = vmatmul.msk.bf16.gmra.mxu2 %vm122_vm0, %v435_v11 }
  0x65   :  { %1086 = vmatmul.msk.bf16.gmra.mxu0 %vm122_vm0, %v63_v20  ;;  %1164 = vmatmul.msk.bf16.gmra.mxu3 %vm122_vm0, %v438_v21 }
  0x66   :  { %1124 = vmatmul.msk.bf16.gmra.mxu1 %vm122_vm0, %v250_v22 }
  0x67   :  { %1162 = vmatmul.msk.bf16.gmra.mxu2 %vm122_vm0, %v436_v23 }
  0x92   :  { %v156_v25 = vpop.f32.mrf.mxu0 }
  0x93   :  { %v196_v26 = vadd.f32 %v156_v25, %v66_v24  ;;  %v343_v27 = vpop.f32.mrf.mxu1 }
  0x95   :  { %213 = vst.msk [vmem:[#allocation2] sm:$0xff] %vm25_vm1, %v196_v26 }
  0x98   :  { %v186_v29 = vpop.f32.mrf.mxu3 }
  0x99   :  { %v208_v31 = vadd.f32 %v186_v29, %v78_v28 }
  0x9a   :  { %v529_v32 = vpop.f32.mrf.mxu2  ;;  %v158_v33 = vpop.f32.mrf.mxu0 }
  0x9b   :  { %225 = vst.msk [vmem:[#allocation2 + $0x60] sm:$0xff] %vm25_vm1, %v208_v31  ;;  %v197_v34 = vadd.f32 %v158_v33, %v67_v30  ;;  %v345_v35 = vpop.f32.mrf.mxu1  ;;  %v72_v33 = vld [vmem:[#allocation2 + $0x30] sm:$0xff] }
  0x9c   :  { %v253_v36 = vld [vmem:[#allocation2] sm:$0xff] }
  0x9d   :  { %v383_v37 = vadd.f32 %v343_v27, %v253_v36  ;;  %214 = vst.msk [vmem:[#allocation2 + $0x8] sm:$0xff] %vm25_vm1, %v197_v34 }
  0x9f   :  { %399 = vst.msk [vmem:[#allocation2] sm:$0xff] %vm25_vm1, %v383_v37 }
  0xa0   :  { %v188_v39 = vpop.f32.mrf.mxu3 }
  0xa1   :  { %v209_v41 = vadd.f32 %v188_v39, %v79_v38 }
  0xa2   :  { %v531_v42 = vpop.f32.mrf.mxu2  ;;  %v161_v43 = vpop.f32.mrf.mxu0  ;;  %v265_v14 = vld [vmem:[#allocation2 + $0x60] sm:$0xff] }
  0xa3   :  { %226 = vst.msk [vmem:[#allocation2 + $0x68] sm:$0xff] %vm25_vm1, %v209_v41  ;;  %v198_v44 = vadd.f32 %v161_v43, %v68_v40  ;;  %v348_v45 = vpop.f32.mrf.mxu1 }
  0xa4   :  { %v254_v46 = vld [vmem:[#allocation2 + $0x8] sm:$0xff] }
  0xa5   :  { %v384_v47 = vadd.f32 %v345_v35, %v254_v46  ;;  %215 = vst.msk [vmem:[#allocation2 + $0x10] sm:$0xff] %vm25_vm1, %v198_v44 }
  0xa6   :  { %v439_v48 = vld [vmem:[#allocation2] sm:$0xff] }
  0xa7   :  { %400 = vst.msk [vmem:[#allocation2 + $0x8] sm:$0xff] %vm25_vm1, %v384_v47  ;;  %v569_v50 = vadd.f32 %v529_v32, %v439_v48 }
  0xa8   :  { %v191_v51 = vpop.f32.mrf.mxu3 }
  0xa9   :  { %585 = vst.msk [vmem:[#allocation2] sm:$0xff] %vm25_vm1, %v569_v50  ;;  %v210_v53 = vadd.f32 %v191_v51, %v80_v49 }
  0xaa   :  { %v534_v54 = vpop.f32.mrf.mxu2  ;;  %v163_v55 = vpop.f32.mrf.mxu0  ;;  %v266_v31 = vld [vmem:[#allocation2 + $0x68] sm:$0xff] }
  0xab   :  { %227 = vst.msk [vmem:[#allocation2 + $0x70] sm:$0xff] %vm25_vm1, %v210_v53  ;;  %v199_v56 = vadd.f32 %v163_v55, %v69_v52  ;;  %v350_v57 = vpop.f32.mrf.mxu1  ;;  %v73_v53 = vld [vmem:[#allocation2 + $0x38] sm:$0xff] }
  0xac   :  { %v255_v58 = vld [vmem:[#allocation2 + $0x10] sm:$0xff] }
  0xad   :  { %v385_v59 = vadd.f32 %v348_v45, %v255_v58  ;;  %216 = vst.msk [vmem:[#allocation2 + $0x18] sm:$0xff] %vm25_vm1, %v199_v56 }
  0xae   :  { %v440_v61 = vld [vmem:[#allocation2 + $0x8] sm:$0xff] }
  0xaf   :  { %401 = vst.msk [vmem:[#allocation2 + $0x10] sm:$0xff] %vm25_vm1, %v385_v59  ;;  %v570_v63 = vadd.f32 %v531_v42, %v440_v61 }
  0xb0   :  { %v193_v0 = vpop.f32.mrf.mxu3  ;;  %v604_v2 = vld [vmem:[#allocation2] sm:$0xff] }
  0xb1   :  { %586 = vst.msk [vmem:[#allocation2 + $0x8] sm:$0xff] %vm25_vm1, %v570_v63  ;;  %v211_v3 = vadd.f32 %v193_v0, %v81_v62  ;;  %v1573_v5 = vadd.f32 %v1568_v60, %v604_v2 }
  0xb2   :  { %v536_v4 = vpop.f32.mrf.mxu2  ;;  %v166_v6 = vpop.f32.mrf.mxu0  ;;  %v267_v51 = vld [vmem:[#allocation2 + $0x70] sm:$0xff] }
  0xb3   :  { %228 = vst.msk [vmem:[#allocation2 + $0x78] sm:$0xff] %vm25_vm1, %v211_v3  ;;  %v200_v7 = vadd.f32 %v166_v6, %v70_v1  ;;  %v353_v8 = vpop.f32.mrf.mxu1  ;;  %v1165_v9 = vmul.f32 -1.442695, %v1573_v5 }
  0xb4   :  { %v256_v10 = vld [vmem:[#allocation2 + $0x18] sm:$0xff] }
  0xb5   :  { %v386_v11 = vadd.f32 %v350_v57, %v256_v10  ;;  %217 = vst.msk [vmem:[#allocation2 + $0x20] sm:$0xff] %vm25_vm1, %v200_v7  ;;  %1214 = vpow2.f32 %v1165_v9 }
  0xb6   :  { %v441_v12 = vld [vmem:[#allocation2 + $0x10] sm:$0xff] }
  0xb7   :  { %402 = vst.msk [vmem:[#allocation2 + $0x18] sm:$0xff] %vm25_vm1, %v386_v11  ;;  %v571_v13 = vadd.f32 %v534_v54, %v441_v12 }
  0xb8   :  { %v373_v15 = vpop.f32.mrf.mxu3  ;;  %v605_v17 = vld [vmem:[#allocation2 + $0x8] sm:$0xff] }
  0xb9   :  { %587 = vst.msk [vmem:[#allocation2 + $0x10] sm:$0xff] %vm25_vm1, %v571_v13  ;;  %v395_v18 = vadd.f32 %v373_v15, %v265_v14  ;;  %v1581_v20 = vadd.f32 %v1568_v60, %v605_v17 }
  0xba   :  { %v539_v19 = vpop.f32.mrf.mxu2  ;;  %v168_v21 = vpop.f32.mrf.mxu0 }
  0xbb   :  { %v1215_v22 = vpop.eup %1214  ;;  %411 = vst.msk [vmem:[#allocation2 + $0x60] sm:$0xff] %vm25_vm1, %v395_v18  ;;  %v201_v23 = vadd.f32 %v168_v21, %v71_v16  ;;  %v355_v24 = vpop.f32.mrf.mxu1  ;;  %v1166_v25 = vmul.f32 -1.442695, %v1581_v20  ;;  %v268_v16 = vld [vmem:[#allocation2 + $0x78] sm:$0xff]  ;;  %v74_v18 = vld [vmem:[#allocation2 + $0x40] sm:$0xff] }
  0xbc   :  { %v257_v26 = vld [vmem:[#allocation2 + $0x20] sm:$0xff]  ;;  %v1585_v27 = vadd.f32 1.0, %v1215_v22 }
  0xbd   :  { %v387_v28 = vadd.f32 %v353_v8, %v257_v26  ;;  %218 = vst.msk [vmem:[#allocation2 + $0x28] sm:$0xff] %vm25_vm1, %v201_v23  ;;  %1216 = vpow2.f32 %v1166_v25 }
  0xbe   :  { %v442_v29 = vld [vmem:[#allocation2 + $0x18] sm:$0xff]  ;;  %1218 = vrcp.f32 %v1585_v27  ;;  %v713_v54 = vand.u32 2147483647, %v1585_v27  ;;  %v715_v55 = vand.u32 2147483648, %v1585_v27  ;;  %vm709_vm3 = vweird.f32 %v1585_v27 }
  0xbf   :  { %403 = vst.msk [vmem:[#allocation2 + $0x20] sm:$0xff] %vm25_vm1, %v387_v28  ;;  %v572_v30 = vadd.f32 %v536_v4, %v442_v29 }
  0xc0   :  { %v375_v32 = vpop.f32.mrf.mxu3  ;;  %v606_v34 = vld [vmem:[#allocation2 + $0x10] sm:$0xff]  ;;  %v716_v7 = vor.u32 1.1754944e-38, %v715_v55  ;;  %vm714_vm5 = vcmp.eq.f32.partialorder %v713_v54, 8.507059e+37 }
  0xc1   :  { %588 = vst.msk [vmem:[#allocation2 + $0x18] sm:$0xff] %vm25_vm1, %v572_v30  ;;  %v396_v35 = vadd.f32 %v375_v32, %v266_v31  ;;  %v1592_v37 = vadd.f32 %v1568_v60, %v606_v34 }
  0xc2   :  { %v541_v36 = vpop.f32.mrf.mxu2  ;;  %v171_v38 = vpop.f32.mrf.mxu0 }
  0xc3   :  { %v1217_v39 = vpop.eup %1216  ;;  %412 = vst.msk [vmem:[#allocation2 + $0x68] sm:$0xff] %vm25_vm1, %v396_v35  ;;  %v202_v40 = vadd.f32 %v171_v38, %v72_v33  ;;  %v358_v41 = vpop.f32.mrf.mxu1  ;;  %v1167_v42 = vmul.f32 -1.442695, %v1592_v37 }
  0xc4   :  { %v1219_v43 = vpop.eup %1218  ;;  %v258_v44 = vld [vmem:[#allocation2 + $0x28] sm:$0xff]  ;;  %v1596_v45 = vadd.f32 1.0, %v1217_v39 }
  0xc5   :  { %v388_v46 = vadd.f32 %v355_v24, %v258_v44  ;;  %219 = vst.msk [vmem:[#allocation2 + $0x30] sm:$0xff] %vm25_vm1, %v202_v40  ;;  %v705_v47 = vmul.f32 %v1219_v43, %v1585_v27  ;;  %1220 = vpow2.f32 %v1167_v42  ;;  %vm710_vm2 = vweird.f32 %v1219_v43 }
  0xc6   :  { %v443_v48 = vld [vmem:[#allocation2 + $0x20] sm:$0xff]  ;;  %1222 = vrcp.f32 %v1596_v45  ;;  %vm711_vm4 = vmor %vm709_vm3, %vm710_vm2  ;;  %v730_v21 = vand.u32 2147483648, %v1596_v45  ;;  %vm724_vm7 = vweird.f32 %v1596_v45 }
  0xc7   :  { %404 = vst.msk [vmem:[#allocation2 + $0x28] sm:$0xff] %vm25_vm1, %v388_v46  ;;  %v573_v49 = vadd.f32 %v539_v19, %v443_v48  ;;  %v706_v50 = vsub.f32 1.0, %v705_v47  ;;  %v728_v19 = vand.u32 2147483647, %v1596_v45  ;;  %v75_v47 = vld [vmem:[#allocation2 + $0x48] sm:$0xff] }
  0xc8   :  { %v378_v52 = vpop.f32.mrf.mxu3  ;;  %v607_v56 = vld [vmem:[#allocation2 + $0x18] sm:$0xff]  ;;  %v731_v32 = vor.u32 1.1754944e-38, %v730_v21 }
  0xc9   :  { %589 = vst.msk [vmem:[#allocation2 + $0x20] sm:$0xff] %vm25_vm1, %v573_v49  ;;  %v397_v57 = vadd.f32 %v378_v52, %v267_v51  ;;  %v707_v58 = vmul.f32 %v1219_v43, %v706_v50  ;;  %v1606_v59 = vadd.f32 %v1568_v60, %v607_v56  ;;  %vm729_vm9 = vcmp.eq.f32.partialorder %v728_v19, 8.507059e+37 }
  0xca   :  { %v173_v61 = vpop.f32.mrf.mxu0  ;;  %v544_v0 = vpop.f32.mrf.mxu2 }
  0xcb   :  { %v1221_v62 = vpop.eup %1220  ;;  %413 = vst.msk [vmem:[#allocation2 + $0x70] sm:$0xff] %vm25_vm1, %v397_v57  ;;  %v203_v63 = vadd.f32 %v173_v61, %v73_v53  ;;  %v708_v1 = vadd.f32 %v1219_v43, %v707_v58  ;;  %v1168_v2 = vmul.f32 -1.442695, %v1606_v59  ;;  %v360_v6 = vpop.f32.mrf.mxu1 }
  0xcc   :  { %v1223_v3 = vpop.eup %1222  ;;  %v259_v4 = vld [vmem:[#allocation2 + $0x30] sm:$0xff]  ;;  %v1611_v8 = vadd.f32 1.0, %v1221_v62 }
  0xcd   :  { %v389_v9 = vadd.f32 %v358_v41, %v259_v4  ;;  %220 = vst.msk [vmem:[#allocation2 + $0x38] sm:$0xff] %vm25_vm1, %v203_v63  ;;  %v712_v10 = vsel %vm711_vm4, %v1219_v43, %v708_v1  ;;  %v720_v11 = vmul.f32 %v1223_v3, %v1596_v45  ;;  %vm725_vm6 = vweird.f32 %v1223_v3  ;;  %v451_v45 = vld [vmem:[#allocation2 + $0x60] sm:$0xff] }
  0xce   :  { %v444_v12 = vld [vmem:[#allocation2 + $0x28] sm:$0xff]  ;;  %v717_v13 = vsel %vm714_vm5, %v716_v7, %v712_v10  ;;  %1224 = vrcp.f32 %v1611_v8  ;;  %vm726_vm8 = vmor %vm724_vm7, %vm725_vm6  ;;  %v743_v48 = vand.u32 2147483647, %v1611_v8  ;;  %v745_v49 = vand.u32 2147483648, %v1611_v8 }
  0xcf   :  { %405 = vst.msk [vmem:[#allocation2 + $0x30] sm:$0xff] %vm25_vm1, %v389_v9  ;;  %v574_v14 = vadd.f32 %v541_v36, %v444_v12  ;;  %960 = vrot.lane.b32.xlu0 %v717_v13, %s1279_s4  ;;  %v721_v15 = vsub.f32 1.0, %v720_v11  ;;  %1226 = vpow2.f32 %v1168_v2  ;;  %vm739_vm11 = vweird.f32 %v1611_v8  ;;  %v452_v10 = vld [vmem:[#allocation2 + $0x68] sm:$0xff]  ;;  %v76_v12 = vld [vmem:[#allocation2 + $0x50] sm:$0xff] }
  0xd0   :  { %v380_v17 = vpop.f32.mrf.mxu3  ;;  %v608_v22 = vld [vmem:[#allocation2 + $0x20] sm:$0xff]  ;;  %vm744_vm13 = vcmp.eq.f32.partialorder %v743_v48, 8.507059e+37  ;;  %v746_v62 = vor.u32 1.1754944e-38, %v745_v49 }
  0xd1   :  { %590 = vst.msk [vmem:[#allocation2 + $0x28] sm:$0xff] %vm25_vm1, %v574_v14  ;;  %v398_v23 = vadd.f32 %v380_v17, %v268_v16  ;;  %v722_v24 = vmul.f32 %v1223_v3, %v721_v15  ;;  %v1622_v25 = vadd.f32 %v1568_v60, %v608_v22 }
  0xd2   :  { %v176_v26 = vpop.f32.mrf.mxu0  ;;  %v546_v35 = vpop.f32.mrf.mxu2 }
  0xd3   :  { %414 = vst.msk [vmem:[#allocation2 + $0x78] sm:$0xff] %vm25_vm1, %v398_v23  ;;  %v204_v27 = vadd.f32 %v176_v26, %v74_v18  ;;  %v723_v28 = vadd.f32 %v1223_v3, %v722_v24  ;;  %v1169_v29 = vmul.f32 -1.442695, %v1622_v25  ;;  %v363_v40 = vpop.f32.mrf.mxu1 }
  0xd4   :  { %v1225_v30 = vpop.eup %1224  ;;  %v260_v31 = vld [vmem:[#allocation2 + $0x38] sm:$0xff] }
  0xd5   :  { %v1227_v33 = vpop.eup %1226  ;;  %v390_v34 = vadd.f32 %v360_v6, %v260_v31  ;;  %221 = vst.msk [vmem:[#allocation2 + $0x40] sm:$0xff] %vm25_vm1, %v204_v27  ;;  %v727_v36 = vsel %vm726_vm8, %v1223_v3, %v723_v28  ;;  %v735_v38 = vmul.f32 %v1225_v30, %v1611_v8  ;;  %1228 = vpow2.f32 %v1169_v29 }
  0xd6   :  { %v445_v39 = vld [vmem:[#allocation2 + $0x30] sm:$0xff]  ;;  %v732_v41 = vsel %vm729_vm9, %v731_v32, %v727_v36  ;;  %v1629_v42 = vadd.f32 1.0, %v1227_v33  ;;  %vm740_vm10 = vweird.f32 %v1225_v30 }
  0xd7   :  { %406 = vst.msk [vmem:[#allocation2 + $0x38] sm:$0xff] %vm25_vm1, %v390_v34  ;;  %v575_v43 = vadd.f32 %v544_v0, %v445_v39  ;;  %962 = vrot.lane.b32.xlu0 %v732_v41, %s1279_s4  ;;  %v736_v44 = vsub.f32 1.0, %v735_v38  ;;  %vm741_vm12 = vmor %vm739_vm11, %vm740_vm10  ;;  %v453_v41 = vld [vmem:[#allocation2 + $0x70] sm:$0xff] }
  0xd8   :  { %v559_v46 = vpop.f32.mrf.mxu3  ;;  %1230 = vrcp.f32 %v1629_v42  ;;  %v609_v50 = vld [vmem:[#allocation2 + $0x28] sm:$0xff]  ;;  %v758_v18 = vand.u32 2147483647, %v1629_v42  ;;  %v760_v19 = vand.u32 2147483648, %v1629_v42  ;;  %vm754_vm15 = vweird.f32 %v1629_v42 }
  0xd9   :  { %591 = vst.msk [vmem:[#allocation2 + $0x30] sm:$0xff] %vm25_vm1, %v575_v43  ;;  %v581_v51 = vadd.f32 %v559_v46, %v451_v45  ;;  %v737_v52 = vmul.f32 %v1225_v30, %v736_v44  ;;  %v1638_v53 = vadd.f32 %v1568_v60, %v609_v50  ;;  %v77_v43 = vld [vmem:[#allocation2 + $0x58] sm:$0xff] }
  0xda   :  { %v178_v54 = vpop.f32.mrf.mxu0  ;;  %v549_v7 = vpop.f32.mrf.mxu2  ;;  %vm759_vm2 = vcmp.eq.f32.partialorder %v758_v18, 8.507059e+37 }
  0xdb   :  { %597 = vst.msk [vmem:[#allocation2 + $0x60] sm:$0xff] %vm25_vm1, %v581_v51  ;;  %v205_v55 = vadd.f32 %v178_v54, %v75_v47  ;;  %v738_v56 = vadd.f32 %v1225_v30, %v737_v52  ;;  %v1170_v57 = vmul.f32 -1.442695, %v1638_v53  ;;  %v1229_v58 = vpop.eup %1228  ;;  %v365_v9 = vpop.f32.mrf.mxu1 }
  0xdc   :  { %v261_v61 = vld [vmem:[#allocation2 + $0x40] sm:$0xff]  ;;  %v1644_v1 = vadd.f32 1.0, %v1229_v58 }
  0xdd   :  { %v391_v63 = vadd.f32 %v363_v40, %v261_v61  ;;  %222 = vst.msk [vmem:[#allocation2 + $0x48] sm:$0xff] %vm25_vm1, %v205_v55  ;;  %v742_v0 = vsel %vm741_vm12, %v1225_v30, %v738_v56  ;;  %1232 = vpow2.f32 %v1170_v57 }
  0xde   :  { %v1231_v2 = vpop.eup %1230  ;;  %v446_v3 = vld [vmem:[#allocation2 + $0x38] sm:$0xff]  ;;  %v747_v4 = vsel %vm744_vm13, %v746_v62, %v742_v0  ;;  %1234 = vrcp.f32 %v1644_v1  ;;  %v775_v48 = vand.u32 2147483648, %v1644_v1  ;;  %v773_v54 = vand.u32 2147483647, %v1644_v1 }
  0xdf   :  { %407 = vst.msk [vmem:[#allocation2 + $0x40] sm:$0xff] %vm25_vm1, %v391_v63  ;;  %v576_v6 = vadd.f32 %v546_v35, %v446_v3  ;;  %964 = vrot.lane.b32.xlu1 %v747_v4, %s1279_s4  ;;  %v750_v8 = vmul.f32 %v1231_v2, %v1629_v42  ;;  %vm755_vm14 = vweird.f32 %v1231_v2  ;;  %v761_v35 = vor.u32 1.1754944e-38, %v760_v19 }
  0xe0   :  { %v561_v11 = vpop.f32.mrf.mxu3  ;;  %v610_v13 = vld [vmem:[#allocation2 + $0x30] sm:$0xff]  ;;  %vm756_vm0 = vmor %vm754_vm15, %vm755_vm14  ;;  %vm769_vm4 = vweird.f32 %v1644_v1  ;;  %vm774_vm6 = vcmp.eq.f32.partialorder %v773_v54, 8.507059e+37 }
  0xe1   :  { %592 = vst.msk [vmem:[#allocation2 + $0x38] sm:$0xff] %vm25_vm1, %v576_v6  ;;  %v582_v14 = vadd.f32 %v561_v11, %v452_v10  ;;  %v751_v15 = vsub.f32 1.0, %v750_v8  ;;  %v1652_v16 = vadd.f32 %v1568_v60, %v610_v13  ;;  %v454_v10 = vld [vmem:[#allocation2 + $0x78] sm:$0xff] }
  0xe2   :  { %v181_v17 = vpop.f32.mrf.mxu0  ;;  %v616_v21 = vld [vmem:[#allocation2 + $0x60] sm:$0xff]  ;;  %v551_v46 = vpop.f32.mrf.mxu2 }
  0xe3   :  { %v1233_v22 = vpop.eup %1232  ;;  %598 = vst.msk [vmem:[#allocation2 + $0x68] sm:$0xff] %vm25_vm1, %v582_v14  ;;  %v206_v23 = vadd.f32 %v181_v17, %v76_v12  ;;  %v752_v24 = vmul.f32 %v1231_v2, %v751_v15  ;;  %v1171_v26 = vmul.f32 -1.442695, %v1652_v16  ;;  %v1659_v27 = vadd.f32 %v1568_v60, %v616_v21  ;;  %v368_v50 = vpop.f32.mrf.mxu1 }
  0xe4   :  { %v262_v28 = vld [vmem:[#allocation2 + $0x48] sm:$0xff]  ;;  %v1662_v29 = vadd.f32 1.0, %v1233_v22  ;;  %v1235_v30 = vpop.eup %1234 }
  0xe5   :  { %v392_v31 = vadd.f32 %v365_v9, %v262_v28  ;;  %223 = vst.msk [vmem:[#allocation2 + $0x50] sm:$0xff] %vm25_vm1, %v206_v23  ;;  %v753_v32 = vadd.f32 %v1231_v2, %v752_v24  ;;  %1236 = vpow2.f32 %v1171_v26  ;;  %v1177_v33 = vmul.f32 -1.442695, %v1659_v27 }
  0xe6   :  { %v447_v34 = vld [vmem:[#allocation2 + $0x40] sm:$0xff]  ;;  %v765_v36 = vmul.f32 %v1235_v30, %v1644_v1  ;;  %1238 = vrcp.f32 %v1662_v29  ;;  %vm770_vm3 = vweird.f32 %v1235_v30  ;;  %v788_v12 = vand.u32 2147483647, %v1662_v29 }
  0xe7   :  { %408 = vst.msk [vmem:[#allocation2 + $0x48] sm:$0xff] %vm25_vm1, %v392_v31  ;;  %v577_v38 = vadd.f32 %v549_v7, %v447_v34  ;;  %v757_v39 = vsel %vm756_vm0, %v1231_v2, %v753_v32  ;;  %1240 = vpow2.f32 %v1177_v33  ;;  %vm771_vm5 = vmor %vm769_vm4, %vm770_vm3  ;;  %v776_v2 = vor.u32 1.1754944e-38, %v775_v48 }
  0xe8   :  { %v762_v40 = vsel %vm759_vm2, %v761_v35, %v757_v39  ;;  %v564_v42 = vpop.f32.mrf.mxu3  ;;  %v766_v44 = vsub.f32 1.0, %v765_v36  ;;  %v611_v45 = vld [vmem:[#allocation2 + $0x38] sm:$0xff]  ;;  %v790_v13 = vand.u32 2147483648, %v1662_v29  ;;  %vm784_vm8 = vweird.f32 %v1662_v29 }
  0xe9   :  { %593 = vst.msk [vmem:[#allocation2 + $0x40] sm:$0xff] %vm25_vm1, %v577_v38  ;;  %966 = vrot.lane.b32.xlu1 %v762_v40, %s1279_s4  ;;  %v583_v47 = vadd.f32 %v564_v42, %v453_v41  ;;  %v1674_v49 = vadd.f32 %v1568_v60, %v611_v45  ;;  %vm789_vm10 = vcmp.eq.f32.partialorder %v788_v12, 8.507059e+37 }
  0xea   :  { %v183_v51 = vpop.f32.mrf.mxu0  ;;  %v767_v52 = vmul.f32 %v1235_v30, %v766_v44  ;;  %v617_v21 = vld [vmem:[#allocation2 + $0x68] sm:$0xff]  ;;  %v554_v31 = vpop.f32.mrf.mxu2  ;;  %v791_v32 = vor.u32 1.1754944e-38, %v790_v13 }
  0xeb   :  { %v1237_v55 = vpop.eup %1236  ;;  %599 = vst.msk [vmem:[#allocation2 + $0x70] sm:$0xff] %vm25_vm1, %v583_v47  ;;  %v207_v56 = vadd.f32 %v183_v51, %v77_v43  ;;  %v1172_v57 = vmul.f32 -1.442695, %v1674_v49  ;;  %v1702_v34 = vadd.f32 %v1568_v60, %v617_v21 }
  0xec   :  { %v1239_v58 = vpop.eup %1238  ;;  %v263_v61 = vld [vmem:[#allocation2 + $0x50] sm:$0xff]  ;;  %v768_v62 = vadd.f32 %v1235_v30, %v767_v52  ;;  %v1680_v63 = vadd.f32 1.0, %v1237_v55 }
  0xed   :  { %v393_v0 = vadd.f32 %v368_v50, %v263_v61  ;;  %224 = vst.msk [vmem:[#allocation2 + $0x58] sm:$0xff] %vm25_vm1, %v207_v56  ;;  %v780_v3 = vmul.f32 %v1239_v58, %v1662_v29  ;;  %1242 = vpow2.f32 %v1172_v57  ;;  %v1241_v4 = vpop.eup %1240  ;;  %vm785_vm7 = vweird.f32 %v1239_v58 }
  0xee   :  { %v448_v6 = vld [vmem:[#allocation2 + $0x48] sm:$0xff]  ;;  %v772_v7 = vsel %vm771_vm5, %v1235_v30, %v768_v62  ;;  %1244 = vrcp.f32 %v1680_v63  ;;  %v1689_v14 = vadd.f32 1.0, %v1241_v4  ;;  %v370_v30 = vpop.f32.mrf.mxu1  ;;  %vm786_vm9 = vmor %vm784_vm8, %vm785_vm7  ;;  %v803_v40 = vand.u32 2147483647, %v1680_v63 }
  0xef   :  { %409 = vst.msk [vmem:[#allocation2 + $0x50] sm:$0xff] %vm25_vm1, %v393_v0  ;;  %v578_v8 = vadd.f32 %v551_v46, %v448_v6  ;;  %v777_v1 = vsel %vm774_vm6, %v776_v2, %v772_v7  ;;  %v781_v9 = vsub.f32 1.0, %v780_v3  ;;  %v805_v43 = vand.u32 2147483648, %v1680_v63 }
  0xf0   :  { %968 = vrot.lane.b32.xlu2 %v777_v1, %s1279_s4  ;;  %v566_v11 = vpop.f32.mrf.mxu3  ;;  %v612_v15 = vld [vmem:[#allocation2 + $0x40] sm:$0xff]  ;;  %1246 = vrcp.f32 %v1689_v14  ;;  %v1178_v46 = vmul.f32 -1.442695, %v1702_v34  ;;  %vm799_vm12 = vweird.f32 %v1680_v63  ;;  %vm1717_vm13 = vcmp.eq.f32.partialorder %v803_v40, 8.507059e+37 }
  0xf1   :  { %594 = vst.msk [vmem:[#allocation2 + $0x48] sm:$0xff] %vm25_vm1, %v578_v8  ;;  %v584_v17 = vadd.f32 %v566_v11, %v454_v10  ;;  %v782_v18 = vmul.f32 %v1239_v58, %v781_v9  ;;  %v1693_v19 = vadd.f32 %v1568_v60, %v612_v15  ;;  %v806_v55 = vor.u32 1.1754944e-38, %v805_v43 }
  0xf2   :  { %vm889_vm15 = vweird.f32 %v1689_v14  ;;  %v893_v61 = vand.u32 2147483647, %v1689_v14  ;;  %v895_v3 = vand.u32 2147483648, %v1689_v14  ;;  %v618_v6 = vld [vmem:[#allocation2 + $0x70] sm:$0xff]  ;;  %v556_v8 = vpop.f32.mrf.mxu2 }
  0xf3   :  { %v1243_v22 = vpop.eup %1242  ;;  %600 = vst.msk [vmem:[#allocation2 + $0x78] sm:$0xff] %vm25_vm1, %v584_v17  ;;  %v783_v23 = vadd.f32 %v1239_v58, %v782_v18  ;;  %v1173_v24 = vmul.f32 -1.442695, %v1693_v19  ;;  %v1745_v21 = vadd.f32 %v1568_v60, %v618_v6 }
  0xf4   :  { %v1245_v26 = vpop.eup %1244  ;;  %v264_v28 = vld [vmem:[#allocation2 + $0x58] sm:$0xff]  ;;  %v1699_v33 = vadd.f32 1.0, %v1243_v22  ;;  %vm1757_vm4 = vcmp.eq.f32.partialorder %v893_v61, 8.507059e+37 }
  0xf5   :  { %v394_v35 = vadd.f32 %v370_v30, %v264_v28  ;;  %v787_v36 = vsel %vm786_vm9, %v1239_v58, %v783_v23  ;;  %v795_v38 = vmul.f32 %v1245_v26, %v1680_v63  ;;  %vm800_vm11 = vweird.f32 %v1245_v26 }
  0xf6   :  { %v449_v39 = vld [vmem:[#allocation2 + $0x50] sm:$0xff]  ;;  %v792_v29 = vsel %vm789_vm10, %v791_v32, %v787_v36  ;;  %1248 = vrcp.f32 %v1699_v33  ;;  %v1709_v44 = vpop.eup %1246  ;;  %vm801_vm14 = vmor %vm799_vm12, %vm800_vm11  ;;  %v818_v15 = vand.u32 2147483647, %v1699_v33  ;;  %v820_v17 = vand.u32 2147483648, %v1699_v33 }
  0xf7   :  { %410 = vst.msk [vmem:[#allocation2 + $0x58] sm:$0xff] %vm25_vm1, %v394_v35  ;;  %v579_v41 = vadd.f32 %v554_v31, %v449_v39  ;;  %v796_v42 = vsub.f32 1.0, %v795_v38  ;;  %1250 = vpow2.f32 %v1173_v24  ;;  %v885_v48 = vmul.f32 %v1709_v44, %v1689_v14 }
  0xf8   :  { %970 = vrot.lane.b32.xlu2 %v792_v29, %s1279_s4  ;;  %v613_v45 = vld [vmem:[#allocation2 + $0x48] sm:$0xff]  ;;  %1252 = vpow2.f32 %v1178_v46  ;;  %vm890_vm0 = vweird.f32 %v1709_v44  ;;  %v896_v36 = vor.u32 1.1754944e-38, %v895_v3  ;;  %vm819_vm6 = vcmp.eq.f32.partialorder %v818_v15, 8.507059e+37 }
  0xf9   :  { %595 = vst.msk [vmem:[#allocation2 + $0x50] sm:$0xff] %vm25_vm1, %v579_v41  ;;  %v797_v47 = vmul.f32 %v1245_v26, %v796_v42  ;;  %v1722_v51 = vadd.f32 %v1568_v60, %v613_v45  ;;  %v886_v56 = vsub.f32 1.0, %v885_v48  ;;  %vm1753_vm3 = vmor %vm889_vm15, %vm890_vm0  ;;  %v821_v14 = vor.u32 1.1754944e-38, %v820_v17 }
  0xfa   :  { %v619_v52 = vld [vmem:[#allocation2 + $0x78] sm:$0xff]  ;;  %v1179_v38 = vmul.f32 -1.442695, %v1745_v21 }
  0xfb   :  { %v798_v54 = vadd.f32 %v1245_v26, %v797_v47  ;;  %v1725_v57 = vadd.f32 %v1568_v60, %v619_v52  ;;  %v1174_v62 = vmul.f32 -1.442695, %v1722_v51  ;;  %v887_v2 = vmul.f32 %v1709_v44, %v886_v56 }
  0xfc   :  { %v1249_v58 = vpop.eup %1248 }
  0xfd   :  { %v1251_v63 = vpop.eup %1250  ;;  %v802_v0 = vsel %vm801_vm14, %v1245_v26, %v798_v54  ;;  %v810_v4 = vmul.f32 %v1249_v58, %v1699_v33  ;;  %1254 = vpow2.f32 %v1174_v62  ;;  %v1180_v10 = vmul.f32 -1.442695, %v1725_v57 }
  0xfe   :  { %v450_v7 = vld [vmem:[#allocation2 + $0x58] sm:$0xff]  ;;  %v807_v1 = vsel %vm1717_vm13, %v806_v55, %v802_v0  ;;  %v1735_v9 = vadd.f32 1.0, %v1251_v63  ;;  %v888_v12 = vadd.f32 %v1709_v44, %v887_v2  ;;  %vm815_vm2 = vweird.f32 %v1249_v58  ;;  %v1253_v24 = vpop.eup %1252 }
  0xff   :  { %v580_v11 = vadd.f32 %v556_v8, %v450_v7  ;;  %972 = vrot.lane.b32.xlu0 %v807_v1, %s1279_s4  ;;  %v811_v13 = vsub.f32 1.0, %v810_v4  ;;  %v1767_v40 = vadd.f32 1.0, %v1253_v24 }
 0x100   :  { %1256 = vrcp.f32 %v1735_v9  ;;  %v614_v18 = vld [vmem:[#allocation2 + $0x50] sm:$0xff]  ;;  %v892_v30 = vsel %vm1753_vm3, %v1709_v44, %v888_v12  ;;  %v835_v50 = vand.u32 2147483648, %v1735_v9  ;;  %v833_v55 = vand.u32 2147483647, %v1735_v9 }
 0x101   :  { %596 = vst.msk [vmem:[#allocation2 + $0x58] sm:$0xff] %vm25_vm1, %v580_v11  ;;  %v812_v22 = vmul.f32 %v1249_v58, %v811_v13  ;;  %1258 = vpow2.f32 %v1180_v10  ;;  %v1749_v23 = vadd.f32 %v1568_v60, %v614_v18  ;;  %vm814_vm1 = vweird.f32 %v1699_v33 }
 0x102   :  { %vm816_vm5 = vmor %vm814_vm1, %vm815_vm2  ;;  %v897_v42 = vsel %vm1757_vm4, %v896_v36, %v892_v30  ;;  %vm829_vm8 = vweird.f32 %v1735_v9  ;;  %vm834_vm10 = vcmp.eq.f32.partialorder %v833_v55, 8.507059e+37 }
 0x103   :  { %v813_v31 = vadd.f32 %v1249_v58, %v812_v22  ;;  %v1175_v32 = vmul.f32 -1.442695, %v1749_v23  ;;  %v1255_v35 = vpop.eup %1254 }
 0x104   :  { %v697_v29 = vadd.f32 1.0, %v1255_v35 }
 0x105   :  { %v817_v39 = vsel %vm816_vm5, %v1249_v58, %v813_v31  ;;  %1260 = vpow2.f32 %v1175_v32 }
 0x106   :  { %v1257_v41 = vpop.eup %1256  ;;  %v822_v43 = vsel %vm819_vm6, %v821_v14, %v817_v39  ;;  %1262 = vrcp.f32 %v697_v29  ;;  %v850_v8 = vand.u32 2147483648, %v697_v29  ;;  %v848_v11 = vand.u32 2147483647, %v697_v29 }
 0x107   :  { %v1259_v33 = vpop.eup %1258  ;;  %984 = vrot.lane.b32.xlu0 %v897_v42, %s1279_s4  ;;  %974 = vrot.lane.b32.xlu1 %v822_v43, %s1279_s4  ;;  %v825_v44 = vmul.f32 %v1257_v41, %v1735_v9  ;;  %1264 = vpow2.f32 %v1179_v38  ;;  %vm830_vm7 = vweird.f32 %v1257_v41  ;;  %vm844_vm12 = vweird.f32 %v697_v29 }
 0x108   :  { %v1774_v45 = vadd.f32 1.0, %v1259_v33  ;;  %v615_v46 = vld [vmem:[#allocation2 + $0x58] sm:$0xff]  ;;  %1266 = vrcp.f32 %v1767_v40  ;;  %vm831_vm9 = vmor %vm829_vm8, %vm830_vm7  ;;  %v851_v18 = vor.u32 1.1754944e-38, %v850_v8  ;;  %vm849_vm14 = vcmp.eq.f32.partialorder %v848_v11, 8.507059e+37 }
 0x109   :  { %v826_v47 = vsub.f32 1.0, %v825_v44  ;;  %v1778_v48 = vadd.f32 %v1568_v60, %v615_v46  ;;  %v836_v60 = vor.u32 1.1754944e-38, %v835_v50  ;;  %vm904_vm8 = vweird.f32 %v1767_v40 }
 0x10a   :  { %1268 = vrcp.f32 %v1774_v45  ;;  %v940_v14 = vand.u32 2147483648, %v1774_v45  ;;  %vm934_vm2 = vweird.f32 %v1774_v45 }
 0x10b   :  { %v1261_v52 = vpop.eup %1260  ;;  %v827_v54 = vmul.f32 %v1257_v41, %v826_v47  ;;  %v1176_v58 = vmul.f32 -1.442695, %v1778_v48 }
 0x10c   :  { %v1783_v56 = vadd.f32 1.0, %v1261_v52  ;;  %v1263_v61 = vpop.eup %1262  ;;  %v941_v47 = vor.u32 1.1754944e-38, %v940_v14 }
 0x10d   :  { %v828_v62 = vadd.f32 %v1257_v41, %v827_v54  ;;  %v1265_v63 = vpop.eup %1264  ;;  %v840_v0 = vmul.f32 %v1263_v61, %v697_v29  ;;  %vm845_vm11 = vweird.f32 %v1263_v61 }
 0x10e   :  { %1270 = vrcp.f32 %v1783_v56  ;;  %v1788_v2 = vpop.eup %1266  ;;  %v1792_v9 = vadd.f32 1.0, %v1265_v63  ;;  %vm846_vm13 = vmor %vm844_vm12, %vm845_vm11  ;;  %v865_v38 = vand.u32 2147483648, %v1783_v56  ;;  %v863_v29 = vand.u32 2147483647, %v1783_v56 }
 0x10f   :  { %v832_v3 = vsel %vm831_vm9, %v1257_v41, %v828_v62  ;;  %v841_v7 = vsub.f32 1.0, %v840_v0  ;;  %1272 = vpow2.f32 %v1176_v58  ;;  %v900_v13 = vmul.f32 %v1788_v2, %v1767_v40 }
 0x110   :  { %v1269_v4 = vpop.eup %1268  ;;  %v837_v6 = vsel %vm834_vm10, %v836_v60, %v832_v3  ;;  %1274 = vrcp.f32 %v1792_v9  ;;  %v938_v41 = vand.u32 2147483647, %v1774_v45  ;;  %vm859_vm4 = vweird.f32 %v1783_v56 }
 0x111   :  { %976 = vrot.lane.b32.xlu2 %v837_v6, %s1279_s4  ;;  %v930_v1 = vmul.f32 %v1269_v4, %v1774_v45  ;;  %v842_v10 = vmul.f32 %v1263_v61, %v841_v7  ;;  %v901_v32 = vsub.f32 1.0, %v900_v13  ;;  %vm935_vm15 = vweird.f32 %v1269_v4 }
 0x112   :  { %vm936_vm3 = vmor %vm934_vm2, %vm935_vm15  ;;  %v866_v46 = vor.u32 1.1754944e-38, %v865_v38  ;;  %vm864_vm5 = vcmp.eq.f32.partialorder %v863_v29, 8.507059e+37  ;;  %vm939_vm6 = vcmp.eq.f32.partialorder %v938_v41, 8.507059e+37  ;;  %vm905_vm7 = vweird.f32 %v1788_v2 }
 0x113   :  { %v931_v12 = vsub.f32 1.0, %v930_v1  ;;  %v843_v17 = vadd.f32 %v1263_v61, %v842_v10  ;;  %v902_v33 = vmul.f32 %v1788_v2, %v901_v32  ;;  %v908_v62 = vand.u32 2147483647, %v1767_v40  ;;  %vm906_vm9 = vmor %vm904_vm8, %vm905_vm7 }
 0x114   :  { %v1271_v15 = vpop.eup %1270  ;;  %v925_v13 = vand.u32 2147483648, %v1792_v9 }
 0x115   :  { %v932_v22 = vmul.f32 %v1269_v4, %v931_v12  ;;  %v855_v24 = vmul.f32 %v1271_v15, %v1783_v56  ;;  %v1273_v26 = vpop.eup %1272  ;;  %v847_v28 = vsel %vm846_vm13, %v1263_v61, %v843_v17  ;;  %vm860_vm0 = vweird.f32 %v1271_v15 }
 0x116   :  { %v852_v30 = vsel %vm849_vm14, %v851_v18, %v847_v28  ;;  %v699_v35 = vadd.f32 1.0, %v1273_v26  ;;  %v1275_v42 = vpop.eup %1274  ;;  %vm861_vm1 = vmor %vm859_vm4, %vm860_vm0  ;;  %v903_v45 = vadd.f32 %v1788_v2, %v902_v33  ;;  %v910_v56 = vand.u32 2147483648, %v1767_v40 }
 0x117   :  { %v856_v31 = vsub.f32 1.0, %v855_v24  ;;  %978 = vrot.lane.b32.xlu0 %v852_v30, %s1279_s4  ;;  %v933_v36 = vadd.f32 %v1269_v4, %v932_v22  ;;  %v915_v54 = vmul.f32 %v1275_v42, %v1792_v9  ;;  %vm909_vm11 = vcmp.eq.f32.partialorder %v908_v62, 8.507059e+37 }
 0x118   :  { %1276 = vrcp.f32 %v699_v35  ;;  %v907_v0 = vsel %vm906_vm9, %v1788_v2, %v903_v45  ;;  %v880_v3 = vand.u32 2147483648, %v699_v35  ;;  %v878_v7 = vand.u32 2147483647, %v699_v35 }
 0x119   :  { %v857_v39 = vmul.f32 %v1271_v15, %v856_v31  ;;  %v937_v44 = vsel %vm936_vm3, %v1269_v4, %v933_v36  ;;  %v916_v60 = vsub.f32 1.0, %v915_v54  ;;  %v911_v4 = vor.u32 1.1754944e-38, %v910_v56 }
 0x11a   :  { %v942_v58 = vsel %vm939_vm6, %v941_v47, %v937_v44  ;;  %vm874_vm12 = vweird.f32 %v699_v35  ;;  %v881_v11 = vor.u32 1.1754944e-38, %v880_v3  ;;  %vm879_vm14 = vcmp.eq.f32.partialorder %v878_v7, 8.507059e+37 }
 0x11b   :  { %v858_v43 = vadd.f32 %v1271_v15, %v857_v39  ;;  %v912_v8 = vsel %vm909_vm11, %v911_v4, %v907_v0  ;;  %v917_v10 = vmul.f32 %v1275_v42, %v916_v60  ;;  %vm920_vm15 = vweird.f32 %v1275_v42 }
 0x11c   :  { %vm919_vm0 = vweird.f32 %v1792_v9  ;;  %v926_v18 = vor.u32 1.1754944e-38, %v925_v13  ;;  %vm1040_vm4 = vcmask 125952  }
 0x11d   :  { %v862_v50 = vsel %vm861_vm1, %v1271_v15, %v858_v43  ;;  %v918_v2 = vadd.f32 %v1275_v42, %v917_v10  ;;  %v923_v15 = vand.u32 2147483647, %v1792_v9  ;;  %vm921_vm2 = vmor %vm919_vm0, %vm920_vm15 }
 0x11e   :  { %v867_v52 = vsel %vm864_vm5, %v866_v46, %v862_v50  ;;  %v1277_v55 = vpop.eup %1276 }
 0x11f   :  { %980 = vrot.lane.b32.xlu1 %v867_v52, %s1279_s4  ;;  %990 = vrot.lane.b32.xlu0 %v942_v58, %s1279_s4  ;;  %v870_v61 = vmul.f32 %v1277_v55, %v699_v35  ;;  %vm875_vm10 = vweird.f32 %v1277_v55  ;;  %v922_v17 = vsel %vm921_vm2, %v1275_v42, %v918_v2  ;;  %vm924_vm3 = vcmp.eq.f32.partialorder %v923_v15, 8.507059e+37 }
 0x120   :  { %vm876_vm13 = vmor %vm874_vm12, %vm875_vm10  ;;  %v927_v22 = vsel %vm924_vm3, %v926_v18, %v922_v17 }
 0x121   :  { %v871_v63 = vsub.f32 1.0, %v870_v61 }
 0x123   :  { %v872_v6 = vmul.f32 %v1277_v55, %v871_v63 }
 0x125   :  { %v873_v1 = vadd.f32 %v1277_v55, %v872_v6 }
 0x127   :  { %986 = vrot.lane.b32.xlu1 %v912_v8, %s1279_s4  ;;  %v877_v40 = vsel %vm876_vm13, %v1277_v55, %v873_v1 }
 0x128   :  { %v882_v12 = vsel %vm879_vm14, %v881_v11, %v877_v40 }
 0x129   :  { %982 = vrot.lane.b32.xlu2 %v882_v12, %s1279_s4 }
 0x131   :  { %988 = vrot.lane.b32.xlu2 %v927_v22, %s1279_s4 }
 0x141   :  { %v961_v24 = vpop.permute.xlu0 %960 }
 0x142   :  { %v1008_v26 = vmul.f32 %v961_v24, %v1573_v5 }
 0x144   :  { %v1024_v28 = vpack.c.bf16 %v1008_v26, %v1008_v26 }
 0x146   :  { %1041 = vst.msk [vmem:[%s1906_s5] sm:$0xf] %vm1040_vm4, %v1024_v28 }
 0x149   :  { %v963_v30 = vpop.permute.xlu0 %962 }
 0x14a   :  { %v1009_v9 = vmul.f32 %v963_v30, %v1581_v20  ;;  %v969_v31 = vpop.permute.xlu2 %968 }
 0x14b   :  { %v1012_v32 = vmul.f32 %v969_v31, %v1622_v25 }
 0x14c   :  { %v1025_v35 = vpack.c.bf16 %v1009_v9, %v1009_v9 }
 0x14d   :  { %v1028_v36 = vpack.c.bf16 %v1012_v32, %v1012_v32 }
 0x14e   :  { %1042 = vst.msk [vmem:[%s1906_s5 + $0x4] sm:$0xf] %vm1040_vm4, %v1025_v35 }
 0x14f   :  { %1045 = vst.msk [vmem:[%s1906_s5 + $0x10] sm:$0xf] %vm1040_vm4, %v1028_v36 }
 0x151   :  { %v965_v5 = vpop.permute.xlu1 %964 }
 0x152   :  { %v1010_v14 = vmul.f32 %v965_v5, %v1592_v37  ;;  %v971_v38 = vpop.permute.xlu2 %970 }
 0x153   :  { %v1013_v20 = vmul.f32 %v971_v38, %v1638_v53 }
 0x154   :  { %v1026_v39 = vpack.c.bf16 %v1010_v14, %v1010_v14 }
 0x155   :  { %v1029_v25 = vpack.c.bf16 %v1013_v20, %v1013_v20 }
 0x156   :  { %1043 = vst.msk [vmem:[%s1906_s5 + $0x8] sm:$0xf] %vm1040_vm4, %v1026_v39 }
 0x157   :  { %1046 = vst.msk [vmem:[%s1906_s5 + $0x14] sm:$0xf] %vm1040_vm4, %v1029_v25 }
 0x15b   :  { %v967_v29 = vpop.permute.xlu1 %966 }
 0x15c   :  { %v1011_v41 = vmul.f32 %v967_v29, %v1606_v59 }
 0x15e   :  { %v1027_v42 = vpack.c.bf16 %v1011_v41, %v1011_v41 }
 0x160   :  { %1044 = vst.msk [vmem:[%s1906_s5 + $0xc] sm:$0xf] %vm1040_vm4, %v1027_v42 }
 0x16b   :  { %v977_v37 = vpop.permute.xlu2 %976 }
 0x16c   :  { %v1016_v53 = vmul.f32 %v977_v37, %v1693_v19 }
 0x16e   :  { %v1032_v43 = vpack.c.bf16 %v1016_v53, %v1016_v53 }
 0x170   :  { %1049 = vst.msk [vmem:[%s1906_s5 + $0x20] sm:$0xf] %vm1040_vm4, %v1032_v43 }
 0x171   :  { %v973_v33 = vpop.permute.xlu0 %972 }
 0x172   :  { %v1014_v44 = vmul.f32 %v973_v33, %v1652_v16 }
 0x174   :  { %v1030_v46 = vpack.c.bf16 %v1014_v44, %v1014_v44 }
 0x176   :  { %1047 = vst.msk [vmem:[%s1906_s5 + $0x18] sm:$0xf] %vm1040_vm4, %v1030_v46 }
 0x179   :  { %v985_v59 = vpop.permute.xlu0 %984  ;;  %v975_v47 = vpop.permute.xlu1 %974 }
 0x17a   :  { %v1020_v50 = vmul.f32 %v985_v59, %v1659_v27  ;;  %v1015_v19 = vmul.f32 %v975_v47, %v1674_v49 }
 0x17c   :  { %v1036_v52 = vpack.c.bf16 %v1020_v50, %v1020_v50  ;;  %v1031_v54 = vpack.c.bf16 %v1015_v19, %v1015_v19 }
 0x17e   :  { %1053 = vst.msk [vmem:[%s1906_s5 + $0x30] sm:$0xf] %vm1040_vm4, %v1036_v52 }
 0x17f   :  { %1048 = vst.msk [vmem:[%s1906_s5 + $0x1c] sm:$0xf] %vm1040_vm4, %v1031_v54 }
 0x183   :  { %v983_v16 = vpop.permute.xlu2 %982 }
 0x184   :  { %v1019_v55 = vmul.f32 %v983_v16, %v1778_v48 }
 0x186   :  { %v1035_v58 = vpack.c.bf16 %v1019_v55, %v1019_v55 }
 0x188   :  { %1052 = vst.msk [vmem:[%s1906_s5 + $0x2c] sm:$0xf] %vm1040_vm4, %v1035_v58 }
 0x189   :  { %v979_v27 = vpop.permute.xlu0 %978 }
 0x18a   :  { %v1017_v49 = vmul.f32 %v979_v27, %v1722_v51 }
 0x18b   :  { %v989_v45 = vpop.permute.xlu2 %988 }
 0x18c   :  { %v1033_v56 = vpack.c.bf16 %v1017_v49, %v1017_v49  ;;  %v1022_v61 = vmul.f32 %v989_v45, %v1745_v21 }
 0x18e   :  { %1050 = vst.msk [vmem:[%s1906_s5 + $0x24] sm:$0xf] %vm1040_vm4, %v1033_v56  ;;  %v1038_v62 = vpack.c.bf16 %v1022_v61, %v1022_v61 }
 0x190   :  { %1055 = vst.msk [vmem:[%s1906_s5 + $0x38] sm:$0xf] %vm1040_vm4, %v1038_v62 }
 0x191   :  { %v981_v48 = vpop.permute.xlu1 %980  ;;  %v991_v63 = vpop.permute.xlu0 %990 }
 0x192   :  { %v1018_v60 = vmul.f32 %v981_v48, %v1749_v23  ;;  %v1023_v51 = vmul.f32 %v991_v63, %v1725_v57 }
 0x194   :  { %v1034_v0 = vpack.c.bf16 %v1018_v60, %v1018_v60  ;;  %v1039_v3 = vpack.c.bf16 %v1023_v51, %v1023_v51 }
 0x196   :  { %1051 = vst.msk [vmem:[%s1906_s5 + $0x28] sm:$0xf] %vm1040_vm4, %v1034_v0 }
 0x197   :  { %1056 = vst.msk [vmem:[%s1906_s5 + $0x3c] sm:$0xf] %vm1040_vm4, %v1039_v3 }
 0x199   :  { %v987_v21 = vpop.permute.xlu1 %986 }
 0x19a   :  { %v1021_v4 = vmul.f32 %v987_v21, %v1702_v34 }
 0x19c   :  { %v1037_v6 = vpack.c.bf16 %v1021_v4, %v1021_v4 }
 0x19e   :  { %1054 = vst.msk [vmem:[%s1906_s5 + $0x34] sm:$0xf] %vm1040_vm4, %v1037_v6 }

// kernel: transformer_stt_forward.43
= control target key start
LH: loop header
LB: loop body
LE: loop exit
PB: predicated region body
PF: predicated region fallthrough
CT: control target
= control target key end

     0   :  { %s531_s12 = smov 0   ;;  %s533_s13 = smov 0   ;;  %s578_s0 = inlined_call_operand.vmem [shape: f32[16,16], index: 0, kind: input, shape index: {}]   ;;  %s579_s1 = inlined_call_operand.vmem [shape: bf16[3,16,16], index: 1, kind: input, shape index: {}]   ;;  %s580_s2 = inlined_call_operand.vmem [shape: f32[3,1,16], index: 2, kind: input, shape index: {}]   ;;  %s581_s3 = inlined_call_operand.vmem [shape: bf16[3,16,16], index: 3, kind: output, shape index: {}]  }
   0x1   :  { %s535_s14 = smov 0  }
   0x2 LB: > { %s28_s15 = sadd.s32 1, %s504_s13  ;;  %p445_p0 = scmp.ge.s32.totalorder %s508_s14, 1  ;;  %s508_s14 = sphi %s535_s14, %s13_s14   ;;  %s504_s13 = sphi %s533_s13, %s583_s13   ;;  %s500_s12 = sphi %s531_s12, %s582_s12  }
   0x3   : > { %p30_p1 = scmp.ge.s32.totalorder %s28_s15, 3  ;;  %p189_p2 = scmp.lt.s32.totalorder %s508_s14, 4 }
   0x5   : > { %s585_s15 = smov (%p30_p1, %s28_s15), 0  ;;  %p190_p3 = pnand %p445_p0, %p189_p2 }
   0x6   : > { %p242_p4 = scmp.lt.s32.totalorder (!%p190_p3), %s500_s12, 2 }
   0x7   : > { %193 = sbr.rel (%p190_p3) target bundleno = 168 (0xa8), region = 32 }
   0xc   : > { %vm269_vm0 = vcmask 130048   ;;  %v510_v0 = vmov 0.0   ;;  %s587_s12 = smov (!%p242_p4, %s500_s12), 2  ;;  %v272_v1 = vld [vmem:[%s578_s0] sm:$0xff]  ;;  %v273_v2 = vld [vmem:[%s578_s0 + $0x8] sm:$0xff]  ;;  %vm320_vm1 = vcmask 125952  }
   0xd   : > { %270 = vst.msk [vmem:[#allocation2] sm:$0xff] %vm269_vm0, %v510_v0  ;;  %s457_s16 = sshll.u32 %s587_s12, 3  ;;  %s253_s19 = scalar_lea.vmem %s580_s2, %s587_s12  ;;  %v274_v4 = vpack.c.bf16 %v273_v2, %v272_v1 }
   0xe   : > { %271 = vst.msk [vmem:[#allocation2 + $0x8] sm:$0xff] %vm269_vm0, %v510_v0  ;;  %s249_s26 = scalar_lea.vmem %s579_s1, %s457_s16  ;;  %v485_v9 = vld [vmem:[%s253_s19] ss:$0 sm:$0xff]  ;;  %s262_s29 = scalar_lea.vmem %s581_s3, %s457_s16 }
   0xf   : > { %v459_v3 = vld [vmem:[%s249_s26] sm:$0xff] }
  0x10   : > { %296 = vmatpush.bf16.msra.mxu0 %v459_v3 }
  0x13   : > { %454 = vmatmul.msk.bf16.vlgmr.msra.gmra.mxu0 %vm269_vm0, %v274_v4 }
  0x14   : > { %v275_v5 = vld [vmem:[#allocation2] sm:$0xff] }
  0x15   : > { %v276_v8 = vld [vmem:[#allocation2 + $0x8] sm:$0xff] }
  0x90   : > { %v298_v6 = vpop.f32.mrf.mxu0 }
  0x91   : > { %v303_v7 = vadd.f32 %v298_v6, %v275_v5 }
  0x93   : > { %305 = vst.msk [vmem:[#allocation2] sm:$0xff] %vm269_vm0, %v303_v7 }
  0x98   : > { %v300_v10 = vpop.f32.mrf.mxu0 }
  0x99   : > { %v304_v11 = vadd.f32 %v300_v10, %v276_v8 }
  0x9a   : > { %v310_v12 = vld [vmem:[#allocation2] sm:$0xff] }
  0x9b   : > { %v316_v13 = vadd.f32 %v485_v9, %v310_v12  ;;  %306 = vst.msk [vmem:[#allocation2 + $0x8] sm:$0xff] %vm269_vm0, %v304_v11 }
  0x9d   : > { %v318_v14 = vpack.c.bf16 %v316_v13, %v316_v13 }
  0x9f   : > { %321 = vst.msk [vmem:[%s262_s29] sm:$0xf] %vm320_vm1, %v318_v14 }
  0xa2   : > { %v311_v15 = vld [vmem:[#allocation2 + $0x8] sm:$0xff] }
  0xa3   : > { %v317_v16 = vadd.f32 %v485_v9, %v311_v15 }
  0xa5   : > { %v319_v17 = vpack.c.bf16 %v317_v16, %v317_v16 }
  0xa7   : > { %322 = vst.msk [vmem:[%s262_s29 + $0x4] sm:$0xf] %vm320_vm1, %v319_v17 }
  0xa8 PF: > { %s13_s14 = sadd.s32 1, %s508_s14   ;;  %s582_s12 = smov %s504_s13 }
  0xa9   : > { %p10_p5 = scmp.ge.s32.totalorder %s13_s14, 5   ;;  %s583_s13 = smov %s585_s15 }
  0xab   :  { %12 = sbr.rel (!%p10_p5) target bundleno = 2 (0x2), region = 76 }

// kernel: transformer_stt_forward.38
= control target key start
LH: loop header
LB: loop body
LE: loop exit
PB: predicated region body
PF: predicated region fallthrough
CT: control target
= control target key end

     0   :  { %vm78_vm0 = vcmask 130048   ;;  %vm25_vm1 = vcmask 261120   ;;  %v714_v7 = vmov 0.0   ;;  %s950_s3 = inlined_call_operand.vmem [shape: bf16[3,16,32], index: 3, kind: input, shape index: {}]   ;;  %s951_s0 = inlined_call_operand.vmem [shape: bf16[64,16], index: 0, kind: input, shape index: {}]   ;;  %s952_s1 = inlined_call_operand.vmem [shape: bf16[64,16], index: 1, kind: input, shape index: {}]   ;;  %s953_s2 = inlined_call_operand.vmem [shape: bf16[64,16], index: 2, kind: input, shape index: {}]   ;;  %s954_s4 = inlined_call_operand.vmem [shape: f32[1,32], index: 4, kind: input, shape index: {}]   ;;  %s955_s5 = inlined_call_operand.vmem [shape: bf16[64,16], index: 5, kind: output, shape index: {}]  }
   0x1   :  { %v665_v0 = vld [vmem:[%s950_s3] sm:$0xff]  ;;  %v662_v2 = vld [vmem:[%s951_s0 + $0x8] sm:$0xff]  ;;  %v675_v4 = vld [vmem:[%s950_s3 + $0x10] sm:$0xff]  ;;  %26 = vst.msk [vmem:[#allocation2] sm:$0xff] %vm25_vm1, %v714_v7 }
   0x2   :  { %v661_v1 = vld [vmem:[%s951_s0] sm:$0xff]  ;;  %v670_v3 = vld [vmem:[%s950_s3 + $0x8] sm:$0xff]  ;;  %98 = vmatpush.bf16.msra.mxu0 %v665_v0  ;;  %676 = vmatpush.bf16.msra.mxu3 %v665_v0  ;;  %27 = vst.msk [vmem:[#allocation2 + $0x8] sm:$0xff] %vm25_vm1, %v714_v7  ;;  %v663_v8 = vld [vmem:[%s951_s0 + $0x10] sm:$0xff] }
   0x3   :  { %v667_v5 = vld [vmem:[%s952_s1 + $0x8] sm:$0xff]  ;;  %677 = vmatpush.bf16.msra.mxu1 %v670_v3  ;;  %678 = vmatpush.bf16.msra.mxu2 %v675_v4  ;;  %28 = vst.msk [vmem:[#allocation2 + $0x10] sm:$0xff] %vm25_vm1, %v714_v7  ;;  %v666_v9 = vld [vmem:[%s952_s1] sm:$0xff]  ;;  %v668_v10 = vld [vmem:[%s952_s1 + $0x10] sm:$0xff] }
   0x4   :  { %v672_v6 = vld [vmem:[%s953_s2 + $0x8] sm:$0xff]  ;;  %29 = vst.msk [vmem:[#allocation2 + $0x18] sm:$0xff] %vm25_vm1, %v714_v7  ;;  %v673_v11 = vld [vmem:[%s953_s2 + $0x10] sm:$0xff]  ;;  %v664_v12 = vld [vmem:[%s951_s0 + $0x18] sm:$0xff] }
   0x5   :  { %597 = vmatmul.msk.bf16.vlgmr.msra.gmra.mxu0 %vm78_vm0, %v661_v1  ;;  %598 = vmatmul.msk.bf16.vlgmr.msra.gmra.mxu3 %vm78_vm0, %v662_v2  ;;  %30 = vst.msk [vmem:[#allocation2 + $0x20] sm:$0xff] %vm25_vm1, %v714_v7  ;;  %v671_v13 = vld [vmem:[%s953_s2] sm:$0xff]  ;;  %v669_v14 = vld [vmem:[%s952_s1 + $0x18] sm:$0xff] }
   0x6   :  { %201 = vmatpush.bf16.msrb.mxu0 %v670_v3  ;;  %624 = vmatmul.msk.bf16.vlgmr.msra.gmra.mxu1 %vm78_vm0, %v667_v5  ;;  %31 = vst.msk [vmem:[#allocation2 + $0x28] sm:$0xff] %vm25_vm1, %v714_v7  ;;  %v674_v15 = vld [vmem:[%s953_s2 + $0x18] sm:$0xff]  ;;  %v825_v56 = vld [vmem:[%s954_s4] ss:$0 sm:$0xff]  ;;  %s715_s2 = smov 112  }
   0x7   :  { %650 = vmatmul.msk.bf16.vlgmr.msra.gmra.mxu2 %vm78_vm0, %v672_v6  ;;  %32 = vst.msk [vmem:[#allocation2 + $0x30] sm:$0xff] %vm25_vm1, %v714_v7 }
   0x8   :  { %33 = vst.msk [vmem:[#allocation2 + $0x38] sm:$0xff] %vm25_vm1, %v714_v7  ;;  %v42_v16 = vld [vmem:[#allocation2] sm:$0xff] }
   0x9   :  { %v43_v21 = vld [vmem:[#allocation2 + $0x8] sm:$0xff] }
   0xa   :  { %303 = vmatpush.bf16.msra.mxu0 %v675_v4  ;;  %v44_v19 = vld [vmem:[#allocation2 + $0x10] sm:$0xff] }
   0xb   :  { %v45_v26 = vld [vmem:[#allocation2 + $0x18] sm:$0xff] }
   0xc   :  { %v46_v36 = vld [vmem:[#allocation2 + $0x20] sm:$0xff] }
   0xd   :  { %v47_v48 = vld [vmem:[#allocation2 + $0x28] sm:$0xff] }
   0xe   :  { %v48_v61 = vld [vmem:[#allocation2 + $0x30] sm:$0xff] }
  0x15   :  { %599 = vmatmul.msk.bf16.gmra.mxu3 %vm78_vm0, %v663_v8  ;;  %623 = vmatmul.msk.bf16.vlgmr.msrb.gmra.mxu0 %vm78_vm0, %v666_v9 }
  0x16   :  { %625 = vmatmul.msk.bf16.gmra.mxu1 %vm78_vm0, %v668_v10 }
  0x17   :  { %651 = vmatmul.msk.bf16.gmra.mxu2 %vm78_vm0, %v673_v11  ;;  %v49_v11 = vld [vmem:[#allocation2 + $0x38] sm:$0xff] }
  0x25   :  { %600 = vmatmul.msk.bf16.gmra.mxu3 %vm78_vm0, %v664_v12  ;;  %649 = vmatmul.msk.bf16.vlgmr.msra.gmra.mxu0 %vm78_vm0, %v671_v13 }
  0x26   :  { %626 = vmatmul.msk.bf16.gmra.mxu1 %vm78_vm0, %v669_v14 }
  0x27   :  { %652 = vmatmul.msk.bf16.gmra.mxu2 %vm78_vm0, %v674_v15 }
  0x82   :  { %v100_v17 = vpop.f32.mrf.mxu0 }
  0x83   :  { %v120_v18 = vadd.f32 %v100_v17, %v42_v16  ;;  %v208_v22 = vpop.f32.mrf.mxu1 }
  0x85   :  { %129 = vst.msk [vmem:[#allocation2] sm:$0xff] %vm25_vm1, %v120_v18 }
  0x88   :  { %v105_v20 = vpop.f32.mrf.mxu3 }
  0x89   :  { %v122_v23 = vadd.f32 %v105_v20, %v44_v19 }
  0x8a   :  { %v102_v24 = vpop.f32.mrf.mxu0  ;;  %v310_v30 = vpop.f32.mrf.mxu2 }
  0x8b   :  { %131 = vst.msk [vmem:[#allocation2 + $0x10] sm:$0xff] %vm25_vm1, %v122_v23  ;;  %v121_v25 = vadd.f32 %v102_v24, %v43_v21  ;;  %v210_v33 = vpop.f32.mrf.mxu1 }
  0x8c   :  { %v145_v28 = vld [vmem:[#allocation2] sm:$0xff] }
  0x8d   :  { %130 = vst.msk [vmem:[#allocation2 + $0x8] sm:$0xff] %vm25_vm1, %v121_v25 }
  0x90   :  { %v107_v27 = vpop.f32.mrf.mxu3 }
  0x91   :  { %v123_v29 = vadd.f32 %v107_v27, %v45_v26 }
  0x92   :  { %v147_v31 = vld [vmem:[#allocation2 + $0x10] sm:$0xff]  ;;  %v203_v32 = vpop.f32.mrf.mxu0  ;;  %v312_v44 = vpop.f32.mrf.mxu2 }
  0x93   :  { %v225_v34 = vadd.f32 %v208_v22, %v147_v31  ;;  %132 = vst.msk [vmem:[#allocation2 + $0x18] sm:$0xff] %vm25_vm1, %v123_v29  ;;  %v223_v35 = vadd.f32 %v203_v32, %v145_v28  ;;  %v213_v46 = vpop.f32.mrf.mxu1 }
  0x94   :  { %v146_v38 = vld [vmem:[#allocation2 + $0x8] sm:$0xff] }
  0x95   :  { %233 = vst.msk [vmem:[#allocation2 + $0x10] sm:$0xff] %vm25_vm1, %v225_v34 }
  0x96   :  { %231 = vst.msk [vmem:[#allocation2] sm:$0xff] %vm25_vm1, %v223_v35 }
  0x98   :  { %v110_v37 = vpop.f32.mrf.mxu3 }
  0x99   :  { %v124_v39 = vadd.f32 %v110_v37, %v46_v36 }
  0x9a   :  { %v148_v40 = vld [vmem:[#allocation2 + $0x18] sm:$0xff]  ;;  %v205_v41 = vpop.f32.mrf.mxu0  ;;  %v315_v59 = vpop.f32.mrf.mxu2 }
  0x9b   :  { %v226_v42 = vadd.f32 %v210_v33, %v148_v40  ;;  %133 = vst.msk [vmem:[#allocation2 + $0x20] sm:$0xff] %vm25_vm1, %v124_v39  ;;  %v224_v43 = vadd.f32 %v205_v41, %v146_v38  ;;  %v215_v60 = vpop.f32.mrf.mxu1 }
  0x9c   :  { %v249_v45 = vld [vmem:[#allocation2 + $0x10] sm:$0xff] }
  0x9d   :  { %234 = vst.msk [vmem:[#allocation2 + $0x18] sm:$0xff] %vm25_vm1, %v226_v42  ;;  %v327_v47 = vadd.f32 %v310_v30, %v249_v45  ;;  %v247_v50 = vld [vmem:[#allocation2] sm:$0xff] }
  0x9e   :  { %232 = vst.msk [vmem:[#allocation2 + $0x8] sm:$0xff] %vm25_vm1, %v224_v43 }
  0x9f   :  { %335 = vst.msk [vmem:[#allocation2 + $0x10] sm:$0xff] %vm25_vm1, %v327_v47 }
  0xa0   :  { %v112_v49 = vpop.f32.mrf.mxu3 }
  0xa1   :  { %v125_v51 = vadd.f32 %v112_v49, %v47_v48 }
  0xa2   :  { %v149_v52 = vld [vmem:[#allocation2 + $0x20] sm:$0xff]  ;;  %v305_v53 = vpop.f32.mrf.mxu0  ;;  %v317_v14 = vpop.f32.mrf.mxu2 }
  0xa3   :  { %v227_v54 = vadd.f32 %v213_v46, %v149_v52  ;;  %134 = vst.msk [vmem:[#allocation2 + $0x28] sm:$0xff] %vm25_vm1, %v125_v51  ;;  %v325_v55 = vadd.f32 %v305_v53, %v247_v50  ;;  %v218_v16 = vpop.f32.mrf.mxu1 }
  0xa4   :  { %v250_v57 = vld [vmem:[#allocation2 + $0x18] sm:$0xff] }
  0xa5   :  { %235 = vst.msk [vmem:[#allocation2 + $0x20] sm:$0xff] %vm25_vm1, %v227_v54  ;;  %v328_v58 = vadd.f32 %v312_v44, %v250_v57  ;;  %v248_v4 = vld [vmem:[#allocation2 + $0x8] sm:$0xff] }
  0xa6   :  { %333 = vst.msk [vmem:[#allocation2] sm:$0xff] %vm25_vm1, %v325_v55  ;;  %v346_v62 = vld [vmem:[#allocation2 + $0x10] sm:$0xff] }
  0xa7   :  { %336 = vst.msk [vmem:[#allocation2 + $0x18] sm:$0xff] %vm25_vm1, %v328_v58  ;;  %v831_v63 = vadd.f32 %v825_v56, %v346_v62 }
  0xa8   :  { %v115_v0 = vpop.f32.mrf.mxu3 }
  0xa9   :  { %v126_v1 = vadd.f32 %v115_v0, %v48_v61  ;;  %v655_v2 = vmul.f32 -1.442695, %v831_v63 }
  0xaa   :  { %v150_v3 = vld [vmem:[#allocation2 + $0x28] sm:$0xff]  ;;  %v307_v5 = vpop.f32.mrf.mxu0  ;;  %v320_v38 = vpop.f32.mrf.mxu2 }
  0xab   :  { %v228_v6 = vadd.f32 %v215_v60, %v150_v3  ;;  %135 = vst.msk [vmem:[#allocation2 + $0x30] sm:$0xff] %vm25_vm1, %v126_v1  ;;  %v326_v7 = vadd.f32 %v307_v5, %v248_v4  ;;  %682 = vpow2.f32 %v655_v2  ;;  %v220_v37 = vpop.f32.mrf.mxu1 }
  0xac   :  { %v251_v8 = vld [vmem:[#allocation2 + $0x20] sm:$0xff] }
  0xad   :  { %236 = vst.msk [vmem:[#allocation2 + $0x28] sm:$0xff] %vm25_vm1, %v228_v6  ;;  %v329_v9 = vadd.f32 %v315_v59, %v251_v8  ;;  %v344_v10 = vld [vmem:[#allocation2] sm:$0xff] }
  0xae   :  { %334 = vst.msk [vmem:[#allocation2 + $0x8] sm:$0xff] %vm25_vm1, %v326_v7  ;;  %v838_v12 = vadd.f32 %v825_v56, %v344_v10  ;;  %v347_v13 = vld [vmem:[#allocation2 + $0x18] sm:$0xff] }
  0xaf   :  { %337 = vst.msk [vmem:[#allocation2 + $0x20] sm:$0xff] %vm25_vm1, %v329_v9  ;;  %v842_v15 = vadd.f32 %v825_v56, %v347_v13 }
  0xb0   :  { %v117_v17 = vpop.f32.mrf.mxu3  ;;  %v653_v18 = vmul.f32 -1.442695, %v838_v12 }
  0xb1   :  { %v683_v19 = vpop.eup %682  ;;  %v127_v20 = vadd.f32 %v117_v17, %v49_v11  ;;  %v656_v21 = vmul.f32 -1.442695, %v842_v15 }
  0xb2   :  { %v151_v22 = vld [vmem:[#allocation2 + $0x30] sm:$0xff]  ;;  %v390_v23 = vadd.f32 1.0, %v683_v19  ;;  %684 = vpow2.f32 %v653_v18  ;;  %v322_v1 = vpop.f32.mrf.mxu2 }
  0xb3   :  { %v229_v24 = vadd.f32 %v218_v16, %v151_v22  ;;  %136 = vst.msk [vmem:[#allocation2 + $0x38] sm:$0xff] %vm25_vm1, %v127_v20  ;;  %686 = vpow2.f32 %v656_v21 }
  0xb4   :  { %v252_v25 = vld [vmem:[#allocation2 + $0x28] sm:$0xff]  ;;  %688 = vrcp.f32 %v390_v23  ;;  %v437_v46 = vand.u32 2147483648, %v390_v23  ;;  %v435_v49 = vand.u32 2147483647, %v390_v23  ;;  %vm431_vm3 = vweird.f32 %v390_v23 }
  0xb5   :  { %237 = vst.msk [vmem:[#allocation2 + $0x30] sm:$0xff] %vm25_vm1, %v229_v24  ;;  %v330_v26 = vadd.f32 %v317_v14, %v252_v25  ;;  %v345_v27 = vld [vmem:[#allocation2 + $0x8] sm:$0xff] }
  0xb6   :  { %v849_v28 = vadd.f32 %v825_v56, %v345_v27  ;;  %v348_v29 = vld [vmem:[#allocation2 + $0x20] sm:$0xff]  ;;  %v438_v57 = vor.u32 1.1754944e-38, %v437_v46  ;;  %vm436_vm5 = vcmp.eq.f32.partialorder %v435_v49, 8.507059e+37 }
  0xb7   :  { %338 = vst.msk [vmem:[#allocation2 + $0x28] sm:$0xff] %vm25_vm1, %v330_v26  ;;  %v853_v30 = vadd.f32 %v825_v56, %v348_v29 }
  0xb8   :  { %v685_v31 = vpop.eup %684  ;;  %v654_v32 = vmul.f32 -1.442695, %v849_v28 }
  0xb9   :  { %v687_v33 = vpop.eup %686  ;;  %v856_v34 = vadd.f32 1.0, %v685_v31  ;;  %v657_v40 = vmul.f32 -1.442695, %v853_v30 }
  0xba   :  { %v689_v35 = vpop.eup %688  ;;  %v152_v36 = vld [vmem:[#allocation2 + $0x38] sm:$0xff]  ;;  %v858_v39 = vadd.f32 1.0, %v687_v33  ;;  %690 = vpow2.f32 %v654_v32 }
  0xbb   :  { %v230_v41 = vadd.f32 %v220_v37, %v152_v36  ;;  %v427_v42 = vmul.f32 %v689_v35, %v390_v23  ;;  %692 = vrcp.f32 %v856_v34  ;;  %vm432_vm2 = vweird.f32 %v689_v35 }
  0xbc   :  { %v253_v43 = vld [vmem:[#allocation2 + $0x30] sm:$0xff]  ;;  %694 = vrcp.f32 %v858_v39  ;;  %vm433_vm4 = vmor %vm431_vm3, %vm432_vm2  ;;  %vm401_vm6 = vweird.f32 %v856_v34  ;;  %v405_v4 = vand.u32 2147483647, %v856_v34  ;;  %v407_v6 = vand.u32 2147483648, %v856_v34 }
  0xbd   :  { %238 = vst.msk [vmem:[#allocation2 + $0x38] sm:$0xff] %vm25_vm1, %v230_v41  ;;  %v331_v44 = vadd.f32 %v320_v38, %v253_v43  ;;  %v428_v45 = vsub.f32 1.0, %v427_v42  ;;  %696 = vpow2.f32 %v657_v40  ;;  %v452_v10 = vand.u32 2147483648, %v858_v39 }
  0xbe   :  { %v349_v47 = vld [vmem:[#allocation2 + $0x28] sm:$0xff]  ;;  %v450_v14 = vand.u32 2147483647, %v858_v39  ;;  %v408_v19 = vor.u32 1.1754944e-38, %v407_v6  ;;  %vm446_vm10 = vweird.f32 %v858_v39  ;;  %vm406_vm11 = vcmp.eq.f32.partialorder %v405_v4, 8.507059e+37 }
  0xbf   :  { %339 = vst.msk [vmem:[#allocation2 + $0x30] sm:$0xff] %vm25_vm1, %v331_v44  ;;  %v429_v48 = vmul.f32 %v689_v35, %v428_v45  ;;  %v866_v50 = vadd.f32 %v825_v56, %v349_v47  ;;  %v453_v22 = vor.u32 1.1754944e-38, %v452_v10 }
  0xc0   :  { %v691_v51 = vpop.eup %690  ;;  %vm451_vm13 = vcmp.eq.f32.partialorder %v450_v14, 8.507059e+37 }
  0xc1   :  { %v693_v52 = vpop.eup %692  ;;  %v430_v53 = vadd.f32 %v689_v35, %v429_v48  ;;  %v868_v54 = vadd.f32 1.0, %v691_v51  ;;  %v658_v59 = vmul.f32 -1.442695, %v866_v50 }
  0xc2   :  { %v695_v55 = vpop.eup %694  ;;  %v397_v58 = vmul.f32 %v693_v52, %v856_v34  ;;  %vm402_vm7 = vweird.f32 %v693_v52 }
  0xc3   :  { %v434_v60 = vsel %vm433_vm4, %v689_v35, %v430_v53  ;;  %v442_v61 = vmul.f32 %v695_v55, %v858_v39  ;;  %698 = vrcp.f32 %v868_v54  ;;  %v697_v62 = vpop.eup %696  ;;  %vm447_vm8 = vweird.f32 %v695_v55  ;;  %vm403_vm9 = vmor %vm401_vm6, %vm402_vm7 }
  0xc4   :  { %v254_v0 = vld [vmem:[#allocation2 + $0x38] sm:$0xff]  ;;  %v439_v2 = vsel %vm436_vm5, %v438_v57, %v434_v60  ;;  %v398_v3 = vsub.f32 1.0, %v397_v58  ;;  %v878_v8 = vadd.f32 1.0, %v697_v62  ;;  %700 = vpow2.f32 %v658_v59  ;;  %vm448_vm12 = vmor %vm446_vm10, %vm447_vm8 }
  0xc5   :  { %v332_v5 = vadd.f32 %v322_v1, %v254_v0  ;;  %528 = vrot.lane.b32.xlu1 %v439_v2, %s715_s2  ;;  %v443_v7 = vsub.f32 1.0, %v442_v61  ;;  %v420_v33 = vand.u32 2147483647, %v868_v54  ;;  %v422_v34 = vand.u32 2147483648, %v868_v54 }
  0xc6   :  { %v399_v9 = vmul.f32 %v693_v52, %v398_v3  ;;  %v350_v11 = vld [vmem:[#allocation2 + $0x30] sm:$0xff]  ;;  %702 = vrcp.f32 %v878_v8  ;;  %vm416_vm15 = vweird.f32 %v868_v54  ;;  %v465_v43 = vand.u32 2147483647, %v878_v8 }
  0xc7   :  { %340 = vst.msk [vmem:[#allocation2 + $0x38] sm:$0xff] %vm25_vm1, %v332_v5  ;;  %v444_v13 = vmul.f32 %v695_v55, %v443_v7  ;;  %v885_v17 = vadd.f32 %v825_v56, %v350_v11  ;;  %vm421_vm1 = vcmp.eq.f32.partialorder %v420_v33, 8.507059e+37  ;;  %v423_v42 = vor.u32 1.1754944e-38, %v422_v34 }
  0xc8   :  { %v400_v16 = vadd.f32 %v693_v52, %v399_v9  ;;  %v467_v44 = vand.u32 2147483648, %v878_v8  ;;  %vm461_vm3 = vweird.f32 %v878_v8  ;;  %vm466_vm5 = vcmp.eq.f32.partialorder %v465_v43, 8.507059e+37 }
  0xc9   :  { %v699_v18 = vpop.eup %698  ;;  %v445_v20 = vadd.f32 %v695_v55, %v444_v13  ;;  %v659_v26 = vmul.f32 -1.442695, %v885_v17 }
  0xca   :  { %v404_v21 = vsel %vm403_vm9, %v693_v52, %v400_v16  ;;  %v412_v23 = vmul.f32 %v699_v18, %v868_v54  ;;  %v701_v27 = vpop.eup %700  ;;  %vm417_vm14 = vweird.f32 %v699_v18  ;;  %v468_v53 = vor.u32 1.1754944e-38, %v467_v44 }
  0xcb   :  { %v409_v24 = vsel %vm406_vm11, %v408_v19, %v404_v21  ;;  %v449_v25 = vsel %vm448_vm12, %v695_v55, %v445_v20  ;;  %v393_v35 = vadd.f32 1.0, %v701_v27  ;;  %704 = vpow2.f32 %v659_v26  ;;  %vm418_vm0 = vmor %vm416_vm15, %vm417_vm14 }
  0xcc   :  { %524 = vrot.lane.b32.xlu0 %v409_v24, %s715_s2  ;;  %v454_v29 = vsel %vm451_vm13, %v453_v22, %v449_v25  ;;  %v413_v31 = vsub.f32 1.0, %v412_v23  ;;  %v703_v32 = vpop.eup %702 }
  0xcd   :  { %530 = vrot.lane.b32.xlu1 %v454_v29, %s715_s2  ;;  %v457_v37 = vmul.f32 %v703_v32, %v878_v8  ;;  %706 = vrcp.f32 %v393_v35  ;;  %vm462_vm2 = vweird.f32 %v703_v32  ;;  %v482_v59 = vand.u32 2147483648, %v393_v35 }
  0xce   :  { %v414_v36 = vmul.f32 %v699_v18, %v413_v31  ;;  %v351_v38 = vld [vmem:[#allocation2 + $0x38] sm:$0xff]  ;;  %vm463_vm4 = vmor %vm461_vm3, %vm462_vm2  ;;  %v480_v62 = vand.u32 2147483647, %v393_v35  ;;  %vm476_vm7 = vweird.f32 %v393_v35  ;;  %vm564_vm2 = vcmask 125952  }
  0xcf   :  { %v458_v40 = vsub.f32 1.0, %v457_v37  ;;  %v899_v41 = vadd.f32 %v825_v56, %v351_v38  ;;  %v483_v3 = vor.u32 1.1754944e-38, %v482_v59 }
  0xd0   :  { %v415_v39 = vadd.f32 %v699_v18, %v414_v36  ;;  %vm481_vm9 = vcmp.eq.f32.partialorder %v480_v62, 8.507059e+37 }
  0xd1   :  { %v459_v46 = vmul.f32 %v703_v32, %v458_v40  ;;  %v660_v47 = vmul.f32 -1.442695, %v899_v41  ;;  %v705_v48 = vpop.eup %704 }
  0xd2   :  { %v419_v45 = vsel %vm418_vm0, %v699_v18, %v415_v39  ;;  %v394_v56 = vadd.f32 1.0, %v705_v48 }
  0xd3   :  { %v424_v49 = vsel %vm421_vm1, %v423_v42, %v419_v45  ;;  %v460_v51 = vadd.f32 %v703_v32, %v459_v46  ;;  %708 = vpow2.f32 %v660_v47  ;;  %v707_v52 = vpop.eup %706 }
  0xd4   :  { %526 = vrot.lane.b32.xlu0 %v424_v49, %s715_s2  ;;  %v472_v55 = vmul.f32 %v707_v52, %v393_v35  ;;  %710 = vrcp.f32 %v394_v56  ;;  %vm477_vm6 = vweird.f32 %v707_v52  ;;  %v497_v8 = vand.u32 2147483648, %v394_v56 }
  0xd5   :  { %v464_v54 = vsel %vm463_vm4, %v703_v32, %v460_v51  ;;  %vm478_vm8 = vmor %vm476_vm7, %vm477_vm6  ;;  %v495_v10 = vand.u32 2147483647, %v394_v56  ;;  %vm491_vm11 = vweird.f32 %v394_v56 }
  0xd6   :  { %v469_v57 = vsel %vm466_vm5, %v468_v53, %v464_v54  ;;  %v473_v58 = vsub.f32 1.0, %v472_v55  ;;  %v498_v14 = vor.u32 1.1754944e-38, %v497_v8 }
  0xd7   :  { %532 = vrot.lane.b32.xlu2 %v469_v57, %s715_s2  ;;  %vm496_vm13 = vcmp.eq.f32.partialorder %v495_v10, 8.507059e+37 }
  0xd8   :  { %v474_v61 = vmul.f32 %v707_v52, %v473_v58 }
  0xd9   :  { %v709_v60 = vpop.eup %708 }
  0xda   :  { %v395_v0 = vadd.f32 1.0, %v709_v60  ;;  %v711_v1 = vpop.eup %710  ;;  %v475_v2 = vadd.f32 %v707_v52, %v474_v61 }
  0xdb   :  { %v487_v4 = vmul.f32 %v711_v1, %v394_v56  ;;  %vm492_vm10 = vweird.f32 %v711_v1 }
  0xdc   :  { %712 = vrcp.f32 %v395_v0  ;;  %v479_v5 = vsel %vm478_vm8, %v707_v52, %v475_v2  ;;  %vm493_vm12 = vmor %vm491_vm11, %vm492_vm10  ;;  %v512_v21 = vand.u32 2147483648, %v395_v0  ;;  %v510_v23 = vand.u32 2147483647, %v395_v0 }
  0xdd   :  { %v484_v6 = vsel %vm481_vm9, %v483_v3, %v479_v5  ;;  %v488_v7 = vsub.f32 1.0, %v487_v4  ;;  %vm506_vm15 = vweird.f32 %v395_v0 }
  0xde   :  { %v513_v25 = vor.u32 1.1754944e-38, %v512_v21  ;;  %vm511_vm1 = vcmp.eq.f32.partialorder %v510_v23, 8.507059e+37 }
  0xdf   :  { %534 = vrot.lane.b32.xlu2 %v484_v6, %s715_s2  ;;  %v489_v9 = vmul.f32 %v711_v1, %v488_v7 }
  0xe1   :  { %v490_v13 = vadd.f32 %v711_v1, %v489_v9 }
  0xe2   :  { %v713_v11 = vpop.eup %712 }
  0xe3   :  { %v502_v16 = vmul.f32 %v713_v11, %v395_v0  ;;  %v494_v18 = vsel %vm493_vm12, %v711_v1, %v490_v13  ;;  %vm507_vm14 = vweird.f32 %v713_v11 }
  0xe4   :  { %v499_v19 = vsel %vm496_vm13, %v498_v14, %v494_v18  ;;  %vm508_vm0 = vmor %vm506_vm15, %vm507_vm14 }
  0xe5   :  { %v503_v20 = vsub.f32 1.0, %v502_v16  ;;  %536 = vrot.lane.b32.xlu0 %v499_v19, %s715_s2 }
  0xe7   :  { %v504_v22 = vmul.f32 %v713_v11, %v503_v20 }
  0xe9   :  { %v505_v24 = vadd.f32 %v713_v11, %v504_v22 }
  0xeb   :  { %v509_v26 = vsel %vm508_vm0, %v713_v11, %v505_v24 }
  0xec   :  { %v514_v27 = vsel %vm511_vm1, %v513_v25, %v509_v26 }
  0xed   :  { %538 = vrot.lane.b32.xlu1 %v514_v27, %s715_s2 }
 0x131   :  { %v533_v29 = vpop.permute.xlu2 %532 }
 0x132   :  { %v552_v31 = vmul.f32 %v533_v29, %v853_v30 }
 0x134   :  { %v560_v32 = vpack.c.bf16 %v552_v31, %v552_v31 }
 0x136   :  { %569 = vst.msk [vmem:[%s955_s5 + $0x10] sm:$0xf] %vm564_vm2, %v560_v32 }
 0x137   :  { %v529_v33 = vpop.permute.xlu1 %528 }
 0x138   :  { %v550_v34 = vmul.f32 %v529_v33, %v831_v63 }
 0x139   :  { %v535_v36 = vpop.permute.xlu2 %534 }
 0x13a   :  { %v558_v35 = vpack.c.bf16 %v550_v34, %v550_v34  ;;  %v553_v37 = vmul.f32 %v535_v36, %v866_v50 }
 0x13c   :  { %567 = vst.msk [vmem:[%s955_s5 + $0x8] sm:$0xf] %vm564_vm2, %v558_v35  ;;  %v561_v30 = vpack.c.bf16 %v553_v37, %v553_v37 }
 0x13e   :  { %v525_v38 = vpop.permute.xlu0 %524  ;;  %570 = vst.msk [vmem:[%s955_s5 + $0x14] sm:$0xf] %vm564_vm2, %v561_v30 }
 0x13f   :  { %v548_v39 = vmul.f32 %v525_v38, %v838_v12  ;;  %v531_v40 = vpop.permute.xlu1 %530 }
 0x140   :  { %v551_v63 = vmul.f32 %v531_v40, %v842_v15 }
 0x141   :  { %v556_v42 = vpack.c.bf16 %v548_v39, %v548_v39 }
 0x142   :  { %v559_v43 = vpack.c.bf16 %v551_v63, %v551_v63 }
 0x143   :  { %565 = vst.msk [vmem:[%s955_s5] sm:$0xf] %vm564_vm2, %v556_v42 }
 0x144   :  { %568 = vst.msk [vmem:[%s955_s5 + $0xc] sm:$0xf] %vm564_vm2, %v559_v43 }
 0x146   :  { %v527_v50 = vpop.permute.xlu0 %526 }
 0x147   :  { %v549_v44 = vmul.f32 %v527_v50, %v849_v28 }
 0x149   :  { %v557_v45 = vpack.c.bf16 %v549_v44, %v549_v44 }
 0x14b   :  { %566 = vst.msk [vmem:[%s955_s5 + $0x4] sm:$0xf] %vm564_vm2, %v557_v45 }
 0x157   :  { %v537_v12 = vpop.permute.xlu0 %536 }
 0x158   :  { %v554_v15 = vmul.f32 %v537_v12, %v885_v17 }
 0x15a   :  { %v562_v46 = vpack.c.bf16 %v554_v15, %v554_v15 }
 0x15c   :  { %571 = vst.msk [vmem:[%s955_s5 + $0x18] sm:$0xf] %vm564_vm2, %v562_v46 }
 0x15f   :  { %v539_v47 = vpop.permute.xlu1 %538 }
 0x160   :  { %v555_v48 = vmul.f32 %v539_v47, %v899_v41 }
 0x162   :  { %v563_v49 = vpack.c.bf16 %v555_v48, %v555_v48 }
 0x164   :  { %572 = vst.msk [vmem:[%s955_s5 + $0x1c] sm:$0xf] %vm564_vm2, %v563_v49 }

// kernel: transformer_stt_forward.42
= control target key start
LH: loop header
LB: loop body
LE: loop exit
PB: predicated region body
PF: predicated region fallthrough
CT: control target
= control target key end

     0   :  { %vm25_vm0 = vcmask 261120   ;;  %v261_v2 = vmov 0.0   ;;  %vm45_vm1 = vcmask 130048   ;;  %s333_s3 = inlined_call_operand.vmem [shape: bf16[3,16,32], index: 3, kind: input, shape index: {}]   ;;  %s334_s0 = inlined_call_operand.vmem [shape: bf16[16,16], index: 0, kind: input, shape index: {}]   ;;  %s335_s1 = inlined_call_operand.vmem [shape: bf16[16,16], index: 1, kind: input, shape index: {}]   ;;  %s336_s2 = inlined_call_operand.vmem [shape: bf16[16,16], index: 2, kind: input, shape index: {}]   ;;  %s337_s4 = inlined_call_operand.vmem [shape: f32[1,32], index: 4, kind: input, shape index: {}]   ;;  %s338_s5 = inlined_call_operand.vmem [shape: f32[16,16], index: 5, kind: output, shape index: {}]  }
   0x1   :  { %v245_v0 = vld [vmem:[%s333_s3] sm:$0xff]  ;;  %v247_v1 = vld [vmem:[%s333_s3 + $0x8] sm:$0xff]  ;;  %26 = vst.msk [vmem:[#allocation2] sm:$0xff] %vm25_vm0, %v261_v2  ;;  %v249_v5 = vld [vmem:[%s333_s3 + $0x10] sm:$0xff] }
   0x2   :  { %v244_v3 = vld [vmem:[%s334_s0] sm:$0xff]  ;;  %27 = vst.msk [vmem:[#allocation2 + $0x8] sm:$0xff] %vm25_vm0, %v261_v2  ;;  %56 = vmatpush.bf16.msra.mxu0 %v245_v0  ;;  %96 = vmatpush.bf16.msra.mxu1 %v247_v1 }
   0x3   :  { %v246_v4 = vld [vmem:[%s335_s1] sm:$0xff]  ;;  %135 = vmatpush.bf16.msra.mxu2 %v249_v5 }
   0x4   :  { %v248_v6 = vld [vmem:[%s336_s2] sm:$0xff]  ;;  %s262_s2 = smov 112  }
   0x5   :  { %219 = vmatmul.msk.bf16.vlgmr.msra.gmra.mxu0 %vm45_vm1, %v244_v3  ;;  %230 = vmatmul.msk.bf16.vlgmr.msra.gmra.mxu1 %vm45_vm1, %v246_v4  ;;  %v252_v22 = vld [vmem:[%s337_s4] ss:$0 sm:$0xff] }
   0x6   :  { %241 = vmatmul.msk.bf16.vlgmr.msra.gmra.mxu2 %vm45_vm1, %v248_v6 }
   0x8   :  { %v30_v7 = vld [vmem:[#allocation2] sm:$0xff] }
   0x9   :  { %v31_v10 = vld [vmem:[#allocation2 + $0x8] sm:$0xff] }
  0x82   :  { %v58_v8 = vpop.f32.mrf.mxu0  ;;  %v98_v11 = vpop.f32.mrf.mxu1 }
  0x83   :  { %v63_v9 = vadd.f32 %v58_v8, %v30_v7 }
  0x85   :  { %66 = vst.msk [vmem:[#allocation2] sm:$0xff] %vm25_vm0, %v63_v9 }
  0x89   :  { %v137_v18 = vpop.f32.mrf.mxu2 }
  0x8a   :  { %v60_v12 = vpop.f32.mrf.mxu0  ;;  %v100_v17 = vpop.f32.mrf.mxu1 }
  0x8b   :  { %v64_v13 = vadd.f32 %v60_v12, %v31_v10 }
  0x8c   :  { %v70_v14 = vld [vmem:[#allocation2] sm:$0xff] }
  0x8d   :  { %v103_v15 = vadd.f32 %v98_v11, %v70_v14  ;;  %67 = vst.msk [vmem:[#allocation2 + $0x8] sm:$0xff] %vm25_vm0, %v64_v13 }
  0x8f   :  { %105 = vst.msk [vmem:[#allocation2] sm:$0xff] %vm25_vm0, %v103_v15 }
  0x91   :  { %v139_v24 = vpop.f32.mrf.mxu2 }
  0x94   :  { %v71_v16 = vld [vmem:[#allocation2 + $0x8] sm:$0xff] }
  0x95   :  { %v104_v19 = vadd.f32 %v100_v17, %v71_v16 }
  0x96   :  { %v109_v20 = vld [vmem:[#allocation2] sm:$0xff] }
  0x97   :  { %106 = vst.msk [vmem:[#allocation2 + $0x8] sm:$0xff] %vm25_vm0, %v104_v19  ;;  %v142_v21 = vadd.f32 %v137_v18, %v109_v20 }
  0x99   :  { %144 = vst.msk [vmem:[#allocation2] sm:$0xff] %vm25_vm0, %v142_v21 }
  0x9e   :  { %v110_v23 = vld [vmem:[#allocation2 + $0x8] sm:$0xff] }
  0x9f   :  { %v143_v25 = vadd.f32 %v139_v24, %v110_v23 }
  0xa0   :  { %v149_v26 = vld [vmem:[#allocation2] sm:$0xff] }
  0xa1   :  { %145 = vst.msk [vmem:[#allocation2 + $0x8] sm:$0xff] %vm25_vm0, %v143_v25  ;;  %v155_v27 = vadd.f32 %v252_v22, %v149_v26 }
  0xa3   :  { %v242_v28 = vmul.f32 -1.442695, %v155_v27 }
  0xa5   :  { %253 = vpow2.f32 %v242_v28 }
  0xa8   :  { %v150_v29 = vld [vmem:[#allocation2 + $0x8] sm:$0xff] }
  0xa9   :  { %v156_v30 = vadd.f32 %v252_v22, %v150_v29 }
  0xab   :  { %v254_v31 = vpop.eup %253  ;;  %v243_v32 = vmul.f32 -1.442695, %v156_v30 }
  0xac   :  { %v163_v33 = vadd.f32 1.0, %v254_v31 }
  0xad   :  { %255 = vpow2.f32 %v243_v32 }
  0xae   :  { %257 = vrcp.f32 %v163_v33  ;;  %v176_v39 = vand.u32 2147483648, %v163_v33  ;;  %v174_v41 = vand.u32 2147483647, %v163_v33  ;;  %vm170_vm3 = vweird.f32 %v163_v33 }
  0xb0   :  { %v177_v44 = vor.u32 1.1754944e-38, %v176_v39  ;;  %vm175_vm5 = vcmp.eq.f32.partialorder %v174_v41, 8.507059e+37 }
  0xb3   :  { %v256_v34 = vpop.eup %255 }
  0xb4   :  { %v258_v35 = vpop.eup %257  ;;  %v164_v36 = vadd.f32 1.0, %v256_v34 }
  0xb5   :  { %v166_v37 = vmul.f32 %v258_v35, %v163_v33  ;;  %vm171_vm2 = vweird.f32 %v258_v35 }
  0xb6   :  { %259 = vrcp.f32 %v164_v36  ;;  %vm172_vm4 = vmor %vm170_vm3, %vm171_vm2  ;;  %v191_v49 = vand.u32 2147483648, %v164_v36  ;;  %v189_v51 = vand.u32 2147483647, %v164_v36  ;;  %vm185_vm7 = vweird.f32 %v164_v36 }
  0xb7   :  { %v167_v38 = vsub.f32 1.0, %v166_v37 }
  0xb8   :  { %v192_v53 = vor.u32 1.1754944e-38, %v191_v49  ;;  %vm190_vm9 = vcmp.eq.f32.partialorder %v189_v51, 8.507059e+37 }
  0xb9   :  { %v168_v40 = vmul.f32 %v258_v35, %v167_v38 }
  0xbb   :  { %v169_v42 = vadd.f32 %v258_v35, %v168_v40 }
  0xbc   :  { %v260_v43 = vpop.eup %259 }
  0xbd   :  { %v173_v45 = vsel %vm172_vm4, %v258_v35, %v169_v42  ;;  %v181_v46 = vmul.f32 %v260_v43, %v164_v36  ;;  %vm186_vm6 = vweird.f32 %v260_v43 }
  0xbe   :  { %v178_v47 = vsel %vm175_vm5, %v177_v44, %v173_v45  ;;  %vm187_vm8 = vmor %vm185_vm7, %vm186_vm6 }
  0xbf   :  { %197 = vrot.lane.b32.xlu0 %v178_v47, %s262_s2  ;;  %v182_v48 = vsub.f32 1.0, %v181_v46 }
  0xc1   :  { %v183_v50 = vmul.f32 %v260_v43, %v182_v48 }
  0xc3   :  { %v184_v52 = vadd.f32 %v260_v43, %v183_v50 }
  0xc5   :  { %v188_v54 = vsel %vm187_vm8, %v260_v43, %v184_v52 }
  0xc6   :  { %v193_v55 = vsel %vm190_vm9, %v192_v53, %v188_v54 }
  0xc7   :  { %199 = vrot.lane.b32.xlu0 %v193_v55, %s262_s2 }
 0x131   :  { %v198_v56 = vpop.permute.xlu0 %197 }
 0x132   :  { %v203_v57 = vmul.f32 %v198_v56, %v155_v27 }
 0x134   :  { %205 = vst.msk [vmem:[%s338_s5] sm:$0xff] %vm45_vm1, %v203_v57 }
 0x139   :  { %v200_v58 = vpop.permute.xlu0 %199 }
 0x13a   :  { %v204_v59 = vmul.f32 %v200_v58, %v156_v30 }
 0x13c   :  { %206 = vst.msk [vmem:[%s338_s5 + $0x8] sm:$0xff] %vm45_vm1, %v204_v59 }

// kernel: transformer_stt_forward.45
= control target key start
LH: loop header
LB: loop body
LE: loop exit
PB: predicated region body
PF: predicated region fallthrough
CT: control target
= control target key end

     0   :  { %vm28_vm0 = vcmask 130048   ;;  %v176_v1 = vmov 0.0   ;;  %v177_v20 = vmov 16.0   ;;  %s251_s1 = inlined_call_operand.vmem [shape: bf16[16,16], index: 1, kind: input, shape index: {}]   ;;  %s252_s0 = inlined_call_operand.vmem [shape: bf16[16,16], index: 0, kind: input, shape index: {}]   ;;  %s253_s2 = inlined_call_operand.vmem [shape: f32[1,16], index: 2, kind: input, shape index: {}]   ;;  %s254_s3 = inlined_call_operand.vmem [shape: f32[16,16], index: 3, kind: input, shape index: {}]   ;;  %s255_s4 = inlined_call_operand.vmem [shape: f32[1,16], index: 4, kind: input, shape index: {}]   ;;  %s256_s5 = inlined_call_operand.vmem [shape: f32[1,16], index: 5, kind: input, shape index: {}]   ;;  %s257_s6 = inlined_call_operand.vmem [shape: f32[16,16], index: 6, kind: output, shape index: {}]  }
   0x1   :  { %v164_v0 = vld [vmem:[%s251_s1] sm:$0xff]  ;;  %29 = vst.msk [vmem:[#allocation2] sm:$0xff] %vm28_vm0, %v176_v1  ;;  %v82_v16 = vld [vmem:[%s254_s3 + $0x8] sm:$0xff]  ;;  %170 = vrcp.f32 %v177_v20 }
   0x2   :  { %v163_v2 = vld [vmem:[%s252_s0] sm:$0xff]  ;;  %30 = vst.msk [vmem:[#allocation2 + $0x8] sm:$0xff] %vm28_vm0, %v176_v1  ;;  %59 = vmatpush.bf16.msra.mxu0 %v164_v0 }
   0x3   :  { %v167_v7 = vld [vmem:[%s253_s2] ss:$0 sm:$0xff] }
   0x4   :  { %v81_v11 = vld [vmem:[%s254_s3] sm:$0xff] }
   0x5   :  { %162 = vmatmul.msk.bf16.vlgmr.msra.gmra.mxu0 %vm28_vm0, %v163_v2  ;;  %v168_v51 = vld [vmem:[%s255_s4] ss:$0 sm:$0xff] }
   0x6   :  { %v169_v54 = vld [vmem:[%s256_s5] ss:$0 sm:$0xff] }
   0x7   :  { %v171_v21 = vpop.eup %170 }
   0x8   :  { %v33_v3 = vld [vmem:[#allocation2] sm:$0xff]  ;;  %v94_v22 = vmul.f32 16.0, %v171_v21  ;;  %vm98_vm1 = vweird.f32 %v171_v21 }
   0x9   :  { %v34_v6 = vld [vmem:[#allocation2 + $0x8] sm:$0xff] }
   0xa   :  { %v95_v23 = vsub.f32 1.0, %v94_v22 }
   0xc   :  { %v96_v24 = vmul.f32 %v171_v21, %v95_v23 }
   0xe   :  { %v97_v25 = vadd.f32 %v171_v21, %v96_v24 }
  0x10   :  { %v99_v26 = vsel %vm98_vm1, %v171_v21, %v97_v25 }
  0x82   :  { %v61_v4 = vpop.f32.mrf.mxu0 }
  0x83   :  { %v66_v5 = vadd.f32 %v61_v4, %v33_v3 }
  0x85   :  { %68 = vst.msk [vmem:[#allocation2] sm:$0xff] %vm28_vm0, %v66_v5 }
  0x8a   :  { %v63_v8 = vpop.f32.mrf.mxu0 }
  0x8b   :  { %v67_v9 = vadd.f32 %v63_v8, %v34_v6 }
  0x8c   :  { %v73_v10 = vld [vmem:[#allocation2] sm:$0xff] }
  0x8d   :  { %69 = vst.msk [vmem:[#allocation2 + $0x8] sm:$0xff] %vm28_vm0, %v67_v9  ;;  %v79_v12 = vadd.f32 %v167_v7, %v73_v10 }
  0x8f   :  { %v83_v13 = vadd.f32 %v81_v11, %v79_v12 }
  0x91   :  { %v87_v14 = vsel %vm28_vm0, %v83_v13, 0.0 }
  0x92   :  { %88 = vadd.xlane.f32.xlu0 %v87_v14 }
  0x94   :  { %v74_v15 = vld [vmem:[#allocation2 + $0x8] sm:$0xff] }
  0x95   :  { %v80_v17 = vadd.f32 %v167_v7, %v74_v15 }
  0x97   :  { %v84_v18 = vadd.f32 %v82_v16, %v80_v17 }
  0x99   :  { %v90_v19 = vsel %vm28_vm0, %v84_v18, 0.0 }
  0x9a   :  { %91 = vadd.xlane.f32.xlu0 %v90_v19 }
 0x105   :  { %v89_v27 = vpop.xlane.xlu0 %88 }
 0x106   :  { %v100_v28 = vmul.f32 %v99_v26, %v89_v27 }
 0x108   :  { %v102_v29 = vsub.f32 %v83_v13, %v100_v28 }
 0x10a   :  { %v104_v30 = vmul.f32 %v102_v29, %v102_v29 }
 0x10c   :  { %v106_v31 = vsel %vm28_vm0, %v104_v30, 0.0 }
 0x10d   :  { %107 = vadd.xlane.f32.xlu1 %v106_v31  ;;  %v92_v32 = vpop.xlane.xlu0 %91 }
 0x10e   :  { %v101_v33 = vmul.f32 %v99_v26, %v92_v32 }
 0x110   :  { %v103_v34 = vsub.f32 %v84_v18, %v101_v33 }
 0x112   :  { %v105_v35 = vmul.f32 %v103_v34, %v103_v34 }
 0x114   :  { %v109_v36 = vsel %vm28_vm0, %v105_v35, 0.0 }
 0x115   :  { %110 = vadd.xlane.f32.xlu1 %v109_v36 }
 0x180   :  { %v108_v37 = vpop.xlane.xlu1 %107 }
 0x181   :  { %v112_v38 = vmul.f32 %v108_v37, %v99_v26 }
 0x183   :  { %v114_v39 = vadd.f32 1e-05, %v112_v38 }
 0x185   :  { %172 = vrsqrt.f32 %v114_v39  ;;  %vm122_vm3 = vweird.f32 %v114_v39 }
 0x188   :  { %v111_v40 = vpop.xlane.xlu1 %110 }
 0x189   :  { %v113_v41 = vmul.f32 %v111_v40, %v99_v26 }
 0x18b   :  { %v173_v42 = vpop.eup %172  ;;  %v115_v43 = vadd.f32 1e-05, %v113_v41 }
 0x18c   :  { %v117_v44 = vmul.f32 %v173_v42, %v114_v39  ;;  %vm123_vm2 = vweird.f32 %v173_v42 }
 0x18d   :  { %174 = vrsqrt.f32 %v115_v43  ;;  %vm124_vm4 = vmor %vm122_vm3, %vm123_vm2  ;;  %vm132_vm6 = vweird.f32 %v115_v43 }
 0x18e   :  { %v118_v45 = vmul.f32 %v173_v42, %v117_v44 }
 0x190   :  { %v119_v46 = vmul.f32 0.5, %v118_v45 }
 0x192   :  { %v120_v47 = vsub.f32 1.5, %v119_v46 }
 0x193   :  { %v175_v48 = vpop.eup %174 }
 0x194   :  { %v121_v49 = vmul.f32 %v173_v42, %v120_v47  ;;  %v127_v50 = vmul.f32 %v175_v48, %v115_v43  ;;  %vm133_vm5 = vweird.f32 %v175_v48 }
 0x195   :  { %vm134_vm7 = vmor %vm132_vm6, %vm133_vm5 }
 0x196   :  { %v125_v52 = vsel %vm124_vm4, %v173_v42, %v121_v49  ;;  %v128_v53 = vmul.f32 %v175_v48, %v127_v50 }
 0x197   :  { %v136_v55 = vmul.f32 %v125_v52, %v102_v29 }
 0x198   :  { %v129_v56 = vmul.f32 0.5, %v128_v53 }
 0x199   :  { %v141_v57 = vmul.f32 %v168_v51, %v136_v55 }
 0x19a   :  { %v130_v58 = vsub.f32 1.5, %v129_v56 }
 0x19b   :  { %v146_v59 = vadd.f32 %v169_v54, %v141_v57 }
 0x19c   :  { %v131_v60 = vmul.f32 %v175_v48, %v130_v58 }
 0x19d   :  { %148 = vst.msk [vmem:[%s257_s6] sm:$0xff] %vm28_vm0, %v146_v59 }
 0x19e   :  { %v135_v61 = vsel %vm134_vm7, %v175_v48, %v131_v60 }
 0x19f   :  { %v137_v62 = vmul.f32 %v135_v61, %v103_v34 }
 0x1a1   :  { %v142_v63 = vmul.f32 %v168_v51, %v137_v62 }
 0x1a3   :  { %v147_v0 = vadd.f32 %v169_v54, %v142_v63 }
 0x1a5   :  { %149 = vst.msk [vmem:[%s257_s6 + $0x8] sm:$0xff] %vm28_vm0, %v147_v0 }

// kernel: transformer_stt_forward.44
= control target key start
LH: loop header
LB: loop body
LE: loop exit
PB: predicated region body
PF: predicated region fallthrough
CT: control target
= control target key end

     0   :  { %s762_s15 = smov 0   ;;  %s764_s16 = smov 0   ;;  %s835_s0 = inlined_call_operand.vmem [shape: bf16[2,8,16], index: 0, kind: input, shape index: {}]   ;;  %s836_s1 = inlined_call_operand.vmem [shape: bf16[2,8,16], index: 1, kind: input, shape index: {}]   ;;  %s837_s2 = inlined_call_operand.vmem [shape: bf16[2,8,16], index: 2, kind: input, shape index: {}]   ;;  %s838_s3 = inlined_call_operand.vmem [shape: f32[2,1,8], index: 3, kind: input, shape index: {}]   ;;  %s839_s4 = inlined_call_operand.vmem [shape: bf16[2,8,16], index: 4, kind: output, shape index: {}]  }
   0x1   :  { %s766_s17 = smov 0  }
   0x2 LB: > { %s33_s18 = sadd.s32 1, %s726_s16  ;;  %p653_p0 = scmp.ge.s32.totalorder %s730_s17, 1  ;;  %s730_s17 = sphi %s766_s17, %s14_s17   ;;  %s726_s16 = sphi %s764_s16, %s841_s16   ;;  %s722_s15 = sphi %s762_s15, %s840_s15  }
   0x3   : > { %p35_p1 = scmp.ge.s32.totalorder %s33_s18, 2  ;;  %p228_p2 = scmp.lt.s32.totalorder %s730_s17, 3 }
   0x5   : > { %s843_s18 = smov (%p35_p1, %s33_s18), 0  ;;  %p229_p3 = pnand %p653_p0, %p228_p2 }
   0x6   : > { %p278_p4 = scmp.lt.s32.totalorder (!%p229_p3), %s722_s15, 1  ;;  %s732_s26 = smov (!%p229_p3), 120  }
   0x7   : > { %232 = sbr.rel (%p229_p3) target bundleno = 894 (0x37e), region = 36  ;;  %s736_s7 = smov (!%p229_p3), 8  }
   0xc   : > { %s845_s15 = smov (!%p278_p4, %s722_s15), 1  ;;  %vm322_vm0 = vcmask 64512   ;;  %vm317_vm1 = vcmask 7168   ;;  %v733_v7 = vmov -inf   ;;  %v734_v17 = vmov 0  }
   0xd   : > { %s780_s19 = sshll.u32 %s845_s15, 2  ;;  %s304_s29 = scalar_lea.vmem %s838_s3, %s845_s15  ;;  %318 = vst.msk [vmem:[#allocation2] sm:$0xff] %vm317_vm1, %v733_v7  ;;  %694 = vset.pattern.permute.xlu0 %v734_v17  ;;  %693 = vset.pattern.permute.xlu1 %v734_v17  ;;  %vm389_vm2 = vcmask 1043456   ;;  %v735_v31 = vmov 0.0   ;;  %vm528_vm3 = vcmask 125952  }
   0xe   : > { %s291_s22 = scalar_lea.vmem %s836_s1, %s780_s19  ;;  %s284_s25 = scalar_lea.vmem %s835_s0, %s780_s19  ;;  %319 = vst.msk [vmem:[#allocation2 + $0x8] sm:$0xff] %vm317_vm1, %v733_v7  ;;  %v695_v11 = vld [vmem:[%s304_s29] ss:$0 sm:$0xff] }
   0xf   : > { %v326_v0 = vld [vmem:[%s291_s22] sm:$0xf]  ;;  %s298_s6 = scalar_lea.vmem %s837_s2, %s780_s19  ;;  %320 = vst.msk [vmem:[#allocation3] sm:$0xff] %vm317_vm1, %v735_v31  ;;  %s311_s10 = scalar_lea.vmem %s839_s4, %s780_s19 }
  0x10   : > { %v334_v1 = vsel %vm322_vm0, %v326_v0, 0  ;;  %v415_v2 = vunpack.c.l.b16 %v326_v0  ;;  %v325_v3 = vld [vmem:[%s284_s25] sm:$0xf]  ;;  %324 = vst.msk [vmem:[#allocation4 + $0x8] sm:$0xff] %vm322_vm0, %v735_v31 }
  0x11   : > { %343 = vmatpush.bf16.xpose.msra.mxu0 %v334_v1  ;;  %v410_v5 = vunpack.c.l.b16 %v325_v3  ;;  %v327_v18 = vld [vmem:[%s298_s6] sm:$0xf]  ;;  %321 = vst.msk [vmem:[#allocation3 + $0x8] sm:$0xff] %vm317_vm1, %v735_v31 }
  0x12   : > { %v416_v4 = vpack.c.b16 %v415_v2, %v415_v2  ;;  %v475_v19 = vunpack.c.l.b16 %v327_v18  ;;  %v391_v30 = vsel %vm389_vm2, %v327_v18, 0  ;;  %323 = vst.msk [vmem:[#allocation4] sm:$0xff] %vm322_vm0, %v735_v31 }
  0x13   : > { %v411_v6 = vpack.c.b16 %v410_v5, %v410_v5  ;;  %400 = vmatpush.bf16.msra.mxu1 %v391_v30 }
  0x14   : > { %417 = vrot.lane.b32.xlu0 %v416_v4, %s732_s26  ;;  %v476_v20 = vpack.c.b16 %v475_v19, %v475_v19  ;;  %v354_v21 = vld [vmem:[#allocation2] sm:$0xff] }
  0x15   : > { %v441_v35 = vld [vmem:[#allocation2 + $0x8] sm:$0xff] }
  0x16   : > { %v370_v48 = vld [vmem:[#allocation3] sm:$0xff] }
  0x17   : > { %v466_v1 = vld [vmem:[#allocation4 + $0x8] sm:$0xff] }
  0x18   : > { %658 = vmatmul.msk.bf16.vlgmr.msra.gmra.mxu0 %vm322_vm0, %v325_v3  ;;  %v458_v60 = vld [vmem:[#allocation3 + $0x8] sm:$0xff] }
  0x1c   : > { %412 = vrot.lane.b32.xlu0 %v411_v6, %s732_s26 }
  0x86   : > { %v418_v8 = vpop.permute.xlu0 %417 }
  0x87   : > { %v423_v9 = vsel %vm322_vm0, %v418_v8, 0 }
  0x88   : > { %432 = vmatpush.bf16.xpose.msra.mxu2 %v423_v9 }
  0x8e   : > { %v413_v10 = vpop.permute.xlu0 %412 }
  0x8f   : > { %660 = vmatmul.msk.bf16.vlgmr.msra.gmra.mxu2 %vm322_vm0, %v413_v10 }
  0x95   : > { %v345_v12 = vpop.f32.mrf.mxu0 }
  0x96   : > { %v349_v13 = vmul.f32 0.35355338, %v345_v12 }
  0x98   : > { %v353_v14 = vadd.f32 %v695_v11, %v349_v13  ;;  %v378_v13 = vld [vmem:[#allocation4] sm:$0xff] }
  0x9a   : > { %v355_v15 = vsel %vm322_vm0, %v353_v14, -inf }
  0x9b   : > { %356 = vmax.xlane.f32.xlu2 %v355_v15 }
  0x9d   : > { %v347_v16 = vpop.f32.mrf.mxu0 }
  0xb3   : > { %477 = vrot.lane.b32.xlu2 %v476_v20, %s732_s26 }
 0x10e   : > { %v357_v22 = vpop.xlane.xlu2 %356 }
 0x10f   : > { %v358_v23 = vmax.f32 %v354_v21, %v357_v22 }
 0x111   : > { %v359_v24 = vsub.f32 %v354_v21, %v358_v23  ;;  %408 = vst.msk [vmem:[#allocation2] sm:$0xff] %vm317_vm1, %v358_v23  ;;  %364 = vperm.xlu0 %694, %v358_v23  }
 0x112   : > { %v434_v25 = vpop.f32.mrf.mxu2 }
 0x113   : > { %v438_v26 = vmul.f32 0.35355338, %v434_v25  ;;  %v360_v46 = vmul.f32 1.442695, %v359_v24 }
 0x115   : > { %v439_v27 = vadd.f32 %v695_v11, %v438_v26 }
 0x116   : > { %v478_v44 = vpop.permute.xlu2 %477 }
 0x117   : > { %v442_v28 = vsel %vm322_vm0, %v439_v27, -inf  ;;  %v483_v45 = vsel %vm389_vm2, %v478_v44, 0 }
 0x118   : > { %443 = vmax.xlane.f32.xlu1 %v442_v28  ;;  %492 = vmatpush.bf16.msra.mxu3 %v483_v45 }
 0x11a   : > { %v436_v29 = vpop.f32.mrf.mxu2 }
 0x183   : > { %v365_v32 = vpop.permute.xlu0 %364 }
 0x184   : > { %v367_v33 = vsub.f32 %v353_v14, %v365_v32 }
 0x186   : > { %v368_v34 = vmul.f32 1.442695, %v367_v33 }
 0x188   : > { %696 = vpow2.f32 %v368_v34 }
 0x18b   : > { %v444_v36 = vpop.xlane.xlu1 %443 }
 0x18c   : > { %v445_v37 = vmax.f32 %v441_v35, %v444_v36 }
 0x18e   : > { %v697_v38 = vpop.eup %696  ;;  %v446_v39 = vsub.f32 %v441_v35, %v445_v37  ;;  %500 = vst.msk [vmem:[#allocation2 + $0x8] sm:$0xff] %vm317_vm1, %v445_v37  ;;  %451 = vperm.xlu1 %693, %v445_v37  }
 0x18f   : > { %v372_v40 = vsel %vm322_vm0, %v697_v38, 0.0  ;;  %v385_v41 = vpack.c.bf16 %v697_v38, %v697_v38 }
 0x190   : > { %v447_v42 = vmul.f32 1.442695, %v446_v39  ;;  %373 = vadd.xlane.f32.xlu2 %v372_v40 }
 0x191   : > { %659 = vmatmul.msk.bf16.vlgmr.msra.gmra.mxu1 %vm322_vm0, %v385_v41 }
 0x192   : > { %698 = vpow2.f32 %v447_v42 }
 0x193   : > { %700 = vpow2.f32 %v360_v46 }
 0x198   : > { %v699_v43 = vpop.eup %698 }
 0x199   : > { %469 = vperm.xlu1 %693, %v699_v43   ;;  %v701_v47 = vpop.eup %700  ;;  %v459_v61 = vmul.f32 %v699_v43, %v458_v60 }
 0x19a   : > { %v371_v51 = vmul.f32 %v701_v47, %v370_v48 }
 0x200   : > { %v452_v49 = vpop.permute.xlu1 %451 }
 0x201   : > { %v454_v50 = vsub.f32 %v439_v27, %v452_v49 }
 0x203   : > { %v455_v52 = vmul.f32 1.442695, %v454_v50  ;;  %v374_v53 = vpop.xlane.xlu2 %373 }
 0x204   : > { %v375_v54 = vadd.f32 %v374_v53, %v371_v51 }
 0x205   : > { %702 = vpow2.f32 %v455_v52 }
 0x206   : > { %377 = vst.msk [vmem:[#allocation3] sm:$0xff] %vm317_vm1, %v375_v54 }
 0x20b   : > { %v703_v55 = vpop.eup %702  ;;  %v470_v2 = vpop.permute.xlu1 %469 }
 0x20c   : > { %v460_v56 = vsel %vm322_vm0, %v703_v55, 0.0  ;;  %v473_v57 = vpack.c.bf16 %v703_v55, %v703_v55  ;;  %v472_v3 = vmul.f32 %v470_v2, %v466_v1 }
 0x20d   : > { %461 = vadd.xlane.f32.xlu0 %v460_v56  ;;  %v505_v7 = vld [vmem:[#allocation3] sm:$0xff] }
 0x20e   : > { %v402_v58 = vpop.f32.mrf.mxu1  ;;  %661 = vmatmul.msk.bf16.vlgmr.msra.gmra.mxu3 %vm322_vm0, %v473_v57 }
 0x216   : > { %v404_v59 = vpop.f32.mrf.mxu1 }
 0x280   : > { %v462_v62 = vpop.xlane.xlu0 %461 }
 0x281   : > { %v463_v63 = vadd.f32 %v462_v62, %v459_v61 }
 0x283   : > { %464 = vst.msk [vmem:[#allocation3 + $0x8] sm:$0xff] %vm317_vm1, %v463_v63 }
 0x28a   : > { %v514_v0 = vld [vmem:[#allocation3 + $0x8] sm:$0xff] }
 0x28b   : > { %704 = vrcp.f32 %v514_v0 }
 0x28c   : > { %706 = vrcp.f32 %v505_v7 }
 0x291   : > { %v705_v4 = vpop.eup %704  ;;  %v494_v5 = vpop.f32.mrf.mxu3 }
 0x292   : > { %v498_v6 = vadd.f32 %v494_v5, %v472_v3  ;;  %518 = vperm.xlu1 %693, %v705_v4   ;;  %v707_v9 = vpop.eup %706 }
 0x294   : > { %499 = vst.msk [vmem:[#allocation4 + $0x8] sm:$0xff] %vm322_vm0, %v498_v6 }
 0x299   : > { %v496_v8 = vpop.f32.mrf.mxu3 }
 0x29a   : > { %381 = vperm.xlu1 %693, %v701_v47  }
 0x29b   : > { %v513_v11 = vld [vmem:[#allocation4 + $0x8] sm:$0xff] }
 0x2a2   : > { %509 = vperm.xlu1 %693, %v707_v9  }
 0x304   : > { %v519_v10 = vpop.permute.xlu1 %518 }
 0x305   : > { %v521_v12 = vmul.f32 %v519_v10, %v513_v11 }
 0x307   : > { %523 = vrot.lane.b32.xlu1 %v521_v12, %s736_s7 }
 0x30c   : > { %v382_v14 = vpop.permute.xlu1 %381 }
 0x30d   : > { %v384_v15 = vmul.f32 %v382_v14, %v378_v13 }
 0x30f   : > { %v406_v16 = vadd.f32 %v402_v58, %v384_v15 }
 0x311   : > { %407 = vst.msk [vmem:[#allocation4] sm:$0xff] %vm322_vm0, %v406_v16 }
 0x314   : > { %v510_v17 = vpop.permute.xlu1 %509 }
 0x318   : > { %v504_v18 = vld [vmem:[#allocation4] sm:$0xff] }
 0x319   : > { %v512_v19 = vmul.f32 %v510_v17, %v504_v18 }
 0x379   : > { %v524_v20 = vpop.permute.xlu1 %523 }
 0x37a   : > { %v526_v21 = vsel %vm322_vm0, %v512_v19, %v524_v20 }
 0x37b   : > { %v527_v22 = vpack.c.bf16 %v526_v21, %v526_v21 }
 0x37d   : > { %529 = vst.msk [vmem:[%s311_s10] sm:$0xf] %vm528_vm3, %v527_v22 }
 0x37e PF: > { %s14_s17 = sadd.s32 1, %s730_s17   ;;  %s840_s15 = smov %s726_s16 }
 0x37f   : > { %p11_p5 = scmp.ge.s32.totalorder %s14_s17, 4   ;;  %s841_s16 = smov %s843_s18 }
 0x381   :  { %13 = sbr.rel (!%p11_p5) target bundleno = 2 (0x2), region = 86 }

// kernel: transformer_stt_forward.46
= control target key start
LH: loop header
LB: loop body
LE: loop exit
PB: predicated region body
PF: predicated region fallthrough
CT: control target
= control target key end

     0   :  { %vm19_vm0 = vcmask 261120   ;;  %v88_v3 = vmov 0.0   ;;  %vm35_vm1 = vcmask 130048   ;;  %vm73_vm2 = vcmask 257024   ;;  %s131_s1 = inlined_call_operand.vmem [shape: bf16[16,32], index: 1, kind: input, shape index: {}]   ;;  %s132_s0 = inlined_call_operand.vmem [shape: f32[16,16], index: 0, kind: input, shape index: {}]   ;;  %s133_s2 = inlined_call_operand.vmem [shape: f32[1,32], index: 2, kind: input, shape index: {}]   ;;  %s134_s3 = inlined_call_operand.vmem [shape: bf16[16,32], index: 3, kind: output, shape index: {}]  }
   0x1   :  { %v85_v0 = vld [vmem:[%s131_s1] sm:$0xff]  ;;  %v23_v2 = vld [vmem:[%s132_s0 + $0x8] sm:$0xff]  ;;  %20 = vst.msk [vmem:[#allocation2] sm:$0xff] %vm19_vm0, %v88_v3 }
   0x2   :  { %v22_v1 = vld [vmem:[%s132_s0] sm:$0xff]  ;;  %21 = vst.msk [vmem:[#allocation2 + $0x8] sm:$0xff] %vm19_vm0, %v88_v3  ;;  %46 = vmatpush.bf16.msra.mxu0 %v85_v0 }
   0x3   :  { %v24_v4 = vpack.c.bf16 %v23_v2, %v22_v1  ;;  %v87_v9 = vld [vmem:[%s133_s2] ss:$0 sm:$0xff] }
   0x5   :  { %84 = vmatmul.msk.bf16.vlgmr.msra.gmra.mxu0 %vm35_vm1, %v24_v4 }
   0x8   :  { %v25_v5 = vld [vmem:[#allocation2] sm:$0xff] }
   0x9   :  { %v26_v8 = vld [vmem:[#allocation2 + $0x8] sm:$0xff] }
  0x82   :  { %v48_v6 = vpop.f32.mrf.mxu0 }
  0x83   :  { %v53_v7 = vadd.f32 %v48_v6, %v25_v5 }
  0x85   :  { %56 = vst.msk [vmem:[#allocation2] sm:$0xff] %vm19_vm0, %v53_v7 }
  0x8a   :  { %v50_v10 = vpop.f32.mrf.mxu0 }
  0x8b   :  { %v54_v11 = vadd.f32 %v50_v10, %v26_v8 }
  0x8c   :  { %v61_v12 = vld [vmem:[#allocation2] sm:$0xff] }
  0x8d   :  { %v67_v13 = vadd.f32 %v87_v9, %v61_v12  ;;  %57 = vst.msk [vmem:[#allocation2 + $0x8] sm:$0xff] %vm19_vm0, %v54_v11 }
  0x8f   :  { %v69_v14 = vmax.f32 %v67_v13, 0.0 }
  0x91   :  { %v71_v15 = vpack.c.bf16 %v69_v14, %v69_v14 }
  0x93   :  { %74 = vst.msk [vmem:[%s134_s3] sm:$0xf] %vm73_vm2, %v71_v15 }
  0x94   :  { %v62_v16 = vld [vmem:[#allocation2 + $0x8] sm:$0xff] }
  0x95   :  { %v68_v17 = vadd.f32 %v87_v9, %v62_v16 }
  0x97   :  { %v70_v18 = vmax.f32 %v68_v17, 0.0 }
  0x99   :  { %v72_v19 = vpack.c.bf16 %v70_v18, %v70_v18 }
  0x9b   :  { %75 = vst.msk [vmem:[%s134_s3 + $0x4] sm:$0xf] %vm73_vm2, %v72_v19 }

// kernel: transformer_stt_forward.53
= control target key start
LH: loop header
LB: loop body
LE: loop exit
PB: predicated region body
PF: predicated region fallthrough
CT: control target
= control target key end

     0   :  { %vm18_vm0 = vcmask 130048   ;;  %v95_v4 = vmov 16.0   ;;  %s140_s0 = inlined_call_operand.vmem [shape: f32[16,16], index: 0, kind: input, shape index: {}]   ;;  %s141_s1 = inlined_call_operand.vmem [shape: f32[1,16], index: 1, kind: input, shape index: {}]   ;;  %s142_s2 = inlined_call_operand.vmem [shape: f32[1,16], index: 2, kind: input, shape index: {}]   ;;  %s143_s3 = inlined_call_operand.vmem [shape: f32[16,16], index: 3, kind: output, shape index: {}]  }
   0x1   :  { %v14_v0 = vld [vmem:[%s140_s0] sm:$0xff]  ;;  %v15_v2 = vld [vmem:[%s140_s0 + $0x8] sm:$0xff]  ;;  %89 = vrcp.f32 %v95_v4 }
   0x2   :  { %v19_v1 = vsel %vm18_vm0, %v14_v0, 0.0  ;;  %v22_v3 = vsel %vm18_vm0, %v15_v2, 0.0  ;;  %v87_v35 = vld [vmem:[%s141_s1] ss:$0 sm:$0xff] }
   0x3   :  { %20 = vadd.xlane.f32.xlu0 %v19_v1  ;;  %v88_v38 = vld [vmem:[%s142_s2] ss:$0 sm:$0xff] }
   0x7   :  { %v90_v5 = vpop.eup %89 }
   0x8   :  { %v26_v6 = vmul.f32 16.0, %v90_v5  ;;  %vm30_vm1 = vweird.f32 %v90_v5 }
   0xa   :  { %v27_v7 = vsub.f32 1.0, %v26_v6 }
   0xb   :  { %23 = vadd.xlane.f32.xlu0 %v22_v3 }
   0xc   :  { %v28_v8 = vmul.f32 %v90_v5, %v27_v7 }
   0xe   :  { %v29_v9 = vadd.f32 %v90_v5, %v28_v8 }
  0x10   :  { %v31_v10 = vsel %vm30_vm1, %v90_v5, %v29_v9 }
  0x76   :  { %v21_v11 = vpop.xlane.xlu0 %20 }
  0x77   :  { %v32_v12 = vmul.f32 %v31_v10, %v21_v11 }
  0x79   :  { %v34_v13 = vsub.f32 %v14_v0, %v32_v12 }
  0x7b   :  { %v36_v14 = vmul.f32 %v34_v13, %v34_v13 }
  0x7d   :  { %v38_v15 = vsel %vm18_vm0, %v36_v14, 0.0 }
  0x7e   :  { %39 = vadd.xlane.f32.xlu1 %v38_v15  ;;  %v24_v16 = vpop.xlane.xlu0 %23 }
  0x7f   :  { %v33_v17 = vmul.f32 %v31_v10, %v24_v16 }
  0x81   :  { %v35_v18 = vsub.f32 %v15_v2, %v33_v17 }
  0x83   :  { %v37_v19 = vmul.f32 %v35_v18, %v35_v18 }
  0x85   :  { %v41_v20 = vsel %vm18_vm0, %v37_v19, 0.0 }
  0x86   :  { %42 = vadd.xlane.f32.xlu1 %v41_v20 }
  0xf1   :  { %v40_v21 = vpop.xlane.xlu1 %39 }
  0xf2   :  { %v44_v22 = vmul.f32 %v40_v21, %v31_v10 }
  0xf4   :  { %v46_v23 = vadd.f32 1e-05, %v44_v22 }
  0xf6   :  { %91 = vrsqrt.f32 %v46_v23  ;;  %vm54_vm3 = vweird.f32 %v46_v23 }
  0xf9   :  { %v43_v24 = vpop.xlane.xlu1 %42 }
  0xfa   :  { %v45_v25 = vmul.f32 %v43_v24, %v31_v10 }
  0xfc   :  { %v92_v26 = vpop.eup %91  ;;  %v47_v27 = vadd.f32 1e-05, %v45_v25 }
  0xfd   :  { %v49_v28 = vmul.f32 %v92_v26, %v46_v23  ;;  %vm55_vm2 = vweird.f32 %v92_v26 }
  0xfe   :  { %93 = vrsqrt.f32 %v47_v27  ;;  %vm56_vm4 = vmor %vm54_vm3, %vm55_vm2  ;;  %vm64_vm6 = vweird.f32 %v47_v27 }
  0xff   :  { %v50_v29 = vmul.f32 %v92_v26, %v49_v28 }
 0x101   :  { %v51_v30 = vmul.f32 0.5, %v50_v29 }
 0x103   :  { %v52_v31 = vsub.f32 1.5, %v51_v30 }
 0x104   :  { %v94_v32 = vpop.eup %93 }
 0x105   :  { %v53_v33 = vmul.f32 %v92_v26, %v52_v31  ;;  %v59_v34 = vmul.f32 %v94_v32, %v47_v27  ;;  %vm65_vm5 = vweird.f32 %v94_v32 }
 0x106   :  { %vm66_vm7 = vmor %vm64_vm6, %vm65_vm5 }
 0x107   :  { %v57_v36 = vsel %vm56_vm4, %v92_v26, %v53_v33  ;;  %v60_v37 = vmul.f32 %v94_v32, %v59_v34 }
 0x108   :  { %v68_v39 = vmul.f32 %v57_v36, %v34_v13 }
 0x109   :  { %v61_v40 = vmul.f32 0.5, %v60_v37 }
 0x10a   :  { %v73_v41 = vmul.f32 %v87_v35, %v68_v39 }
 0x10b   :  { %v62_v42 = vsub.f32 1.5, %v61_v40 }
 0x10c   :  { %v78_v43 = vadd.f32 %v88_v38, %v73_v41 }
 0x10d   :  { %v63_v44 = vmul.f32 %v94_v32, %v62_v42 }
 0x10e   :  { %80 = vst.msk [vmem:[%s143_s3] sm:$0xff] %vm18_vm0, %v78_v43 }
 0x10f   :  { %v67_v45 = vsel %vm66_vm7, %v94_v32, %v63_v44 }
 0x110   :  { %v69_v46 = vmul.f32 %v67_v45, %v35_v18 }
 0x112   :  { %v74_v47 = vmul.f32 %v87_v35, %v69_v46 }
 0x114   :  { %v79_v48 = vadd.f32 %v88_v38, %v74_v47 }
 0x116   :  { %81 = vst.msk [vmem:[%s143_s3 + $0x8] sm:$0xff] %vm18_vm0, %v79_v48 }

// kernel: transformer_stt_forward.58
= control target key start
LH: loop header
LB: loop body
LE: loop exit
PB: predicated region body
PF: predicated region fallthrough
CT: control target
= control target key end

     0   :  { %s531_s12 = smov 0   ;;  %s533_s13 = smov 0   ;;  %s578_s0 = inlined_call_operand.vmem [shape: f32[16,16], index: 0, kind: input, shape index: {}]   ;;  %s579_s1 = inlined_call_operand.vmem [shape: bf16[2,16,16], index: 1, kind: input, shape index: {}]   ;;  %s580_s2 = inlined_call_operand.vmem [shape: f32[2,1,16], index: 2, kind: input, shape index: {}]   ;;  %s581_s3 = inlined_call_operand.vmem [shape: bf16[2,16,16], index: 3, kind: output, shape index: {}]  }
   0x1   :  { %s535_s14 = smov 0  }
   0x2 LB: > { %s28_s15 = sadd.s32 1, %s504_s13  ;;  %p445_p0 = scmp.ge.s32.totalorder %s508_s14, 1  ;;  %s508_s14 = sphi %s535_s14, %s13_s14   ;;  %s504_s13 = sphi %s533_s13, %s583_s13   ;;  %s500_s12 = sphi %s531_s12, %s582_s12  }
   0x3   : > { %p30_p1 = scmp.ge.s32.totalorder %s28_s15, 2  ;;  %p189_p2 = scmp.lt.s32.totalorder %s508_s14, 3 }
   0x5   : > { %s585_s15 = smov (%p30_p1, %s28_s15), 0  ;;  %p190_p3 = pnand %p445_p0, %p189_p2 }
   0x6   : > { %p242_p4 = scmp.lt.s32.totalorder (!%p190_p3), %s500_s12, 1 }
   0x7   : > { %193 = sbr.rel (%p190_p3) target bundleno = 168 (0xa8), region = 32 }
   0xc   : > { %vm269_vm0 = vcmask 130048   ;;  %v510_v0 = vmov 0.0   ;;  %s587_s12 = smov (!%p242_p4, %s500_s12), 1  ;;  %v272_v1 = vld [vmem:[%s578_s0] sm:$0xff]  ;;  %v273_v2 = vld [vmem:[%s578_s0 + $0x8] sm:$0xff]  ;;  %vm320_vm1 = vcmask 125952  }
   0xd   : > { %270 = vst.msk [vmem:[#allocation2] sm:$0xff] %vm269_vm0, %v510_v0  ;;  %s457_s16 = sshll.u32 %s587_s12, 3  ;;  %s253_s19 = scalar_lea.vmem %s580_s2, %s587_s12  ;;  %v274_v4 = vpack.c.bf16 %v273_v2, %v272_v1 }
   0xe   : > { %271 = vst.msk [vmem:[#allocation2 + $0x8] sm:$0xff] %vm269_vm0, %v510_v0  ;;  %s249_s26 = scalar_lea.vmem %s579_s1, %s457_s16  ;;  %v485_v9 = vld [vmem:[%s253_s19] ss:$0 sm:$0xff]  ;;  %s262_s29 = scalar_lea.vmem %s581_s3, %s457_s16 }
   0xf   : > { %v459_v3 = vld [vmem:[%s249_s26] sm:$0xff] }
  0x10   : > { %296 = vmatpush.bf16.msra.mxu0 %v459_v3 }
  0x13   : > { %454 = vmatmul.msk.bf16.vlgmr.msra.gmra.mxu0 %vm269_vm0, %v274_v4 }
  0x14   : > { %v275_v5 = vld [vmem:[#allocation2] sm:$0xff] }
  0x15   : > { %v276_v8 = vld [vmem:[#allocation2 + $0x8] sm:$0xff] }
  0x90   : > { %v298_v6 = vpop.f32.mrf.mxu0 }
  0x91   : > { %v303_v7 = vadd.f32 %v298_v6, %v275_v5 }
  0x93   : > { %305 = vst.msk [vmem:[#allocation2] sm:$0xff] %vm269_vm0, %v303_v7 }
  0x98   : > { %v300_v10 = vpop.f32.mrf.mxu0 }
  0x99   : > { %v304_v11 = vadd.f32 %v300_v10, %v276_v8 }
  0x9a   : > { %v310_v12 = vld [vmem:[#allocation2] sm:$0xff] }
  0x9b   : > { %v316_v13 = vadd.f32 %v485_v9, %v310_v12  ;;  %306 = vst.msk [vmem:[#allocation2 + $0x8] sm:$0xff] %vm269_vm0, %v304_v11 }
  0x9d   : > { %v318_v14 = vpack.c.bf16 %v316_v13, %v316_v13 }
  0x9f   : > { %321 = vst.msk [vmem:[%s262_s29] sm:$0xf] %vm320_vm1, %v318_v14 }
  0xa2   : > { %v311_v15 = vld [vmem:[#allocation2 + $0x8] sm:$0xff] }
  0xa3   : > { %v317_v16 = vadd.f32 %v485_v9, %v311_v15 }
  0xa5   : > { %v319_v17 = vpack.c.bf16 %v317_v16, %v317_v16 }
  0xa7   : > { %322 = vst.msk [vmem:[%s262_s29 + $0x4] sm:$0xf] %vm320_vm1, %v319_v17 }
  0xa8 PF: > { %s13_s14 = sadd.s32 1, %s508_s14   ;;  %s582_s12 = smov %s504_s13 }
  0xa9   : > { %p10_p5 = scmp.ge.s32.totalorder %s13_s14, 4   ;;  %s583_s13 = smov %s585_s15 }
  0xab   :  { %12 = sbr.rel (!%p10_p5) target bundleno = 2 (0x2), region = 76 }

// kernel: transformer_stt_forward.47
= control target key start
LH: loop header
LB: loop body
LE: loop exit
PB: predicated region body
PF: predicated region fallthrough
CT: control target
= control target key end

     0   :  { %vm28_vm0 = vcmask 130048   ;;  %v190_v1 = vmov 0.0   ;;  %vm56_vm1 = vcmask 261120   ;;  %v191_v21 = vmov 16.0   ;;  %s267_s1 = inlined_call_operand.vmem [shape: bf16[32,16], index: 1, kind: input, shape index: {}]   ;;  %s268_s0 = inlined_call_operand.vmem [shape: bf16[16,32], index: 0, kind: input, shape index: {}]   ;;  %s269_s2 = inlined_call_operand.vmem [shape: f32[1,16], index: 2, kind: input, shape index: {}]   ;;  %s270_s3 = inlined_call_operand.vmem [shape: f32[16,16], index: 3, kind: input, shape index: {}]   ;;  %s271_s4 = inlined_call_operand.vmem [shape: f32[1,16], index: 4, kind: input, shape index: {}]   ;;  %s272_s5 = inlined_call_operand.vmem [shape: f32[1,16], index: 5, kind: input, shape index: {}]   ;;  %s273_s6 = inlined_call_operand.vmem [shape: f32[16,16], index: 6, kind: output, shape index: {}]  }
   0x1   :  { %v178_v0 = vld [vmem:[%s267_s1 + $0x8] sm:$0xff]  ;;  %29 = vst.msk [vmem:[#allocation2] sm:$0xff] %vm28_vm0, %v190_v1  ;;  %v177_v2 = vld [vmem:[%s267_s1] sm:$0xff]  ;;  %184 = vrcp.f32 %v191_v21 }
   0x2   :  { %30 = vst.msk [vmem:[#allocation2 + $0x8] sm:$0xff] %vm28_vm0, %v190_v1  ;;  %66 = vmatpush.bf16.msra.mxu0 %v178_v0  ;;  %v176_v3 = vld [vmem:[%s268_s0] sm:$0xff]  ;;  %v91_v17 = vld [vmem:[%s270_s3 + $0x8] sm:$0xff] }
   0x3   :  { %v181_v8 = vld [vmem:[%s269_s2] ss:$0 sm:$0xff] }
   0x4   :  { %v90_v12 = vld [vmem:[%s270_s3] sm:$0xff] }
   0x5   :  { %v182_v52 = vld [vmem:[%s271_s4] ss:$0 sm:$0xff] }
   0x6   :  { %67 = vmatpush.bf16.msra.mxu0 %v177_v2  ;;  %v183_v55 = vld [vmem:[%s272_s5] ss:$0 sm:$0xff] }
   0x7   :  { %v185_v22 = vpop.eup %184 }
   0x8   :  { %v33_v4 = vld [vmem:[#allocation2] sm:$0xff]  ;;  %v103_v23 = vmul.f32 16.0, %v185_v22  ;;  %vm107_vm2 = vweird.f32 %v185_v22 }
   0x9   :  { %175 = vmatmul.msk.bf16.vlgmr.msra.gmra.mxu0 %vm56_vm1, %v176_v3  ;;  %v34_v7 = vld [vmem:[#allocation2 + $0x8] sm:$0xff] }
   0xa   :  { %v104_v24 = vsub.f32 1.0, %v103_v23 }
   0xc   :  { %v105_v25 = vmul.f32 %v185_v22, %v104_v24 }
   0xe   :  { %v106_v26 = vadd.f32 %v185_v22, %v105_v25 }
  0x10   :  { %v108_v27 = vsel %vm107_vm2, %v185_v22, %v106_v26 }
  0x86   :  { %v69_v5 = vpop.f32.mrf.mxu0 }
  0x87   :  { %v74_v6 = vadd.f32 %v69_v5, %v33_v4 }
  0x89   :  { %77 = vst.msk [vmem:[#allocation2] sm:$0xff] %vm28_vm0, %v74_v6 }
  0x8e   :  { %v71_v9 = vpop.f32.mrf.mxu0 }
  0x8f   :  { %v75_v10 = vadd.f32 %v71_v9, %v34_v7 }
  0x90   :  { %v82_v11 = vld [vmem:[#allocation2] sm:$0xff] }
  0x91   :  { %78 = vst.msk [vmem:[#allocation2 + $0x8] sm:$0xff] %vm28_vm0, %v75_v10  ;;  %v88_v13 = vadd.f32 %v181_v8, %v82_v11 }
  0x93   :  { %v92_v14 = vadd.f32 %v90_v12, %v88_v13 }
  0x95   :  { %v96_v15 = vsel %vm28_vm0, %v92_v14, 0.0 }
  0x96   :  { %97 = vadd.xlane.f32.xlu0 %v96_v15 }
  0x98   :  { %v83_v16 = vld [vmem:[#allocation2 + $0x8] sm:$0xff] }
  0x99   :  { %v89_v18 = vadd.f32 %v181_v8, %v83_v16 }
  0x9b   :  { %v93_v19 = vadd.f32 %v91_v17, %v89_v18 }
  0x9d   :  { %v99_v20 = vsel %vm28_vm0, %v93_v19, 0.0 }
  0x9e   :  { %100 = vadd.xlane.f32.xlu0 %v99_v20 }
 0x109   :  { %v98_v28 = vpop.xlane.xlu0 %97 }
 0x10a   :  { %v109_v29 = vmul.f32 %v108_v27, %v98_v28 }
 0x10c   :  { %v111_v30 = vsub.f32 %v92_v14, %v109_v29 }
 0x10e   :  { %v113_v31 = vmul.f32 %v111_v30, %v111_v30 }
 0x110   :  { %v115_v32 = vsel %vm28_vm0, %v113_v31, 0.0 }
 0x111   :  { %116 = vadd.xlane.f32.xlu1 %v115_v32  ;;  %v101_v33 = vpop.xlane.xlu0 %100 }
 0x112   :  { %v110_v34 = vmul.f32 %v108_v27, %v101_v33 }
 0x114   :  { %v112_v35 = vsub.f32 %v93_v19, %v110_v34 }
 0x116   :  { %v114_v36 = vmul.f32 %v112_v35, %v112_v35 }
 0x118   :  { %v118_v37 = vsel %vm28_vm0, %v114_v36, 0.0 }
 0x119   :  { %119 = vadd.xlane.f32.xlu1 %v118_v37 }
 0x184   :  { %v117_v38 = vpop.xlane.xlu1 %116 }
 0x185   :  { %v121_v39 = vmul.f32 %v117_v38, %v108_v27 }
 0x187   :  { %v123_v40 = vadd.f32 1e-05, %v121_v39 }
 0x189   :  { %186 = vrsqrt.f32 %v123_v40  ;;  %vm131_vm4 = vweird.f32 %v123_v40 }
 0x18c   :  { %v120_v41 = vpop.xlane.xlu1 %119 }
 0x18d   :  { %v122_v42 = vmul.f32 %v120_v41, %v108_v27 }
 0x18f   :  { %v187_v43 = vpop.eup %186  ;;  %v124_v44 = vadd.f32 1e-05, %v122_v42 }
 0x190   :  { %v126_v45 = vmul.f32 %v187_v43, %v123_v40  ;;  %vm132_vm3 = vweird.f32 %v187_v43 }
 0x191   :  { %188 = vrsqrt.f32 %v124_v44  ;;  %vm133_vm5 = vmor %vm131_vm4, %vm132_vm3  ;;  %vm141_vm7 = vweird.f32 %v124_v44 }
 0x192   :  { %v127_v46 = vmul.f32 %v187_v43, %v126_v45 }
 0x194   :  { %v128_v47 = vmul.f32 0.5, %v127_v46 }
 0x196   :  { %v129_v48 = vsub.f32 1.5, %v128_v47 }
 0x197   :  { %v189_v49 = vpop.eup %188 }
 0x198   :  { %v130_v50 = vmul.f32 %v187_v43, %v129_v48  ;;  %v136_v51 = vmul.f32 %v189_v49, %v124_v44  ;;  %vm142_vm6 = vweird.f32 %v189_v49 }
 0x199   :  { %vm143_vm8 = vmor %vm141_vm7, %vm142_vm6 }
 0x19a   :  { %v134_v53 = vsel %vm133_vm5, %v187_v43, %v130_v50  ;;  %v137_v54 = vmul.f32 %v189_v49, %v136_v51 }
 0x19b   :  { %v145_v56 = vmul.f32 %v134_v53, %v111_v30 }
 0x19c   :  { %v138_v57 = vmul.f32 0.5, %v137_v54 }
 0x19d   :  { %v150_v58 = vmul.f32 %v182_v52, %v145_v56 }
 0x19e   :  { %v139_v59 = vsub.f32 1.5, %v138_v57 }
 0x19f   :  { %v155_v60 = vadd.f32 %v183_v55, %v150_v58 }
 0x1a0   :  { %v140_v61 = vmul.f32 %v189_v49, %v139_v59 }
 0x1a1   :  { %157 = vst.msk [vmem:[%s273_s6] sm:$0xff] %vm28_vm0, %v155_v60 }
 0x1a2   :  { %v144_v62 = vsel %vm143_vm8, %v189_v49, %v140_v61 }
 0x1a3   :  { %v146_v63 = vmul.f32 %v144_v62, %v112_v35 }
 0x1a5   :  { %v151_v0 = vmul.f32 %v182_v52, %v146_v63 }
 0x1a7   :  { %v156_v1 = vadd.f32 %v183_v55, %v151_v0 }
 0x1a9   :  { %158 = vst.msk [vmem:[%s273_s6 + $0x8] sm:$0xff] %vm28_vm0, %v156_v1 }

// kernel: transformer_stt_forward.57
= control target key start
LH: loop header
LB: loop body
LE: loop exit
PB: predicated region body
PF: predicated region fallthrough
CT: control target
= control target key end

     0   :  { %vm19_vm0 = vcmask 130048   ;;  %v85_v3 = vmov 0.0   ;;  %vm70_vm1 = vcmask 125952   ;;  %s129_s1 = inlined_call_operand.vmem [shape: bf16[16,16], index: 1, kind: input, shape index: {}]   ;;  %s130_s0 = inlined_call_operand.vmem [shape: f32[16,16], index: 0, kind: input, shape index: {}]   ;;  %s131_s2 = inlined_call_operand.vmem [shape: f32[1,16], index: 2, kind: input, shape index: {}]   ;;  %s132_s3 = inlined_call_operand.vmem [shape: bf16[16,16], index: 3, kind: output, shape index: {}]  }
   0x1   :  { %v82_v0 = vld [vmem:[%s129_s1] sm:$0xff]  ;;  %v23_v2 = vld [vmem:[%s130_s0 + $0x8] sm:$0xff]  ;;  %20 = vst.msk [vmem:[#allocation2] sm:$0xff] %vm19_vm0, %v85_v3 }
   0x2   :  { %v22_v1 = vld [vmem:[%s130_s0] sm:$0xff]  ;;  %21 = vst.msk [vmem:[#allocation2 + $0x8] sm:$0xff] %vm19_vm0, %v85_v3  ;;  %46 = vmatpush.bf16.msra.mxu0 %v82_v0 }
   0x3   :  { %v24_v4 = vpack.c.bf16 %v23_v2, %v22_v1  ;;  %v84_v9 = vld [vmem:[%s131_s2] ss:$0 sm:$0xff] }
   0x5   :  { %81 = vmatmul.msk.bf16.vlgmr.msra.gmra.mxu0 %vm19_vm0, %v24_v4 }
   0x8   :  { %v25_v5 = vld [vmem:[#allocation2] sm:$0xff] }
   0x9   :  { %v26_v8 = vld [vmem:[#allocation2 + $0x8] sm:$0xff] }
  0x82   :  { %v48_v6 = vpop.f32.mrf.mxu0 }
  0x83   :  { %v53_v7 = vadd.f32 %v48_v6, %v25_v5 }
  0x85   :  { %55 = vst.msk [vmem:[#allocation2] sm:$0xff] %vm19_vm0, %v53_v7 }
  0x8a   :  { %v50_v10 = vpop.f32.mrf.mxu0 }
  0x8b   :  { %v54_v11 = vadd.f32 %v50_v10, %v26_v8 }
  0x8c   :  { %v60_v12 = vld [vmem:[#allocation2] sm:$0xff] }
  0x8d   :  { %v66_v13 = vadd.f32 %v84_v9, %v60_v12  ;;  %56 = vst.msk [vmem:[#allocation2 + $0x8] sm:$0xff] %vm19_vm0, %v54_v11 }
  0x8f   :  { %v68_v14 = vpack.c.bf16 %v66_v13, %v66_v13 }
  0x91   :  { %71 = vst.msk [vmem:[%s132_s3] sm:$0xf] %vm70_vm1, %v68_v14 }
  0x94   :  { %v61_v15 = vld [vmem:[#allocation2 + $0x8] sm:$0xff] }
  0x95   :  { %v67_v16 = vadd.f32 %v84_v9, %v61_v15 }
  0x97   :  { %v69_v17 = vpack.c.bf16 %v67_v16, %v67_v16 }
  0x99   :  { %72 = vst.msk [vmem:[%s132_s3 + $0x4] sm:$0xf] %vm70_vm1, %v69_v17 }

// kernel: transformer_stt_forward.73
= control target key start
LH: loop header
LB: loop body
LE: loop exit
PB: predicated region body
PF: predicated region fallthrough
CT: control target
= control target key end

     0   :  { %vm34_vm0 = vcmask 130048   ;;  %v67_v4 = vlaneseq  ;;  %s151_s1 = inlined_call_operand.vmem [shape: bf16[16,128], index: 1, kind: input, shape index: {}]   ;;  %s152_s0 = inlined_call_operand.vmem [shape: f32[16,16], index: 0, kind: input, shape index: {}]   ;;  %s153_s2 = inlined_call_operand.vmem [shape: f32[1,128], index: 2, kind: input, shape index: {}]   ;;  %s154_s3 = inlined_call_operand.vmem [shape: f32[16,128], index: 3, kind: output, shape index: {}]  }
   0x1   :  { %v103_v0 = vld [vmem:[%s151_s1] sm:$0xff]  ;;  %v22_v2 = vld [vmem:[%s152_s0 + $0x8] sm:$0xff] }
   0x2   :  { %v21_v1 = vld [vmem:[%s152_s0] sm:$0xff]  ;;  %45 = vmatpush.bf16.msra.mxu0 %v103_v0  ;;  %v68_v5 = vand.u32 127, %v67_v4 }
   0x3   :  { %v23_v3 = vpack.c.bf16 %v22_v2, %v21_v1  ;;  %v104_v6 = vld [vmem:[%s153_s2] ss:$0 sm:$0xff] }
   0x4   :  { %vm69_vm1 = vcmp.lt.s32.totalorder %v68_v5, 12 }
   0x5   :  { %102 = vmatmul.msk.bf16.vlgmr.msra.gmra.mxu0 %vm34_vm0, %v23_v3 }
  0x82   :  { %v47_v7 = vpop.f32.mrf.mxu0 }
  0x83   :  { %v65_v8 = vadd.f32 %v104_v6, %v47_v7 }
  0x85   :  { %v70_v9 = vsel %vm69_vm1, %v65_v8, -inf }
  0x86   :  { %72 = vmax.xlane.f32.xlu0 %v70_v9 }
  0x8a   :  { %v49_v10 = vpop.f32.mrf.mxu0 }
  0x8b   :  { %v66_v11 = vadd.f32 %v104_v6, %v49_v10 }
  0x8d   :  { %v71_v12 = vsel %vm69_vm1, %v66_v11, -inf }
  0x8e   :  { %74 = vmax.xlane.f32.xlu0 %v71_v12 }
  0xf9   :  { %v73_v13 = vpop.xlane.xlu0 %72 }
  0xfa   :  { %v76_v14 = vsub.f32 %v70_v9, %v73_v13 }
  0xfc   :  { %v78_v15 = vmul.f32 1.442695, %v76_v14 }
  0xfe   :  { %105 = vpow2.f32 %v78_v15 }
 0x101   :  { %v75_v16 = vpop.xlane.xlu0 %74 }
 0x102   :  { %v77_v17 = vsub.f32 %v71_v12, %v75_v16 }
 0x104   :  { %v106_v18 = vpop.eup %105  ;;  %v80_v19 = vmul.f32 1.442695, %v77_v17 }
 0x105   :  { %82 = vadd.xlane.f32.xlu1 %v106_v18 }
 0x106   :  { %107 = vpow2.f32 %v80_v19 }
 0x10c   :  { %v108_v20 = vpop.eup %107 }
 0x10d   :  { %84 = vadd.xlane.f32.xlu1 %v108_v20 }
 0x178   :  { %v83_v21 = vpop.xlane.xlu1 %82 }
 0x179   :  { %109 = vlog2.f32 %v83_v21 }
 0x17f   :  { %v110_v22 = vpop.eup %109 }
 0x180   :  { %v87_v23 = vmul.f32 0.6931472, %v110_v22  ;;  %v85_v24 = vpop.xlane.xlu1 %84 }
 0x181   :  { %111 = vlog2.f32 %v85_v24 }
 0x182   :  { %v90_v25 = vsub.f32 %v76_v14, %v87_v23 }
 0x184   :  { %92 = vst [vmem:[%s154_s3] sm:$0xff] %v90_v25 }
 0x187   :  { %v112_v26 = vpop.eup %111 }
 0x188   :  { %v89_v27 = vmul.f32 0.6931472, %v112_v26 }
 0x18a   :  { %v91_v28 = vsub.f32 %v77_v17, %v89_v27 }
 0x18c   :  { %93 = vst [vmem:[%s154_s3 + $0x8] sm:$0xff] %v91_v28 }

</bundles_post_ra>
